<compile_context>
chip_gen: v7x
topology: tpu7x:2x2x1
jax: 0.10.0
libtpu: 0.0.40
codegen_flags: <defaults>
</compile_context>

<pallas_src>
import jax
import jax.numpy as jnp
from jax import lax
from jax.experimental import pallas as pl
from jax.experimental.pallas import tpu as pltpu


def bilstm_last_fc_kernel(emb_ref, wih_f_ref, whh_f_ref, b_f_ref,
                          wih_b_ref, b_b_ref, wfc_f_ref, wfc_b_ref, bfc_ref,
                          out_ref, gx_ref):
    T, Bt, E = emb_ref.shape
    H = whh_f_ref.shape[0]

    # ---- hoisted input projection: one big GEMM for all T timesteps (bf16 x bf16 -> f32) ----
    x_all = emb_ref[...].reshape(T * Bt, E)                      # lane/sublane-aligned reshape
    gates_x = jnp.dot(x_all, wih_f_ref[...],
                      preferred_element_type=jnp.float32)        # (T*Bt, 4H) f32
    gx_ref[...] = (gates_x + b_f_ref[...]).reshape(T, Bt, 4 * H)

    h0 = jnp.zeros((Bt, H), jnp.float32)
    c0 = jnp.zeros((Bt, H), jnp.float32)

    # ---- forward recurrence: only the small h @ W_hh stays on the serial path ----
    def step(t, carry):
        h, c = carry
        gates = gx_ref[t] + jnp.dot(h.astype(whh_f_ref.dtype), whh_f_ref[...],
                                    preferred_element_type=jnp.float32)   # (Bt, 4H) f32
        i = jax.nn.sigmoid(gates[:, 0 * H:1 * H])   # H=128 => each slice is 128-lane dense
        f = jax.nn.sigmoid(gates[:, 1 * H:2 * H])
        g = jnp.tanh(gates[:, 2 * H:3 * H])
        o = jax.nn.sigmoid(gates[:, 3 * H:4 * H])
        c_new = f * c + i * g
        h_new = o * jnp.tanh(c_new)
        return (h_new, c_new)

    h_f, _ = lax.fori_loop(0, T, step, (h0, c0), unroll=True)

    # ---- backward direction output at the LAST timestep ----
    # Reverse-direction hidden at position T-1 is its very first step (zero initial state,
    # input x_{T-1}); h_prev = 0 so the W_hh term and f*c_prev vanish.
    gates_b = (jnp.dot(emb_ref[T - 1], wih_b_ref[...],
                       preferred_element_type=jnp.float32) + b_b_ref[...])
    i_b = jax.nn.sigmoid(gates_b[:, 0 * H:1 * H])
    g_b = jnp.tanh(gates_b[:, 2 * H:3 * H])
    o_b = jax.nn.sigmoid(gates_b[:, 3 * H:4 * H])
    h_b = o_b * jnp.tanh(i_b * g_b)

    # ---- fc on [h_f | h_b] without a lane-axis concatenate ----
    # TODO(synk): nn.Dropout applied in eval mode (identity); training mask not modeled.
    out = (jnp.dot(h_f, wfc_f_ref[...], preferred_element_type=jnp.float32)
           + jnp.dot(h_b, wfc_b_ref[...], preferred_element_type=jnp.float32)
           + bfc_ref[...])
    out_ref[...] = out.astype(out_ref.dtype)


def lstm_forward(x_tokens, p, *, b_tile=16):
    """x_tokens: int32 (B, T) token ids. Returns (B, 1) float32 logits."""
    B, T = x_tokens.shape
    E = p['emb'].shape[1]
    H = p['whh_f'].shape[0]
    OUT = p['wfc'].shape[1]
    assert B % b_tile == 0

    # TODO(synk): embedding gather is still JAX glue (jnp.take); a scalar-prefetched
    # token-id table + per-row DMA inside the kernel would cut one HBM round trip.
    emb_tm = jnp.take(p['emb'], x_tokens.T, axis=0).astype(jnp.bfloat16)   # (T, B, E) time-major

    wih_f = p['wih_f'].astype(jnp.bfloat16)
    whh_f = p['whh_f'].astype(jnp.bfloat16)
    wih_b = p['wih_b'].astype(jnp.bfloat16)
    wfc_f = p['wfc'][:H]           # (H, OUT) f32
    wfc_b = p['wfc'][H:]           # (H, OUT) f32

    flops = (2 * T * B * E * 4 * H      # hoisted input projection
             + 2 * T * B * H * 4 * H    # recurrence
             + 2 * B * E * 4 * H        # backward single step
             + 2 * B * 2 * H * OUT)     # fc
    transcendentals = 5 * T * B * H + 4 * B * H
    bytes_accessed = (emb_tm.size * 2
                      + (wih_f.size + whh_f.size + wih_b.size) * 2
                      + (p['b_f'].size + p['b_b'].size + p['wfc'].size + p['bfc'].size) * 4
                      + B * OUT * 4)

    grid = (B // b_tile,)
    return pl.pallas_call(
        bilstm_last_fc_kernel,
        out_shape=jax.ShapeDtypeStruct((B, OUT), jnp.float32),
        grid_spec=pltpu.PrefetchScalarGridSpec(
            num_scalar_prefetch=0,
            grid=grid,
            in_specs=[
                pl.BlockSpec((T, b_tile, E), lambda b: (0, b, 0)),   # activations: tiled over batch
                pl.BlockSpec((E, 4 * H), lambda b: (0, 0)),          # weights: VMEM-resident
                pl.BlockSpec((H, 4 * H), lambda b: (0, 0)),
                pl.BlockSpec((1, 4 * H), lambda b: (0, 0)),
                pl.BlockSpec((E, 4 * H), lambda b: (0, 0)),
                pl.BlockSpec((1, 4 * H), lambda b: (0, 0)),
                pl.BlockSpec((H, OUT), lambda b: (0, 0)),
                pl.BlockSpec((H, OUT), lambda b: (0, 0)),
                pl.BlockSpec((1, OUT), lambda b: (0, 0)),
            ],
            out_specs=pl.BlockSpec((b_tile, OUT), lambda b: (b, 0)),
            scratch_shapes=[pltpu.VMEM((T, b_tile, 4 * H), jnp.float32)],  # hoisted gates
        ),
        compiler_params=pltpu.CompilerParams(
            dimension_semantics=("parallel",),          # batch tiles independent (megacore on v7x)
            vmem_limit_bytes=32 * 1024 * 1024,          # explicit budget; tile sized well below it
        ),
        cost_estimate=pl.CostEstimate(flops=flops,
                                      transcendentals=transcendentals,
                                      bytes_accessed=bytes_accessed),
    )(emb_tm, wih_f, whh_f, p['b_f'], wih_b, p['b_b'], wfc_f, wfc_b, p['bfc'])


def reference_forward(x_tokens, p):
    """Pure-JAX f32 reference with identical math for validation."""
    emb = jnp.take(p['emb'], x_tokens, axis=0)                 # (B, T, E)
    B = emb.shape[0]
    H = p['whh_f'].shape[0]

    def fwd_step(carry, x_t):
        h, c = carry
        gates = x_t @ p['wih_f'] + h @ p['whh_f'] + p['b_f']
        i, f, g, o = jnp.split(gates, 4, axis=-1)
        c = jax.nn.sigmoid(f) * c + jax.nn.sigmoid(i) * jnp.tanh(g)
        h = jax.nn.sigmoid(o) * jnp.tanh(c)
        return (h, c), None

    h0 = jnp.zeros((B, H), jnp.float32)
    c0 = jnp.zeros((B, H), jnp.float32)
    (h_f, _), _ = lax.scan(fwd_step, (h0, c0), jnp.transpose(emb, (1, 0, 2)))

    x_last = emb[:, -1, :]
    gates_b = x_last @ p['wih_b'] + p['b_b']
    i, f, g, o = jnp.split(gates_b, 4, axis=-1)
    c_b = jax.nn.sigmoid(i) * jnp.tanh(g)
    h_b = jax.nn.sigmoid(o) * jnp.tanh(c_b)

    last = jnp.concatenate([h_f, h_b], axis=-1)
    return last @ p['wfc'] + p['bfc']


def init_params(key, vocab_size, emb_dim, hidden_dim, output_dim):
    ks = jax.random.split(key, 10)
    kH = 1.0 / jnp.sqrt(hidden_dim)

    def uni(k, shape, bound):
        return jax.random.uniform(k, shape, jnp.float32, -bound, bound)

    # PyTorch stores W_ih as (4H, E), W_hh as (4H, H); we keep them pre-transposed
    # so gates = x @ W + b with gate order (i, f, g, o).
    return dict(
        emb=jax.random.normal(ks[0], (vocab_size, emb_dim), jnp.float32),
        wih_f=uni(ks[1], (emb_dim, 4 * hidden_dim), kH),
        whh_f=uni(ks[2], (hidden_dim, 4 * hidden_dim), kH),
        b_f=uni(ks[3], (1, 4 * hidden_dim), kH) + uni(ks[4], (1, 4 * hidden_dim), kH),  # b_ih + b_hh
        wih_b=uni(ks[5], (emb_dim, 4 * hidden_dim), kH),
        b_b=uni(ks[6], (1, 4 * hidden_dim), kH) + uni(ks[7], (1, 4 * hidden_dim), kH),
        wfc=uni(ks[8], (2 * hidden_dim, output_dim), 1.0 / jnp.sqrt(2 * hidden_dim)),
        bfc=uni(ks[9], (1, output_dim), 1.0 / jnp.sqrt(2 * hidden_dim)),
    )


if __name__ == "__main__":
    # Small, lane-aligned shapes consistent with the module (hidden 256 / emb 300 scaled down).
    B, T = 32, 16
    VOCAB, EMB, HID, OUT = 200, 128, 128, 1

    key = jax.random.PRNGKey(0)
    k_param, k_tok = jax.random.split(key)
    params = init_params(k_param, VOCAB, EMB, HID, OUT)
    x = jax.random.randint(k_tok, (B, T), 0, VOCAB, dtype=jnp.int32)

    y = jax.block_until_ready(lstm_forward(x, params))
    y_ref = jax.block_until_ready(reference_forward(x, params))

    assert y.shape == (B, OUT), y.shape
    # bf16 matmul operands (f32 accumulation) vs pure-f32 reference => loosened tolerance.
    assert jnp.allclose(y, y_ref, atol=3e-2, rtol=3e-2), (y, y_ref)
    print("KERNEL_OK")
</pallas_src>

<mosaic_0001>
module attributes {stable_mosaic.version = 11 : i64} {
  func.func @bilstm_last_fc_kernel(%arg0: i32, %arg1: memref<16x16x128xbf16, #tpu.memory_space<vmem>>, %arg2: memref<128x512xbf16, #tpu.memory_space<vmem>>, %arg3: memref<128x512xbf16, #tpu.memory_space<vmem>>, %arg4: memref<1x512xf32, #tpu.memory_space<vmem>>, %arg5: memref<128x512xbf16, #tpu.memory_space<vmem>>, %arg6: memref<1x512xf32, #tpu.memory_space<vmem>>, %arg7: memref<128x1xf32, #tpu.memory_space<vmem>>, %arg8: memref<128x1xf32, #tpu.memory_space<vmem>>, %arg9: memref<1x1xf32, #tpu.memory_space<vmem>>, %arg10: memref<16x1xf32, #tpu.memory_space<vmem>>, %arg11: memref<16x16x512xf32, #tpu.memory_space<vmem>>) attributes {dimension_semantics = [#tpu.dimension_semantics<parallel>], iteration_bounds = array<i64: 2>, scalar_prefetch = 0 : i64, scratch_operands = 1 : i64, tpu.core_type = #tpu.core_type<tc>, window_params = [{transform_indices = @transform_0, window_bounds = array<i64: 16, 16, 128>}, {pipeline_mode = #tpu.pipeline_mode<synchronous>, transform_indices = @transform_1, window_bounds = array<i64: 128, 512>}, {pipeline_mode = #tpu.pipeline_mode<synchronous>, transform_indices = @transform_2, window_bounds = array<i64: 128, 512>}, {pipeline_mode = #tpu.pipeline_mode<synchronous>, transform_indices = @transform_3, window_bounds = array<i64: 1, 512>}, {pipeline_mode = #tpu.pipeline_mode<synchronous>, transform_indices = @transform_4, window_bounds = array<i64: 128, 512>}, {pipeline_mode = #tpu.pipeline_mode<synchronous>, transform_indices = @transform_5, window_bounds = array<i64: 1, 512>}, {pipeline_mode = #tpu.pipeline_mode<synchronous>, transform_indices = @transform_6, window_bounds = array<i64: 128, 1>}, {pipeline_mode = #tpu.pipeline_mode<synchronous>, transform_indices = @transform_7, window_bounds = array<i64: 128, 1>}, {pipeline_mode = #tpu.pipeline_mode<synchronous>, transform_indices = @transform_8, window_bounds = array<i64: 1, 1>}, {transform_indices = @transform_9, window_bounds = array<i64: 16, 1>}]} {
    %c0 = arith.constant 0 : index
    %c0_0 = arith.constant 0 : index
    %c0_1 = arith.constant 0 : index
    %0 = vector.load %arg1[%c0, %c0_0, %c0_1] : memref<16x16x128xbf16, #tpu.memory_space<vmem>>, vector<16x16x128xbf16>
    %1 = vector.shape_cast %0 : vector<16x16x128xbf16> to vector<256x128xbf16>
    %c0_2 = arith.constant 0 : index
    %c0_3 = arith.constant 0 : index
    %2 = vector.load %arg2[%c0_2, %c0_3] : memref<128x512xbf16, #tpu.memory_space<vmem>>, vector<128x512xbf16>
    %cst = arith.constant dense<0.000000e+00> : vector<256x512xf32>
    %3 = tpu.matmul %1, %2, %cst {dimension_numbers = #tpu.dot_dimension_numbers<[1], [0], [0], [1], [0, 0, 1, 1], [], []>} : vector<256x128xbf16>, vector<128x512xbf16>, vector<256x512xf32> -> vector<256x512xf32>
    %c0_4 = arith.constant 0 : index
    %c0_5 = arith.constant 0 : index
    %4 = vector.load %arg4[%c0_4, %c0_5] : memref<1x512xf32, #tpu.memory_space<vmem>>, vector<1x512xf32>
    %5 = vector.broadcast %4 : vector<1x512xf32> to vector<256x512xf32>
    %6 = arith.addf %3, %5 : vector<256x512xf32>
    %7 = vector.shape_cast %6 : vector<256x512xf32> to vector<16x16x512xf32>
    %c0_6 = arith.constant 0 : index
    %c0_7 = arith.constant 0 : index
    %c0_8 = arith.constant 0 : index
    %8 = vector.load %arg11[%c0_6, %c0_7, %c0_8] : memref<16x16x512xf32, #tpu.memory_space<vmem>>, vector<16x16x512xf32>
    tpu.vector_store %arg11[%c0_6, %c0_7, %c0_8], %7 {strides = array<i32>} : memref<16x16x512xf32, #tpu.memory_space<vmem>>, vector<16x16x512xf32>,
    %cst_9 = arith.constant 0.000000e+00 : f32
    %9 = vector.broadcast %cst_9 : f32 to vector<16x128xf32>
    %cst_10 = arith.constant 0.000000e+00 : f32
    %10 = vector.broadcast %cst_10 : f32 to vector<16x128xf32>
    %c0_i32 = arith.constant 0 : i32
    %11 = arith.index_cast %c0_i32 : i32 to index
    %c0_11 = arith.constant 0 : index
    %c0_12 = arith.constant 0 : index
    %12 = vector.load %arg11[%11, %c0_11, %c0_12] : memref<16x16x512xf32, #tpu.memory_space<vmem>>, vector<1x16x512xf32>
    %13 = vector.shape_cast %12 : vector<1x16x512xf32> to vector<16x512xf32>
    %14 = arith.truncf %9 : vector<16x128xf32> to vector<16x128xbf16>
    %c0_13 = arith.constant 0 : index
    %c0_14 = arith.constant 0 : index
    %15 = vector.load %arg3[%c0_13, %c0_14] : memref<128x512xbf16, #tpu.memory_space<vmem>>, vector<128x512xbf16>
    %cst_15 = arith.constant dense<0.000000e+00> : vector<16x512xf32>
    %16 = tpu.matmul %14, %15, %cst_15 {dimension_numbers = #tpu.dot_dimension_numbers<[1], [0], [0], [1], [0, 0, 1, 1], [], []>} : vector<16x128xbf16>, vector<128x512xbf16>, vector<16x512xf32> -> vector<16x512xf32>
    %17 = arith.addf %13, %16 : vector<16x512xf32>
    %18 = vector.extract_strided_slice %17 {offsets = [0, 0], sizes = [16, 128], strides = [1, 1]} : vector<16x512xf32> to vector<16x128xf32>
    %19 = arith.negf %18 : vector<16x128xf32>
    %20 = math.exp %19 : vector<16x128xf32>
    %cst_16 = arith.constant 1.000000e+00 : f32
    %21 = vector.broadcast %cst_16 : f32 to vector<16x128xf32>
    %22 = arith.addf %21, %20 : vector<16x128xf32>
    %23 = arith.divf %21, %22 : vector<16x128xf32>
    %24 = vector.extract_strided_slice %17 {offsets = [0, 128], sizes = [16, 128], strides = [1, 1]} : vector<16x512xf32> to vector<16x128xf32>
    %25 = arith.negf %24 : vector<16x128xf32>
    %26 = math.exp %25 : vector<16x128xf32>
    %cst_17 = arith.constant 1.000000e+00 : f32
    %27 = vector.broadcast %cst_17 : f32 to vector<16x128xf32>
    %28 = arith.addf %27, %26 : vector<16x128xf32>
    %29 = arith.divf %27, %28 : vector<16x128xf32>
    %30 = vector.extract_strided_slice %17 {offsets = [0, 256], sizes = [16, 128], strides = [1, 1]} : vector<16x512xf32> to vector<16x128xf32>
    %31 = math.tanh %30 : vector<16x128xf32>
    %32 = vector.extract_strided_slice %17 {offsets = [0, 384], sizes = [16, 128], strides = [1, 1]} : vector<16x512xf32> to vector<16x128xf32>
    %33 = arith.negf %32 : vector<16x128xf32>
    %34 = math.exp %33 : vector<16x128xf32>
    %cst_18 = arith.constant 1.000000e+00 : f32
    %35 = vector.broadcast %cst_18 : f32 to vector<16x128xf32>
    %36 = arith.addf %35, %34 : vector<16x128xf32>
    %37 = arith.divf %35, %36 : vector<16x128xf32>
    %38 = arith.mulf %29, %10 : vector<16x128xf32>
    %39 = arith.mulf %23, %31 : vector<16x128xf32>
    %40 = arith.addf %38, %39 : vector<16x128xf32>
    %41 = math.tanh %40 : vector<16x128xf32>
    %42 = arith.mulf %37, %41 : vector<16x128xf32>
    %c1_i32 = arith.constant 1 : i32
    %43 = arith.index_cast %c1_i32 : i32 to index
    %c0_19 = arith.constant 0 : index
    %c0_20 = arith.constant 0 : index
    %44 = vector.load %arg11[%43, %c0_19, %c0_20] : memref<16x16x512xf32, #tpu.memory_space<vmem>>, vector<1x16x512xf32>
    %45 = vector.shape_cast %44 : vector<1x16x512xf32> to vector<16x512xf32>
    %46 = arith.truncf %42 : vector<16x128xf32> to vector<16x128xbf16>
    %c0_21 = arith.constant 0 : index
    %c0_22 = arith.constant 0 : index
    %47 = vector.load %arg3[%c0_21, %c0_22] : memref<128x512xbf16, #tpu.memory_space<vmem>>, vector<128x512xbf16>
    %cst_23 = arith.constant dense<0.000000e+00> : vector<16x512xf32>
    %48 = tpu.matmul %46, %47, %cst_23 {dimension_numbers = #tpu.dot_dimension_numbers<[1], [0], [0], [1], [0, 0, 1, 1], [], []>} : vector<16x128xbf16>, vector<128x512xbf16>, vector<16x512xf32> -> vector<16x512xf32>
    %49 = arith.addf %45, %48 : vector<16x512xf32>
    %50 = vector.extract_strided_slice %49 {offsets = [0, 0], sizes = [16, 128], strides = [1, 1]} : vector<16x512xf32> to vector<16x128xf32>
    %51 = arith.negf %50 : vector<16x128xf32>
    %52 = math.exp %51 : vector<16x128xf32>
    %cst_24 = arith.constant 1.000000e+00 : f32
    %53 = vector.broadcast %cst_24 : f32 to vector<16x128xf32>
    %54 = arith.addf %53, %52 : vector<16x128xf32>
    %55 = arith.divf %53, %54 : vector<16x128xf32>
    %56 = vector.extract_strided_slice %49 {offsets = [0, 128], sizes = [16, 128], strides = [1, 1]} : vector<16x512xf32> to vector<16x128xf32>
    %57 = arith.negf %56 : vector<16x128xf32>
    %58 = math.exp %57 : vector<16x128xf32>
    %cst_25 = arith.constant 1.000000e+00 : f32
    %59 = vector.broadcast %cst_25 : f32 to vector<16x128xf32>
    %60 = arith.addf %59, %58 : vector<16x128xf32>
    %61 = arith.divf %59, %60 : vector<16x128xf32>
    %62 = vector.extract_strided_slice %49 {offsets = [0, 256], sizes = [16, 128], strides = [1, 1]} : vector<16x512xf32> to vector<16x128xf32>
    %63 = math.tanh %62 : vector<16x128xf32>
    %64 = vector.extract_strided_slice %49 {offsets = [0, 384], sizes = [16, 128], strides = [1, 1]} : vector<16x512xf32> to vector<16x128xf32>
    %65 = arith.negf %64 : vector<16x128xf32>
    %66 = math.exp %65 : vector<16x128xf32>
    %cst_26 = arith.constant 1.000000e+00 : f32
    %67 = vector.broadcast %cst_26 : f32 to vector<16x128xf32>
    %68 = arith.addf %67, %66 : vector<16x128xf32>
    %69 = arith.divf %67, %68 : vector<16x128xf32>
    %70 = arith.mulf %61, %40 : vector<16x128xf32>
    %71 = arith.mulf %55, %63 : vector<16x128xf32>
    %72 = arith.addf %70, %71 : vector<16x128xf32>
    %73 = math.tanh %72 : vector<16x128xf32>
    %74 = arith.mulf %69, %73 : vector<16x128xf32>
    %c2_i32 = arith.constant 2 : i32
    %75 = arith.index_cast %c2_i32 : i32 to index
    %c0_27 = arith.constant 0 : index
    %c0_28 = arith.constant 0 : index
    %76 = vector.load %arg11[%75, %c0_27, %c0_28] : memref<16x16x512xf32, #tpu.memory_space<vmem>>, vector<1x16x512xf32>
    %77 = vector.shape_cast %76 : vector<1x16x512xf32> to vector<16x512xf32>
    %78 = arith.truncf %74 : vector<16x128xf32> to vector<16x128xbf16>
    %c0_29 = arith.constant 0 : index
    %c0_30 = arith.constant 0 : index
    %79 = vector.load %arg3[%c0_29, %c0_30] : memref<128x512xbf16, #tpu.memory_space<vmem>>, vector<128x512xbf16>
    %cst_31 = arith.constant dense<0.000000e+00> : vector<16x512xf32>
    %80 = tpu.matmul %78, %79, %cst_31 {dimension_numbers = #tpu.dot_dimension_numbers<[1], [0], [0], [1], [0, 0, 1, 1], [], []>} : vector<16x128xbf16>, vector<128x512xbf16>, vector<16x512xf32> -> vector<16x512xf32>
    %81 = arith.addf %77, %80 : vector<16x512xf32>
    %82 = vector.extract_strided_slice %81 {offsets = [0, 0], sizes = [16, 128], strides = [1, 1]} : vector<16x512xf32> to vector<16x128xf32>
    %83 = arith.negf %82 : vector<16x128xf32>
    %84 = math.exp %83 : vector<16x128xf32>
    %cst_32 = arith.constant 1.000000e+00 : f32
    %85 = vector.broadcast %cst_32 : f32 to vector<16x128xf32>
    %86 = arith.addf %85, %84 : vector<16x128xf32>
    %87 = arith.divf %85, %86 : vector<16x128xf32>
    %88 = vector.extract_strided_slice %81 {offsets = [0, 128], sizes = [16, 128], strides = [1, 1]} : vector<16x512xf32> to vector<16x128xf32>
    %89 = arith.negf %88 : vector<16x128xf32>
    %90 = math.exp %89 : vector<16x128xf32>
    %cst_33 = arith.constant 1.000000e+00 : f32
    %91 = vector.broadcast %cst_33 : f32 to vector<16x128xf32>
    %92 = arith.addf %91, %90 : vector<16x128xf32>
    %93 = arith.divf %91, %92 : vector<16x128xf32>
    %94 = vector.extract_strided_slice %81 {offsets = [0, 256], sizes = [16, 128], strides = [1, 1]} : vector<16x512xf32> to vector<16x128xf32>
    %95 = math.tanh %94 : vector<16x128xf32>
    %96 = vector.extract_strided_slice %81 {offsets = [0, 384], sizes = [16, 128], strides = [1, 1]} : vector<16x512xf32> to vector<16x128xf32>
    %97 = arith.negf %96 : vector<16x128xf32>
    %98 = math.exp %97 : vector<16x128xf32>
    %cst_34 = arith.constant 1.000000e+00 : f32
    %99 = vector.broadcast %cst_34 : f32 to vector<16x128xf32>
    %100 = arith.addf %99, %98 : vector<16x128xf32>
    %101 = arith.divf %99, %100 : vector<16x128xf32>
    %102 = arith.mulf %93, %72 : vector<16x128xf32>
    %103 = arith.mulf %87, %95 : vector<16x128xf32>
    %104 = arith.addf %102, %103 : vector<16x128xf32>
    %105 = math.tanh %104 : vector<16x128xf32>
    %106 = arith.mulf %101, %105 : vector<16x128xf32>
    %c3_i32 = arith.constant 3 : i32
    %107 = arith.index_cast %c3_i32 : i32 to index
    %c0_35 = arith.constant 0 : index
    %c0_36 = arith.constant 0 : index
    %108 = vector.load %arg11[%107, %c0_35, %c0_36] : memref<16x16x512xf32, #tpu.memory_space<vmem>>, vector<1x16x512xf32>
    %109 = vector.shape_cast %108 : vector<1x16x512xf32> to vector<16x512xf32>
    %110 = arith.truncf %106 : vector<16x128xf32> to vector<16x128xbf16>
    %c0_37 = arith.constant 0 : index
    %c0_38 = arith.constant 0 : index
    %111 = vector.load %arg3[%c0_37, %c0_38] : memref<128x512xbf16, #tpu.memory_space<vmem>>, vector<128x512xbf16>
    %cst_39 = arith.constant dense<0.000000e+00> : vector<16x512xf32>
    %112 = tpu.matmul %110, %111, %cst_39 {dimension_numbers = #tpu.dot_dimension_numbers<[1], [0], [0], [1], [0, 0, 1, 1], [], []>} : vector<16x128xbf16>, vector<128x512xbf16>, vector<16x512xf32> -> vector<16x512xf32>
    %113 = arith.addf %109, %112 : vector<16x512xf32>
    %114 = vector.extract_strided_slice %113 {offsets = [0, 0], sizes = [16, 128], strides = [1, 1]} : vector<16x512xf32> to vector<16x128xf32>
    %115 = arith.negf %114 : vector<16x128xf32>
    %116 = math.exp %115 : vector<16x128xf32>
    %cst_40 = arith.constant 1.000000e+00 : f32
    %117 = vector.broadcast %cst_40 : f32 to vector<16x128xf32>
    %118 = arith.addf %117, %116 : vector<16x128xf32>
    %119 = arith.divf %117, %118 : vector<16x128xf32>
    %120 = vector.extract_strided_slice %113 {offsets = [0, 128], sizes = [16, 128], strides = [1, 1]} : vector<16x512xf32> to vector<16x128xf32>
    %121 = arith.negf %120 : vector<16x128xf32>
    %122 = math.exp %121 : vector<16x128xf32>
    %cst_41 = arith.constant 1.000000e+00 : f32
    %123 = vector.broadcast %cst_41 : f32 to vector<16x128xf32>
    %124 = arith.addf %123, %122 : vector<16x128xf32>
    %125 = arith.divf %123, %124 : vector<16x128xf32>
    %126 = vector.extract_strided_slice %113 {offsets = [0, 256], sizes = [16, 128], strides = [1, 1]} : vector<16x512xf32> to vector<16x128xf32>
    %127 = math.tanh %126 : vector<16x128xf32>
    %128 = vector.extract_strided_slice %113 {offsets = [0, 384], sizes = [16, 128], strides = [1, 1]} : vector<16x512xf32> to vector<16x128xf32>
    %129 = arith.negf %128 : vector<16x128xf32>
    %130 = math.exp %129 : vector<16x128xf32>
    %cst_42 = arith.constant 1.000000e+00 : f32
    %131 = vector.broadcast %cst_42 : f32 to vector<16x128xf32>
    %132 = arith.addf %131, %130 : vector<16x128xf32>
    %133 = arith.divf %131, %132 : vector<16x128xf32>
    %134 = arith.mulf %125, %104 : vector<16x128xf32>
    %135 = arith.mulf %119, %127 : vector<16x128xf32>
    %136 = arith.addf %134, %135 : vector<16x128xf32>
    %137 = math.tanh %136 : vector<16x128xf32>
    %138 = arith.mulf %133, %137 : vector<16x128xf32>
    %c4_i32 = arith.constant 4 : i32
    %139 = arith.index_cast %c4_i32 : i32 to index
    %c0_43 = arith.constant 0 : index
    %c0_44 = arith.constant 0 : index
    %140 = vector.load %arg11[%139, %c0_43, %c0_44] : memref<16x16x512xf32, #tpu.memory_space<vmem>>, vector<1x16x512xf32>
    %141 = vector.shape_cast %140 : vector<1x16x512xf32> to vector<16x512xf32>
    %142 = arith.truncf %138 : vector<16x128xf32> to vector<16x128xbf16>
    %c0_45 = arith.constant 0 : index
    %c0_46 = arith.constant 0 : index
    %143 = vector.load %arg3[%c0_45, %c0_46] : memref<128x512xbf16, #tpu.memory_space<vmem>>, vector<128x512xbf16>
    %cst_47 = arith.constant dense<0.000000e+00> : vector<16x512xf32>
    %144 = tpu.matmul %142, %143, %cst_47 {dimension_numbers = #tpu.dot_dimension_numbers<[1], [0], [0], [1], [0, 0, 1, 1], [], []>} : vector<16x128xbf16>, vector<128x512xbf16>, vector<16x512xf32> -> vector<16x512xf32>
    %145 = arith.addf %141, %144 : vector<16x512xf32>
    %146 = vector.extract_strided_slice %145 {offsets = [0, 0], sizes = [16, 128], strides = [1, 1]} : vector<16x512xf32> to vector<16x128xf32>
    %147 = arith.negf %146 : vector<16x128xf32>
    %148 = math.exp %147 : vector<16x128xf32>
    %cst_48 = arith.constant 1.000000e+00 : f32
    %149 = vector.broadcast %cst_48 : f32 to vector<16x128xf32>
    %150 = arith.addf %149, %148 : vector<16x128xf32>
    %151 = arith.divf %149, %150 : vector<16x128xf32>
    %152 = vector.extract_strided_slice %145 {offsets = [0, 128], sizes = [16, 128], strides = [1, 1]} : vector<16x512xf32> to vector<16x128xf32>
    %153 = arith.negf %152 : vector<16x128xf32>
    %154 = math.exp %153 : vector<16x128xf32>
    %cst_49 = arith.constant 1.000000e+00 : f32
    %155 = vector.broadcast %cst_49 : f32 to vector<16x128xf32>
    %156 = arith.addf %155, %154 : vector<16x128xf32>
    %157 = arith.divf %155, %156 : vector<16x128xf32>
    %158 = vector.extract_strided_slice %145 {offsets = [0, 256], sizes = [16, 128], strides = [1, 1]} : vector<16x512xf32> to vector<16x128xf32>
    %159 = math.tanh %158 : vector<16x128xf32>
    %160 = vector.extract_strided_slice %145 {offsets = [0, 384], sizes = [16, 128], strides = [1, 1]} : vector<16x512xf32> to vector<16x128xf32>
    %161 = arith.negf %160 : vector<16x128xf32>
    %162 = math.exp %161 : vector<16x128xf32>
    %cst_50 = arith.constant 1.000000e+00 : f32
    %163 = vector.broadcast %cst_50 : f32 to vector<16x128xf32>
    %164 = arith.addf %163, %162 : vector<16x128xf32>
    %165 = arith.divf %163, %164 : vector<16x128xf32>
    %166 = arith.mulf %157, %136 : vector<16x128xf32>
    %167 = arith.mulf %151, %159 : vector<16x128xf32>
    %168 = arith.addf %166, %167 : vector<16x128xf32>
    %169 = math.tanh %168 : vector<16x128xf32>
    %170 = arith.mulf %165, %169 : vector<16x128xf32>
    %c5_i32 = arith.constant 5 : i32
    %171 = arith.index_cast %c5_i32 : i32 to index
    %c0_51 = arith.constant 0 : index
    %c0_52 = arith.constant 0 : index
    %172 = vector.load %arg11[%171, %c0_51, %c0_52] : memref<16x16x512xf32, #tpu.memory_space<vmem>>, vector<1x16x512xf32>
    %173 = vector.shape_cast %172 : vector<1x16x512xf32> to vector<16x512xf32>
    %174 = arith.truncf %170 : vector<16x128xf32> to vector<16x128xbf16>
    %c0_53 = arith.constant 0 : index
    %c0_54 = arith.constant 0 : index
    %175 = vector.load %arg3[%c0_53, %c0_54] : memref<128x512xbf16, #tpu.memory_space<vmem>>, vector<128x512xbf16>
    %cst_55 = arith.constant dense<0.000000e+00> : vector<16x512xf32>
    %176 = tpu.matmul %174, %175, %cst_55 {dimension_numbers = #tpu.dot_dimension_numbers<[1], [0], [0], [1], [0, 0, 1, 1], [], []>} : vector<16x128xbf16>, vector<128x512xbf16>, vector<16x512xf32> -> vector<16x512xf32>
    %177 = arith.addf %173, %176 : vector<16x512xf32>
    %178 = vector.extract_strided_slice %177 {offsets = [0, 0], sizes = [16, 128], strides = [1, 1]} : vector<16x512xf32> to vector<16x128xf32>
    %179 = arith.negf %178 : vector<16x128xf32>
    %180 = math.exp %179 : vector<16x128xf32>
    %cst_56 = arith.constant 1.000000e+00 : f32
    %181 = vector.broadcast %cst_56 : f32 to vector<16x128xf32>
    %182 = arith.addf %181, %180 : vector<16x128xf32>
    %183 = arith.divf %181, %182 : vector<16x128xf32>
    %184 = vector.extract_strided_slice %177 {offsets = [0, 128], sizes = [16, 128], strides = [1, 1]} : vector<16x512xf32> to vector<16x128xf32>
    %185 = arith.negf %184 : vector<16x128xf32>
    %186 = math.exp %185 : vector<16x128xf32>
    %cst_57 = arith.constant 1.000000e+00 : f32
    %187 = vector.broadcast %cst_57 : f32 to vector<16x128xf32>
    %188 = arith.addf %187, %186 : vector<16x128xf32>
    %189 = arith.divf %187, %188 : vector<16x128xf32>
    %190 = vector.extract_strided_slice %177 {offsets = [0, 256], sizes = [16, 128], strides = [1, 1]} : vector<16x512xf32> to vector<16x128xf32>
    %191 = math.tanh %190 : vector<16x128xf32>
    %192 = vector.extract_strided_slice %177 {offsets = [0, 384], sizes = [16, 128], strides = [1, 1]} : vector<16x512xf32> to vector<16x128xf32>
    %193 = arith.negf %192 : vector<16x128xf32>
    %194 = math.exp %193 : vector<16x128xf32>
    %cst_58 = arith.constant 1.000000e+00 : f32
    %195 = vector.broadcast %cst_58 : f32 to vector<16x128xf32>
    %196 = arith.addf %195, %194 : vector<16x128xf32>
    %197 = arith.divf %195, %196 : vector<16x128xf32>
    %198 = arith.mulf %189, %168 : vector<16x128xf32>
    %199 = arith.mulf %183, %191 : vector<16x128xf32>
    %200 = arith.addf %198, %199 : vector<16x128xf32>
    %201 = math.tanh %200 : vector<16x128xf32>
    %202 = arith.mulf %197, %201 : vector<16x128xf32>
    %c6_i32 = arith.constant 6 : i32
    %203 = arith.index_cast %c6_i32 : i32 to index
    %c0_59 = arith.constant 0 : index
    %c0_60 = arith.constant 0 : index
    %204 = vector.load %arg11[%203, %c0_59, %c0_60] : memref<16x16x512xf32, #tpu.memory_space<vmem>>, vector<1x16x512xf32>
    %205 = vector.shape_cast %204 : vector<1x16x512xf32> to vector<16x512xf32>
    %206 = arith.truncf %202 : vector<16x128xf32> to vector<16x128xbf16>
    %c0_61 = arith.constant 0 : index
    %c0_62 = arith.constant 0 : index
    %207 = vector.load %arg3[%c0_61, %c0_62] : memref<128x512xbf16, #tpu.memory_space<vmem>>, vector<128x512xbf16>
    %cst_63 = arith.constant dense<0.000000e+00> : vector<16x512xf32>
    %208 = tpu.matmul %206, %207, %cst_63 {dimension_numbers = #tpu.dot_dimension_numbers<[1], [0], [0], [1], [0, 0, 1, 1], [], []>} : vector<16x128xbf16>, vector<128x512xbf16>, vector<16x512xf32> -> vector<16x512xf32>
    %209 = arith.addf %205, %208 : vector<16x512xf32>
    %210 = vector.extract_strided_slice %209 {offsets = [0, 0], sizes = [16, 128], strides = [1, 1]} : vector<16x512xf32> to vector<16x128xf32>
    %211 = arith.negf %210 : vector<16x128xf32>
    %212 = math.exp %211 : vector<16x128xf32>
    %cst_64 = arith.constant 1.000000e+00 : f32
    %213 = vector.broadcast %cst_64 : f32 to vector<16x128xf32>
    %214 = arith.addf %213, %212 : vector<16x128xf32>
    %215 = arith.divf %213, %214 : vector<16x128xf32>
    %216 = vector.extract_strided_slice %209 {offsets = [0, 128], sizes = [16, 128], strides = [1, 1]} : vector<16x512xf32> to vector<16x128xf32>
    %217 = arith.negf %216 : vector<16x128xf32>
    %218 = math.exp %217 : vector<16x128xf32>
    %cst_65 = arith.constant 1.000000e+00 : f32
    %219 = vector.broadcast %cst_65 : f32 to vector<16x128xf32>
    %220 = arith.addf %219, %218 : vector<16x128xf32>
    %221 = arith.divf %219, %220 : vector<16x128xf32>
    %222 = vector.extract_strided_slice %209 {offsets = [0, 256], sizes = [16, 128], strides = [1, 1]} : vector<16x512xf32> to vector<16x128xf32>
    %223 = math.tanh %222 : vector<16x128xf32>
    %224 = vector.extract_strided_slice %209 {offsets = [0, 384], sizes = [16, 128], strides = [1, 1]} : vector<16x512xf32> to vector<16x128xf32>
    %225 = arith.negf %224 : vector<16x128xf32>
    %226 = math.exp %225 : vector<16x128xf32>
    %cst_66 = arith.constant 1.000000e+00 : f32
    %227 = vector.broadcast %cst_66 : f32 to vector<16x128xf32>
    %228 = arith.addf %227, %226 : vector<16x128xf32>
    %229 = arith.divf %227, %228 : vector<16x128xf32>
    %230 = arith.mulf %221, %200 : vector<16x128xf32>
    %231 = arith.mulf %215, %223 : vector<16x128xf32>
    %232 = arith.addf %230, %231 : vector<16x128xf32>
    %233 = math.tanh %232 : vector<16x128xf32>
    %234 = arith.mulf %229, %233 : vector<16x128xf32>
    %c7_i32 = arith.constant 7 : i32
    %235 = arith.index_cast %c7_i32 : i32 to index
    %c0_67 = arith.constant 0 : index
    %c0_68 = arith.constant 0 : index
    %236 = vector.load %arg11[%235, %c0_67, %c0_68] : memref<16x16x512xf32, #tpu.memory_space<vmem>>, vector<1x16x512xf32>
    %237 = vector.shape_cast %236 : vector<1x16x512xf32> to vector<16x512xf32>
    %238 = arith.truncf %234 : vector<16x128xf32> to vector<16x128xbf16>
    %c0_69 = arith.constant 0 : index
    %c0_70 = arith.constant 0 : index
    %239 = vector.load %arg3[%c0_69, %c0_70] : memref<128x512xbf16, #tpu.memory_space<vmem>>, vector<128x512xbf16>
    %cst_71 = arith.constant dense<0.000000e+00> : vector<16x512xf32>
    %240 = tpu.matmul %238, %239, %cst_71 {dimension_numbers = #tpu.dot_dimension_numbers<[1], [0], [0], [1], [0, 0, 1, 1], [], []>} : vector<16x128xbf16>, vector<128x512xbf16>, vector<16x512xf32> -> vector<16x512xf32>
    %241 = arith.addf %237, %240 : vector<16x512xf32>
    %242 = vector.extract_strided_slice %241 {offsets = [0, 0], sizes = [16, 128], strides = [1, 1]} : vector<16x512xf32> to vector<16x128xf32>
    %243 = arith.negf %242 : vector<16x128xf32>
    %244 = math.exp %243 : vector<16x128xf32>
    %cst_72 = arith.constant 1.000000e+00 : f32
    %245 = vector.broadcast %cst_72 : f32 to vector<16x128xf32>
    %246 = arith.addf %245, %244 : vector<16x128xf32>
    %247 = arith.divf %245, %246 : vector<16x128xf32>
    %248 = vector.extract_strided_slice %241 {offsets = [0, 128], sizes = [16, 128], strides = [1, 1]} : vector<16x512xf32> to vector<16x128xf32>
    %249 = arith.negf %248 : vector<16x128xf32>
    %250 = math.exp %249 : vector<16x128xf32>
    %cst_73 = arith.constant 1.000000e+00 : f32
    %251 = vector.broadcast %cst_73 : f32 to vector<16x128xf32>
    %252 = arith.addf %251, %250 : vector<16x128xf32>
    %253 = arith.divf %251, %252 : vector<16x128xf32>
    %254 = vector.extract_strided_slice %241 {offsets = [0, 256], sizes = [16, 128], strides = [1, 1]} : vector<16x512xf32> to vector<16x128xf32>
    %255 = math.tanh %254 : vector<16x128xf32>
    %256 = vector.extract_strided_slice %241 {offsets = [0, 384], sizes = [16, 128], strides = [1, 1]} : vector<16x512xf32> to vector<16x128xf32>
    %257 = arith.negf %256 : vector<16x128xf32>
    %258 = math.exp %257 : vector<16x128xf32>
    %cst_74 = arith.constant 1.000000e+00 : f32
    %259 = vector.broadcast %cst_74 : f32 to vector<16x128xf32>
    %260 = arith.addf %259, %258 : vector<16x128xf32>
    %261 = arith.divf %259, %260 : vector<16x128xf32>
    %262 = arith.mulf %253, %232 : vector<16x128xf32>
    %263 = arith.mulf %247, %255 : vector<16x128xf32>
    %264 = arith.addf %262, %263 : vector<16x128xf32>
    %265 = math.tanh %264 : vector<16x128xf32>
    %266 = arith.mulf %261, %265 : vector<16x128xf32>
    %c8_i32 = arith.constant 8 : i32
    %267 = arith.index_cast %c8_i32 : i32 to index
    %c0_75 = arith.constant 0 : index
    %c0_76 = arith.constant 0 : index
    %268 = vector.load %arg11[%267, %c0_75, %c0_76] : memref<16x16x512xf32, #tpu.memory_space<vmem>>, vector<1x16x512xf32>
    %269 = vector.shape_cast %268 : vector<1x16x512xf32> to vector<16x512xf32>
    %270 = arith.truncf %266 : vector<16x128xf32> to vector<16x128xbf16>
    %c0_77 = arith.constant 0 : index
    %c0_78 = arith.constant 0 : index
    %271 = vector.load %arg3[%c0_77, %c0_78] : memref<128x512xbf16, #tpu.memory_space<vmem>>, vector<128x512xbf16>
    %cst_79 = arith.constant dense<0.000000e+00> : vector<16x512xf32>
    %272 = tpu.matmul %270, %271, %cst_79 {dimension_numbers = #tpu.dot_dimension_numbers<[1], [0], [0], [1], [0, 0, 1, 1], [], []>} : vector<16x128xbf16>, vector<128x512xbf16>, vector<16x512xf32> -> vector<16x512xf32>
    %273 = arith.addf %269, %272 : vector<16x512xf32>
    %274 = vector.extract_strided_slice %273 {offsets = [0, 0], sizes = [16, 128], strides = [1, 1]} : vector<16x512xf32> to vector<16x128xf32>
    %275 = arith.negf %274 : vector<16x128xf32>
    %276 = math.exp %275 : vector<16x128xf32>
    %cst_80 = arith.constant 1.000000e+00 : f32
    %277 = vector.broadcast %cst_80 : f32 to vector<16x128xf32>
    %278 = arith.addf %277, %276 : vector<16x128xf32>
    %279 = arith.divf %277, %278 : vector<16x128xf32>
    %280 = vector.extract_strided_slice %273 {offsets = [0, 128], sizes = [16, 128], strides = [1, 1]} : vector<16x512xf32> to vector<16x128xf32>
    %281 = arith.negf %280 : vector<16x128xf32>
    %282 = math.exp %281 : vector<16x128xf32>
    %cst_81 = arith.constant 1.000000e+00 : f32
    %283 = vector.broadcast %cst_81 : f32 to vector<16x128xf32>
    %284 = arith.addf %283, %282 : vector<16x128xf32>
    %285 = arith.divf %283, %284 : vector<16x128xf32>
    %286 = vector.extract_strided_slice %273 {offsets = [0, 256], sizes = [16, 128], strides = [1, 1]} : vector<16x512xf32> to vector<16x128xf32>
    %287 = math.tanh %286 : vector<16x128xf32>
    %288 = vector.extract_strided_slice %273 {offsets = [0, 384], sizes = [16, 128], strides = [1, 1]} : vector<16x512xf32> to vector<16x128xf32>
    %289 = arith.negf %288 : vector<16x128xf32>
    %290 = math.exp %289 : vector<16x128xf32>
    %cst_82 = arith.constant 1.000000e+00 : f32
    %291 = vector.broadcast %cst_82 : f32 to vector<16x128xf32>
    %292 = arith.addf %291, %290 : vector<16x128xf32>
    %293 = arith.divf %291, %292 : vector<16x128xf32>
    %294 = arith.mulf %285, %264 : vector<16x128xf32>
    %295 = arith.mulf %279, %287 : vector<16x128xf32>
    %296 = arith.addf %294, %295 : vector<16x128xf32>
    %297 = math.tanh %296 : vector<16x128xf32>
    %298 = arith.mulf %293, %297 : vector<16x128xf32>
    %c9_i32 = arith.constant 9 : i32
    %299 = arith.index_cast %c9_i32 : i32 to index
    %c0_83 = arith.constant 0 : index
    %c0_84 = arith.constant 0 : index
    %300 = vector.load %arg11[%299, %c0_83, %c0_84] : memref<16x16x512xf32, #tpu.memory_space<vmem>>, vector<1x16x512xf32>
    %301 = vector.shape_cast %300 : vector<1x16x512xf32> to vector<16x512xf32>
    %302 = arith.truncf %298 : vector<16x128xf32> to vector<16x128xbf16>
    %c0_85 = arith.constant 0 : index
    %c0_86 = arith.constant 0 : index
    %303 = vector.load %arg3[%c0_85, %c0_86] : memref<128x512xbf16, #tpu.memory_space<vmem>>, vector<128x512xbf16>
    %cst_87 = arith.constant dense<0.000000e+00> : vector<16x512xf32>
    %304 = tpu.matmul %302, %303, %cst_87 {dimension_numbers = #tpu.dot_dimension_numbers<[1], [0], [0], [1], [0, 0, 1, 1], [], []>} : vector<16x128xbf16>, vector<128x512xbf16>, vector<16x512xf32> -> vector<16x512xf32>
    %305 = arith.addf %301, %304 : vector<16x512xf32>
    %306 = vector.extract_strided_slice %305 {offsets = [0, 0], sizes = [16, 128], strides = [1, 1]} : vector<16x512xf32> to vector<16x128xf32>
    %307 = arith.negf %306 : vector<16x128xf32>
    %308 = math.exp %307 : vector<16x128xf32>
    %cst_88 = arith.constant 1.000000e+00 : f32
    %309 = vector.broadcast %cst_88 : f32 to vector<16x128xf32>
    %310 = arith.addf %309, %308 : vector<16x128xf32>
    %311 = arith.divf %309, %310 : vector<16x128xf32>
    %312 = vector.extract_strided_slice %305 {offsets = [0, 128], sizes = [16, 128], strides = [1, 1]} : vector<16x512xf32> to vector<16x128xf32>
    %313 = arith.negf %312 : vector<16x128xf32>
    %314 = math.exp %313 : vector<16x128xf32>
    %cst_89 = arith.constant 1.000000e+00 : f32
    %315 = vector.broadcast %cst_89 : f32 to vector<16x128xf32>
    %316 = arith.addf %315, %314 : vector<16x128xf32>
    %317 = arith.divf %315, %316 : vector<16x128xf32>
    %318 = vector.extract_strided_slice %305 {offsets = [0, 256], sizes = [16, 128], strides = [1, 1]} : vector<16x512xf32> to vector<16x128xf32>
    %319 = math.tanh %318 : vector<16x128xf32>
    %320 = vector.extract_strided_slice %305 {offsets = [0, 384], sizes = [16, 128], strides = [1, 1]} : vector<16x512xf32> to vector<16x128xf32>
    %321 = arith.negf %320 : vector<16x128xf32>
    %322 = math.exp %321 : vector<16x128xf32>
    %cst_90 = arith.constant 1.000000e+00 : f32
    %323 = vector.broadcast %cst_90 : f32 to vector<16x128xf32>
    %324 = arith.addf %323, %322 : vector<16x128xf32>
    %325 = arith.divf %323, %324 : vector<16x128xf32>
    %326 = arith.mulf %317, %296 : vector<16x128xf32>
    %327 = arith.mulf %311, %319 : vector<16x128xf32>
    %328 = arith.addf %326, %327 : vector<16x128xf32>
    %329 = math.tanh %328 : vector<16x128xf32>
    %330 = arith.mulf %325, %329 : vector<16x128xf32>
    %c10_i32 = arith.constant 10 : i32
    %331 = arith.index_cast %c10_i32 : i32 to index
    %c0_91 = arith.constant 0 : index
    %c0_92 = arith.constant 0 : index
    %332 = vector.load %arg11[%331, %c0_91, %c0_92] : memref<16x16x512xf32, #tpu.memory_space<vmem>>, vector<1x16x512xf32>
    %333 = vector.shape_cast %332 : vector<1x16x512xf32> to vector<16x512xf32>
    %334 = arith.truncf %330 : vector<16x128xf32> to vector<16x128xbf16>
    %c0_93 = arith.constant 0 : index
    %c0_94 = arith.constant 0 : index
    %335 = vector.load %arg3[%c0_93, %c0_94] : memref<128x512xbf16, #tpu.memory_space<vmem>>, vector<128x512xbf16>
    %cst_95 = arith.constant dense<0.000000e+00> : vector<16x512xf32>
    %336 = tpu.matmul %334, %335, %cst_95 {dimension_numbers = #tpu.dot_dimension_numbers<[1], [0], [0], [1], [0, 0, 1, 1], [], []>} : vector<16x128xbf16>, vector<128x512xbf16>, vector<16x512xf32> -> vector<16x512xf32>
    %337 = arith.addf %333, %336 : vector<16x512xf32>
    %338 = vector.extract_strided_slice %337 {offsets = [0, 0], sizes = [16, 128], strides = [1, 1]} : vector<16x512xf32> to vector<16x128xf32>
    %339 = arith.negf %338 : vector<16x128xf32>
    %340 = math.exp %339 : vector<16x128xf32>
    %cst_96 = arith.constant 1.000000e+00 : f32
    %341 = vector.broadcast %cst_96 : f32 to vector<16x128xf32>
    %342 = arith.addf %341, %340 : vector<16x128xf32>
    %343 = arith.divf %341, %342 : vector<16x128xf32>
    %344 = vector.extract_strided_slice %337 {offsets = [0, 128], sizes = [16, 128], strides = [1, 1]} : vector<16x512xf32> to vector<16x128xf32>
    %345 = arith.negf %344 : vector<16x128xf32>
    %346 = math.exp %345 : vector<16x128xf32>
    %cst_97 = arith.constant 1.000000e+00 : f32
    %347 = vector.broadcast %cst_97 : f32 to vector<16x128xf32>
    %348 = arith.addf %347, %346 : vector<16x128xf32>
    %349 = arith.divf %347, %348 : vector<16x128xf32>
    %350 = vector.extract_strided_slice %337 {offsets = [0, 256], sizes = [16, 128], strides = [1, 1]} : vector<16x512xf32> to vector<16x128xf32>
    %351 = math.tanh %350 : vector<16x128xf32>
    %352 = vector.extract_strided_slice %337 {offsets = [0, 384], sizes = [16, 128], strides = [1, 1]} : vector<16x512xf32> to vector<16x128xf32>
    %353 = arith.negf %352 : vector<16x128xf32>
    %354 = math.exp %353 : vector<16x128xf32>
    %cst_98 = arith.constant 1.000000e+00 : f32
    %355 = vector.broadcast %cst_98 : f32 to vector<16x128xf32>
    %356 = arith.addf %355, %354 : vector<16x128xf32>
    %357 = arith.divf %355, %356 : vector<16x128xf32>
    %358 = arith.mulf %349, %328 : vector<16x128xf32>
    %359 = arith.mulf %343, %351 : vector<16x128xf32>
    %360 = arith.addf %358, %359 : vector<16x128xf32>
    %361 = math.tanh %360 : vector<16x128xf32>
    %362 = arith.mulf %357, %361 : vector<16x128xf32>
    %c11_i32 = arith.constant 11 : i32
    %363 = arith.index_cast %c11_i32 : i32 to index
    %c0_99 = arith.constant 0 : index
    %c0_100 = arith.constant 0 : index
    %364 = vector.load %arg11[%363, %c0_99, %c0_100] : memref<16x16x512xf32, #tpu.memory_space<vmem>>, vector<1x16x512xf32>
    %365 = vector.shape_cast %364 : vector<1x16x512xf32> to vector<16x512xf32>
    %366 = arith.truncf %362 : vector<16x128xf32> to vector<16x128xbf16>
    %c0_101 = arith.constant 0 : index
    %c0_102 = arith.constant 0 : index
    %367 = vector.load %arg3[%c0_101, %c0_102] : memref<128x512xbf16, #tpu.memory_space<vmem>>, vector<128x512xbf16>
    %cst_103 = arith.constant dense<0.000000e+00> : vector<16x512xf32>
    %368 = tpu.matmul %366, %367, %cst_103 {dimension_numbers = #tpu.dot_dimension_numbers<[1], [0], [0], [1], [0, 0, 1, 1], [], []>} : vector<16x128xbf16>, vector<128x512xbf16>, vector<16x512xf32> -> vector<16x512xf32>
    %369 = arith.addf %365, %368 : vector<16x512xf32>
    %370 = vector.extract_strided_slice %369 {offsets = [0, 0], sizes = [16, 128], strides = [1, 1]} : vector<16x512xf32> to vector<16x128xf32>
    %371 = arith.negf %370 : vector<16x128xf32>
    %372 = math.exp %371 : vector<16x128xf32>
    %cst_104 = arith.constant 1.000000e+00 : f32
    %373 = vector.broadcast %cst_104 : f32 to vector<16x128xf32>
    %374 = arith.addf %373, %372 : vector<16x128xf32>
    %375 = arith.divf %373, %374 : vector<16x128xf32>
    %376 = vector.extract_strided_slice %369 {offsets = [0, 128], sizes = [16, 128], strides = [1, 1]} : vector<16x512xf32> to vector<16x128xf32>
    %377 = arith.negf %376 : vector<16x128xf32>
    %378 = math.exp %377 : vector<16x128xf32>
    %cst_105 = arith.constant 1.000000e+00 : f32
    %379 = vector.broadcast %cst_105 : f32 to vector<16x128xf32>
    %380 = arith.addf %379, %378 : vector<16x128xf32>
    %381 = arith.divf %379, %380 : vector<16x128xf32>
    %382 = vector.extract_strided_slice %369 {offsets = [0, 256], sizes = [16, 128], strides = [1, 1]} : vector<16x512xf32> to vector<16x128xf32>
    %383 = math.tanh %382 : vector<16x128xf32>
    %384 = vector.extract_strided_slice %369 {offsets = [0, 384], sizes = [16, 128], strides = [1, 1]} : vector<16x512xf32> to vector<16x128xf32>
    %385 = arith.negf %384 : vector<16x128xf32>
    %386 = math.exp %385 : vector<16x128xf32>
    %cst_106 = arith.constant 1.000000e+00 : f32
    %387 = vector.broadcast %cst_106 : f32 to vector<16x128xf32>
    %388 = arith.addf %387, %386 : vector<16x128xf32>
    %389 = arith.divf %387, %388 : vector<16x128xf32>
    %390 = arith.mulf %381, %360 : vector<16x128xf32>
    %391 = arith.mulf %375, %383 : vector<16x128xf32>
    %392 = arith.addf %390, %391 : vector<16x128xf32>
    %393 = math.tanh %392 : vector<16x128xf32>
    %394 = arith.mulf %389, %393 : vector<16x128xf32>
    %c12_i32 = arith.constant 12 : i32
    %395 = arith.index_cast %c12_i32 : i32 to index
    %c0_107 = arith.constant 0 : index
    %c0_108 = arith.constant 0 : index
    %396 = vector.load %arg11[%395, %c0_107, %c0_108] : memref<16x16x512xf32, #tpu.memory_space<vmem>>, vector<1x16x512xf32>
    %397 = vector.shape_cast %396 : vector<1x16x512xf32> to vector<16x512xf32>
    %398 = arith.truncf %394 : vector<16x128xf32> to vector<16x128xbf16>
    %c0_109 = arith.constant 0 : index
    %c0_110 = arith.constant 0 : index
    %399 = vector.load %arg3[%c0_109, %c0_110] : memref<128x512xbf16, #tpu.memory_space<vmem>>, vector<128x512xbf16>
    %cst_111 = arith.constant dense<0.000000e+00> : vector<16x512xf32>
    %400 = tpu.matmul %398, %399, %cst_111 {dimension_numbers = #tpu.dot_dimension_numbers<[1], [0], [0], [1], [0, 0, 1, 1], [], []>} : vector<16x128xbf16>, vector<128x512xbf16>, vector<16x512xf32> -> vector<16x512xf32>
    %401 = arith.addf %397, %400 : vector<16x512xf32>
    %402 = vector.extract_strided_slice %401 {offsets = [0, 0], sizes = [16, 128], strides = [1, 1]} : vector<16x512xf32> to vector<16x128xf32>
    %403 = arith.negf %402 : vector<16x128xf32>
    %404 = math.exp %403 : vector<16x128xf32>
    %cst_112 = arith.constant 1.000000e+00 : f32
    %405 = vector.broadcast %cst_112 : f32 to vector<16x128xf32>
    %406 = arith.addf %405, %404 : vector<16x128xf32>
    %407 = arith.divf %405, %406 : vector<16x128xf32>
    %408 = vector.extract_strided_slice %401 {offsets = [0, 128], sizes = [16, 128], strides = [1, 1]} : vector<16x512xf32> to vector<16x128xf32>
    %409 = arith.negf %408 : vector<16x128xf32>
    %410 = math.exp %409 : vector<16x128xf32>
    %cst_113 = arith.constant 1.000000e+00 : f32
    %411 = vector.broadcast %cst_113 : f32 to vector<16x128xf32>
    %412 = arith.addf %411, %410 : vector<16x128xf32>
    %413 = arith.divf %411, %412 : vector<16x128xf32>
    %414 = vector.extract_strided_slice %401 {offsets = [0, 256], sizes = [16, 128], strides = [1, 1]} : vector<16x512xf32> to vector<16x128xf32>
    %415 = math.tanh %414 : vector<16x128xf32>
    %416 = vector.extract_strided_slice %401 {offsets = [0, 384], sizes = [16, 128], strides = [1, 1]} : vector<16x512xf32> to vector<16x128xf32>
    %417 = arith.negf %416 : vector<16x128xf32>
    %418 = math.exp %417 : vector<16x128xf32>
    %cst_114 = arith.constant 1.000000e+00 : f32
    %419 = vector.broadcast %cst_114 : f32 to vector<16x128xf32>
    %420 = arith.addf %419, %418 : vector<16x128xf32>
    %421 = arith.divf %419, %420 : vector<16x128xf32>
    %422 = arith.mulf %413, %392 : vector<16x128xf32>
    %423 = arith.mulf %407, %415 : vector<16x128xf32>
    %424 = arith.addf %422, %423 : vector<16x128xf32>
    %425 = math.tanh %424 : vector<16x128xf32>
    %426 = arith.mulf %421, %425 : vector<16x128xf32>
    %c13_i32 = arith.constant 13 : i32
    %427 = arith.index_cast %c13_i32 : i32 to index
    %c0_115 = arith.constant 0 : index
    %c0_116 = arith.constant 0 : index
    %428 = vector.load %arg11[%427, %c0_115, %c0_116] : memref<16x16x512xf32, #tpu.memory_space<vmem>>, vector<1x16x512xf32>
    %429 = vector.shape_cast %428 : vector<1x16x512xf32> to vector<16x512xf32>
    %430 = arith.truncf %426 : vector<16x128xf32> to vector<16x128xbf16>
    %c0_117 = arith.constant 0 : index
    %c0_118 = arith.constant 0 : index
    %431 = vector.load %arg3[%c0_117, %c0_118] : memref<128x512xbf16, #tpu.memory_space<vmem>>, vector<128x512xbf16>
    %cst_119 = arith.constant dense<0.000000e+00> : vector<16x512xf32>
    %432 = tpu.matmul %430, %431, %cst_119 {dimension_numbers = #tpu.dot_dimension_numbers<[1], [0], [0], [1], [0, 0, 1, 1], [], []>} : vector<16x128xbf16>, vector<128x512xbf16>, vector<16x512xf32> -> vector<16x512xf32>
    %433 = arith.addf %429, %432 : vector<16x512xf32>
    %434 = vector.extract_strided_slice %433 {offsets = [0, 0], sizes = [16, 128], strides = [1, 1]} : vector<16x512xf32> to vector<16x128xf32>
    %435 = arith.negf %434 : vector<16x128xf32>
    %436 = math.exp %435 : vector<16x128xf32>
    %cst_120 = arith.constant 1.000000e+00 : f32
    %437 = vector.broadcast %cst_120 : f32 to vector<16x128xf32>
    %438 = arith.addf %437, %436 : vector<16x128xf32>
    %439 = arith.divf %437, %438 : vector<16x128xf32>
    %440 = vector.extract_strided_slice %433 {offsets = [0, 128], sizes = [16, 128], strides = [1, 1]} : vector<16x512xf32> to vector<16x128xf32>
    %441 = arith.negf %440 : vector<16x128xf32>
    %442 = math.exp %441 : vector<16x128xf32>
    %cst_121 = arith.constant 1.000000e+00 : f32
    %443 = vector.broadcast %cst_121 : f32 to vector<16x128xf32>
    %444 = arith.addf %443, %442 : vector<16x128xf32>
    %445 = arith.divf %443, %444 : vector<16x128xf32>
    %446 = vector.extract_strided_slice %433 {offsets = [0, 256], sizes = [16, 128], strides = [1, 1]} : vector<16x512xf32> to vector<16x128xf32>
    %447 = math.tanh %446 : vector<16x128xf32>
    %448 = vector.extract_strided_slice %433 {offsets = [0, 384], sizes = [16, 128], strides = [1, 1]} : vector<16x512xf32> to vector<16x128xf32>
    %449 = arith.negf %448 : vector<16x128xf32>
    %450 = math.exp %449 : vector<16x128xf32>
    %cst_122 = arith.constant 1.000000e+00 : f32
    %451 = vector.broadcast %cst_122 : f32 to vector<16x128xf32>
    %452 = arith.addf %451, %450 : vector<16x128xf32>
    %453 = arith.divf %451, %452 : vector<16x128xf32>
    %454 = arith.mulf %445, %424 : vector<16x128xf32>
    %455 = arith.mulf %439, %447 : vector<16x128xf32>
    %456 = arith.addf %454, %455 : vector<16x128xf32>
    %457 = math.tanh %456 : vector<16x128xf32>
    %458 = arith.mulf %453, %457 : vector<16x128xf32>
    %c14_i32 = arith.constant 14 : i32
    %459 = arith.index_cast %c14_i32 : i32 to index
    %c0_123 = arith.constant 0 : index
    %c0_124 = arith.constant 0 : index
    %460 = vector.load %arg11[%459, %c0_123, %c0_124] : memref<16x16x512xf32, #tpu.memory_space<vmem>>, vector<1x16x512xf32>
    %461 = vector.shape_cast %460 : vector<1x16x512xf32> to vector<16x512xf32>
    %462 = arith.truncf %458 : vector<16x128xf32> to vector<16x128xbf16>
    %c0_125 = arith.constant 0 : index
    %c0_126 = arith.constant 0 : index
    %463 = vector.load %arg3[%c0_125, %c0_126] : memref<128x512xbf16, #tpu.memory_space<vmem>>, vector<128x512xbf16>
    %cst_127 = arith.constant dense<0.000000e+00> : vector<16x512xf32>
    %464 = tpu.matmul %462, %463, %cst_127 {dimension_numbers = #tpu.dot_dimension_numbers<[1], [0], [0], [1], [0, 0, 1, 1], [], []>} : vector<16x128xbf16>, vector<128x512xbf16>, vector<16x512xf32> -> vector<16x512xf32>
    %465 = arith.addf %461, %464 : vector<16x512xf32>
    %466 = vector.extract_strided_slice %465 {offsets = [0, 0], sizes = [16, 128], strides = [1, 1]} : vector<16x512xf32> to vector<16x128xf32>
    %467 = arith.negf %466 : vector<16x128xf32>
    %468 = math.exp %467 : vector<16x128xf32>
    %cst_128 = arith.constant 1.000000e+00 : f32
    %469 = vector.broadcast %cst_128 : f32 to vector<16x128xf32>
    %470 = arith.addf %469, %468 : vector<16x128xf32>
    %471 = arith.divf %469, %470 : vector<16x128xf32>
    %472 = vector.extract_strided_slice %465 {offsets = [0, 128], sizes = [16, 128], strides = [1, 1]} : vector<16x512xf32> to vector<16x128xf32>
    %473 = arith.negf %472 : vector<16x128xf32>
    %474 = math.exp %473 : vector<16x128xf32>
    %cst_129 = arith.constant 1.000000e+00 : f32
    %475 = vector.broadcast %cst_129 : f32 to vector<16x128xf32>
    %476 = arith.addf %475, %474 : vector<16x128xf32>
    %477 = arith.divf %475, %476 : vector<16x128xf32>
    %478 = vector.extract_strided_slice %465 {offsets = [0, 256], sizes = [16, 128], strides = [1, 1]} : vector<16x512xf32> to vector<16x128xf32>
    %479 = math.tanh %478 : vector<16x128xf32>
    %480 = vector.extract_strided_slice %465 {offsets = [0, 384], sizes = [16, 128], strides = [1, 1]} : vector<16x512xf32> to vector<16x128xf32>
    %481 = arith.negf %480 : vector<16x128xf32>
    %482 = math.exp %481 : vector<16x128xf32>
    %cst_130 = arith.constant 1.000000e+00 : f32
    %483 = vector.broadcast %cst_130 : f32 to vector<16x128xf32>
    %484 = arith.addf %483, %482 : vector<16x128xf32>
    %485 = arith.divf %483, %484 : vector<16x128xf32>
    %486 = arith.mulf %477, %456 : vector<16x128xf32>
    %487 = arith.mulf %471, %479 : vector<16x128xf32>
    %488 = arith.addf %486, %487 : vector<16x128xf32>
    %489 = math.tanh %488 : vector<16x128xf32>
    %490 = arith.mulf %485, %489 : vector<16x128xf32>
    %c15_i32 = arith.constant 15 : i32
    %491 = arith.index_cast %c15_i32 : i32 to index
    %c0_131 = arith.constant 0 : index
    %c0_132 = arith.constant 0 : index
    %492 = vector.load %arg11[%491, %c0_131, %c0_132] : memref<16x16x512xf32, #tpu.memory_space<vmem>>, vector<1x16x512xf32>
    %493 = vector.shape_cast %492 : vector<1x16x512xf32> to vector<16x512xf32>
    %494 = arith.truncf %490 : vector<16x128xf32> to vector<16x128xbf16>
    %c0_133 = arith.constant 0 : index
    %c0_134 = arith.constant 0 : index
    %495 = vector.load %arg3[%c0_133, %c0_134] : memref<128x512xbf16, #tpu.memory_space<vmem>>, vector<128x512xbf16>
    %cst_135 = arith.constant dense<0.000000e+00> : vector<16x512xf32>
    %496 = tpu.matmul %494, %495, %cst_135 {dimension_numbers = #tpu.dot_dimension_numbers<[1], [0], [0], [1], [0, 0, 1, 1], [], []>} : vector<16x128xbf16>, vector<128x512xbf16>, vector<16x512xf32> -> vector<16x512xf32>
    %497 = arith.addf %493, %496 : vector<16x512xf32>
    %498 = vector.extract_strided_slice %497 {offsets = [0, 0], sizes = [16, 128], strides = [1, 1]} : vector<16x512xf32> to vector<16x128xf32>
    %499 = arith.negf %498 : vector<16x128xf32>
    %500 = math.exp %499 : vector<16x128xf32>
    %cst_136 = arith.constant 1.000000e+00 : f32
    %501 = vector.broadcast %cst_136 : f32 to vector<16x128xf32>
    %502 = arith.addf %501, %500 : vector<16x128xf32>
    %503 = arith.divf %501, %502 : vector<16x128xf32>
    %504 = vector.extract_strided_slice %497 {offsets = [0, 128], sizes = [16, 128], strides = [1, 1]} : vector<16x512xf32> to vector<16x128xf32>
    %505 = arith.negf %504 : vector<16x128xf32>
    %506 = math.exp %505 : vector<16x128xf32>
    %cst_137 = arith.constant 1.000000e+00 : f32
    %507 = vector.broadcast %cst_137 : f32 to vector<16x128xf32>
    %508 = arith.addf %507, %506 : vector<16x128xf32>
    %509 = arith.divf %507, %508 : vector<16x128xf32>
    %510 = vector.extract_strided_slice %497 {offsets = [0, 256], sizes = [16, 128], strides = [1, 1]} : vector<16x512xf32> to vector<16x128xf32>
    %511 = math.tanh %510 : vector<16x128xf32>
    %512 = vector.extract_strided_slice %497 {offsets = [0, 384], sizes = [16, 128], strides = [1, 1]} : vector<16x512xf32> to vector<16x128xf32>
    %513 = arith.negf %512 : vector<16x128xf32>
    %514 = math.exp %513 : vector<16x128xf32>
    %cst_138 = arith.constant 1.000000e+00 : f32
    %515 = vector.broadcast %cst_138 : f32 to vector<16x128xf32>
    %516 = arith.addf %515, %514 : vector<16x128xf32>
    %517 = arith.divf %515, %516 : vector<16x128xf32>
    %518 = arith.mulf %509, %488 : vector<16x128xf32>
    %519 = arith.mulf %503, %511 : vector<16x128xf32>
    %520 = arith.addf %518, %519 : vector<16x128xf32>
    %521 = math.tanh %520 : vector<16x128xf32>
    %522 = arith.mulf %517, %521 : vector<16x128xf32>
    %c16_i32 = arith.constant 16 : i32
    %c15 = arith.constant 15 : index
    %c0_139 = arith.constant 0 : index
    %c0_140 = arith.constant 0 : index
    %523 = vector.load %arg1[%c15, %c0_139, %c0_140] : memref<16x16x128xbf16, #tpu.memory_space<vmem>>, vector<1x16x128xbf16>
    %524 = vector.shape_cast %523 : vector<1x16x128xbf16> to vector<16x128xbf16>
    %c0_141 = arith.constant 0 : index
    %c0_142 = arith.constant 0 : index
    %525 = vector.load %arg5[%c0_141, %c0_142] : memref<128x512xbf16, #tpu.memory_space<vmem>>, vector<128x512xbf16>
    %cst_143 = arith.constant dense<0.000000e+00> : vector<16x512xf32>
    %526 = tpu.matmul %524, %525, %cst_143 {dimension_numbers = #tpu.dot_dimension_numbers<[1], [0], [0], [1], [0, 0, 1, 1], [], []>} : vector<16x128xbf16>, vector<128x512xbf16>, vector<16x512xf32> -> vector<16x512xf32>
    %c0_144 = arith.constant 0 : index
    %c0_145 = arith.constant 0 : index
    %527 = vector.load %arg6[%c0_144, %c0_145] : memref<1x512xf32, #tpu.memory_space<vmem>>, vector<1x512xf32>
    %528 = vector.broadcast %527 : vector<1x512xf32> to vector<16x512xf32>
    %529 = arith.addf %526, %528 : vector<16x512xf32>
    %530 = vector.extract_strided_slice %529 {offsets = [0, 0], sizes = [16, 128], strides = [1, 1]} : vector<16x512xf32> to vector<16x128xf32>
    %531 = arith.negf %530 : vector<16x128xf32>
    %532 = math.exp %531 : vector<16x128xf32>
    %cst_146 = arith.constant 1.000000e+00 : f32
    %533 = vector.broadcast %cst_146 : f32 to vector<16x128xf32>
    %534 = arith.addf %533, %532 : vector<16x128xf32>
    %535 = arith.divf %533, %534 : vector<16x128xf32>
    %536 = vector.extract_strided_slice %529 {offsets = [0, 256], sizes = [16, 128], strides = [1, 1]} : vector<16x512xf32> to vector<16x128xf32>
    %537 = math.tanh %536 : vector<16x128xf32>
    %538 = vector.extract_strided_slice %529 {offsets = [0, 384], sizes = [16, 128], strides = [1, 1]} : vector<16x512xf32> to vector<16x128xf32>
    %539 = arith.negf %538 : vector<16x128xf32>
    %540 = math.exp %539 : vector<16x128xf32>
    %cst_147 = arith.constant 1.000000e+00 : f32
    %541 = vector.broadcast %cst_147 : f32 to vector<16x128xf32>
    %542 = arith.addf %541, %540 : vector<16x128xf32>
    %543 = arith.divf %541, %542 : vector<16x128xf32>
    %544 = arith.mulf %535, %537 : vector<16x128xf32>
    %545 = math.tanh %544 : vector<16x128xf32>
    %546 = arith.mulf %543, %545 : vector<16x128xf32>
    %c0_148 = arith.constant 0 : index
    %c0_149 = arith.constant 0 : index
    %547 = vector.load %arg7[%c0_148, %c0_149] : memref<128x1xf32, #tpu.memory_space<vmem>>, vector<128x1xf32>
    %cst_150 = arith.constant dense<0.000000e+00> : vector<16x1xf32>
    %548 = tpu.matmul %522, %547, %cst_150 {dimension_numbers = #tpu.dot_dimension_numbers<[1], [0], [0], [1], [0, 0, 1, 1], [], []>} : vector<16x128xf32>, vector<128x1xf32>, vector<16x1xf32> -> vector<16x1xf32>
    %c0_151 = arith.constant 0 : index
    %c0_152 = arith.constant 0 : index
    %549 = vector.load %arg8[%c0_151, %c0_152] : memref<128x1xf32, #tpu.memory_space<vmem>>, vector<128x1xf32>
    %cst_153 = arith.constant dense<0.000000e+00> : vector<16x1xf32>
    %550 = tpu.matmul %546, %549, %cst_153 {dimension_numbers = #tpu.dot_dimension_numbers<[1], [0], [0], [1], [0, 0, 1, 1], [], []>} : vector<16x128xf32>, vector<128x1xf32>, vector<16x1xf32> -> vector<16x1xf32>
    %551 = arith.addf %548, %550 : vector<16x1xf32>
    %c0_154 = arith.constant 0 : index
    %c0_155 = arith.constant 0 : index
    %552 = vector.load %arg9[%c0_154, %c0_155] : memref<1x1xf32, #tpu.memory_space<vmem>>, vector<1x1xf32>
    %553 = vector.broadcast %552 : vector<1x1xf32> to vector<16x1xf32>
    %554 = arith.addf %551, %553 : vector<16x1xf32>
    %c0_156 = arith.constant 0 : index
    %c0_157 = arith.constant 0 : index
    %555 = vector.load %arg10[%c0_156, %c0_157] : memref<16x1xf32, #tpu.memory_space<vmem>>, vector<16x1xf32>
    tpu.vector_store %arg10[%c0_156, %c0_157], %554 {strides = array<i32>} : memref<16x1xf32, #tpu.memory_space<vmem>>, vector<16x1xf32>,
    return
  }
  func.func @transform_0(%arg0: i32) -> (i32, i32, i32) {
    %c0_i32 = arith.constant 0 : i32
    %c0_i32_0 = arith.constant 0 : i32
    %c0_i32_1 = arith.constant 0 : i32
    return %c0_i32, %arg0, %c0_i32_0 : i32, i32, i32
  }
  func.func @transform_1(%arg0: i32) -> (i32, i32) {
    %c0_i32 = arith.constant 0 : i32
    %c0_i32_0 = arith.constant 0 : i32
    %c0_i32_1 = arith.constant 0 : i32
    return %c0_i32, %c0_i32_0 : i32, i32
  }
  func.func @transform_2(%arg0: i32) -> (i32, i32) {
    %c0_i32 = arith.constant 0 : i32
    %c0_i32_0 = arith.constant 0 : i32
    %c0_i32_1 = arith.constant 0 : i32
    return %c0_i32, %c0_i32_0 : i32, i32
  }
  func.func @transform_3(%arg0: i32) -> (i32, i32) {
    %c0_i32 = arith.constant 0 : i32
    %c0_i32_0 = arith.constant 0 : i32
    %c0_i32_1 = arith.constant 0 : i32
    return %c0_i32, %c0_i32_0 : i32, i32
  }
  func.func @transform_4(%arg0: i32) -> (i32, i32) {
    %c0_i32 = arith.constant 0 : i32
    %c0_i32_0 = arith.constant 0 : i32
    %c0_i32_1 = arith.constant 0 : i32
    return %c0_i32, %c0_i32_0 : i32, i32
  }
  func.func @transform_5(%arg0: i32) -> (i32, i32) {
    %c0_i32 = arith.constant 0 : i32
    %c0_i32_0 = arith.constant 0 : i32
    %c0_i32_1 = arith.constant 0 : i32
    return %c0_i32, %c0_i32_0 : i32, i32
  }
  func.func @transform_6(%arg0: i32) -> (i32, i32) {
    %c0_i32 = arith.constant 0 : i32
    %c0_i32_0 = arith.constant 0 : i32
    %c0_i32_1 = arith.constant 0 : i32
    return %c0_i32, %c0_i32_0 : i32, i32
  }
  func.func @transform_7(%arg0: i32) -> (i32, i32) {
    %c0_i32 = arith.constant 0 : i32
    %c0_i32_0 = arith.constant 0 : i32
    %c0_i32_1 = arith.constant 0 : i32
    return %c0_i32, %c0_i32_0 : i32, i32
  }
  func.func @transform_8(%arg0: i32) -> (i32, i32) {
    %c0_i32 = arith.constant 0 : i32
    %c0_i32_0 = arith.constant 0 : i32
    %c0_i32_1 = arith.constant 0 : i32
    return %c0_i32, %c0_i32_0 : i32, i32
  }
  func.func @transform_9(%arg0: i32) -> (i32, i32) {
    %c0_i32 = arith.constant 0 : i32
    %c0_i32_0 = arith.constant 0 : i32
    return %arg0, %c0_i32 : i32, i32
  }
}

</mosaic_0001>

<bundles_post_ra>
// kernel: tpu_custom_call.1
= control target key start
LH: loop header
LB: loop body
LE: loop exit
PB: predicated region body
PF: predicated region fallthrough
CT: control target
= control target key end

     0   :  { %s7698_s0 = inlined_call_operand.vmem [shape: bf16[16,32,128], index: 0, kind: input, shape index: {}]   ;;  %s7699_s1 = inlined_call_operand.hbm [shape: bf16[128,512], index: 1, kind: input, shape index: {}]   ;;  %s7700_s2 = inlined_call_operand.hbm [shape: bf16[128,512], index: 2, kind: input, shape index: {}]   ;;  %s7701_s3 = inlined_call_operand.vmem [shape: f32[1,512], index: 3, kind: input, shape index: {}]   ;;  %s7702_s4 = inlined_call_operand.hbm [shape: bf16[128,512], index: 4, kind: input, shape index: {}]   ;;  %s7703_s5 = inlined_call_operand.vmem [shape: f32[1,512], index: 5, kind: input, shape index: {}]   ;;  %s7704_s6 = inlined_call_operand.vmem [shape: f32[128,1], index: 6, kind: input, shape index: {}]   ;;  %s7705_s7 = inlined_call_operand.vmem [shape: f32[128,1], index: 7, kind: input, shape index: {}]   ;;  %s7706_s8 = inlined_call_operand.<no memory space> [shape: f32[1,1], index: 8, kind: input, shape index: {}]   ;;  %s7707_s9 = inlined_call_operand.vmem [shape: f32[32,1], index: 9, kind: output, shape index: {}]  }
   0x1   :  { %v14_v0 = vstv %s7706_s8 }
   0x2   :  { %15 = vst [vmem:[#allocation3] sm:$0x1] %v14_v0 }
   0x3   :  { %16 = vsyncpa [#allocation6], 0 }
   0x4   :  { %17 = vsyncpa [#allocation8], 0  ;;  %s6337_s11 = smov 0   ;;  %s6339_s12 = smov 0  }
   0x5   :  { %s6341_s13 = smov 0  }
   0x6 LB: > { %s7710_s8 = sadd.s32 4294967295, %s6276_s13   ;;  %s6354_s14 = sadd.s32 1, %s6276_s13   ;;  %s6276_s13 = sphi %s6341_s13, %s7725_s13   ;;  %s6272_s12 = sphi %s6339_s12, %s7728_s12   ;;  %s6268_s11 = sphi %s6337_s11, %s7727_s11  }
   0x7   : > { %7714 = sst [smem:[#allocation12_spill]] %s6354_s14  ;;  %s27_s15 = ssub.s32 %s6276_s13, %s6354_s14 }
   0x8   : > { %s30_s16 = sadd.s32 1, %s6272_s12  ;;  %p28_p0 = scmp.eq.s32.totalorder %s27_s15, 0 }
   0x9   : > { %p37_p1 = scmp.ne.s32.totalorder %s6272_s12, %s6268_s11  ;;  %p38_p2 = scmp.eq.s32.totalorder %s6276_s13, 0 }
   0xa   : > { %p4649_p3 = scmp.ge.s32.totalorder %s6276_s13, 1  ;;  %p248_p5 = scmp.lt.s32.totalorder %s6276_s13, 3 }
   0xb   : > { %s6364_s17 = scalar_select %p28_p0, %s6272_s12, %s30_s16  }
   0xc   : > { %p6366_p4 = por %p38_p2, %p37_p1  ;;  %p6373_p6 = scmp.eq.s32.totalorder %s7710_s8, 0 }
   0xd   : > { %7715 = sst [smem:[#allocation13_spill]] %s6364_s17  ;;  %p6377_p7 = pnand %p4649_p3, %p248_p5 }
   0xe   : > { %s7716_s18 = scalar_select %p6366_p4, 1, 0 }
   0xf   : > { %s7717_s19 = scalar_select %p6373_p6, 1, 0 }
  0x10   : > { %s7718_s20 = scalar_select %p6377_p7, 1, 0 }
  0x11   : > { %p5323_p8 = pneg %p6377_p7  ;;  %s6278_s21 = smov [#allocation7]  }
  0x12   : > { %s273_s22 = sshll.u32 %s6278_s21, 4  ;;  %s6279_s24 = smov [#allocation5]   ;;  %s6383_s22 = int_to_ptr.vmem [resolvable:$true] %s273_s22 }
  0x13   : > { %p6387_p9 = pnand %p6373_p6, %p5323_p8  ;;  %s260_s25 = sshll.u32 %s6279_s24, 4  ;;  %s6391_s25 = int_to_ptr.vmem [resolvable:$true] %s260_s25 }
  0x14   : > { %s6280_s26 = smov [#allocation9]   ;;  %s6162_s30 = scalar_lea.hbm %s7700_s2, 4096 }
  0x15   : > { %s6393_s27 = sshll.u32 %s6280_s26, 4  ;;  %p6163_p10 = scmp.ne.s32.totalorder %s7700_s2, %s6162_s30  ;;  %s290_s27 = int_to_ptr.vmem [resolvable:$true] %s6393_s27 }
  0x16   : > { %p6403_p11 = pneg %p6387_p9  ;;  %p6169_p0 = scmp.lt.u32.totalorder %s6162_s30, %s7700_s2 }
  0x18   : > { %p6165_p12 = pnand %p6403_p11, %p6163_p10 }
  0x1a   : > { %p6166_p13 = pneg %p6165_p12 }
  0x1c   : > { %p6171_p1 = pnand %p6169_p0, %p6166_p13 }
  0x1e   : > { %6174 = shalt.err (!%p6171_p1)
}
  0x1f   : > { %s6175_s26 = scalar_lea.vmem %s6383_s22, 4096  ;;  %p6183_p8 = scmp.lt.s32.totalorder %s6383_s22, %s6383_s22 }
  0x20   : > { %p6176_p2 = scmp.ne.s32.totalorder %s6383_s22, %s6175_s26  ;;  %p6184_p6 = scmp.lt.s32.totalorder %s6175_s26, %s6175_s26 }
  0x22   : > { %p6178_p3 = pnand %p6176_p2, %p6403_p11  ;;  %p6185_p10 = por %p6184_p6, %p6183_p8 }
  0x24   : > { %p6179_p5 = pneg %p6178_p3 }
  0x26   : > { %p6186_p12 = pnand %p6185_p10, %p6179_p5 }
  0x28   : > { %6189 = shalt.err (!%p6186_p12)
}
  0x29   : > { %s6281_s28 = smov 256   ;;  %s6282_s29 = smov 16  }
  0x2a   : > { %5329 = dma.hbm_to_vmem [thread:$0]  (!%p6387_p9), %s7700_s2, 4096, %s6383_s22, [#allocation8], %s6281_s28, %s6281_s28, %s6282_s29  }
  0x2b   : > { %s6190_s24 = scalar_lea.hbm %s7699_s1, 4096 }
  0x2c   : > { %p6191_p6 = scmp.ne.s32.totalorder %s7699_s1, %s6190_s24  ;;  %p6197_p1 = scmp.lt.u32.totalorder %s6190_s24, %s7699_s1 }
  0x2e   : > { %p6193_p13 = pnand %p6191_p6, %p6403_p11 }
  0x30   : > { %p6194_p0 = pneg %p6193_p13 }
  0x32   : > { %p6199_p2 = pnand %p6197_p1, %p6194_p0 }
  0x34   : > { %6202 = shalt.err (!%p6199_p2)
}
  0x35   : > { %s6203_s22 = scalar_lea.vmem %s6391_s25, 4096  ;;  %p6211_p10 = scmp.lt.s32.totalorder %s6391_s25, %s6391_s25 }
  0x36   : > { %p6204_p3 = scmp.ne.s32.totalorder %s6391_s25, %s6203_s22  ;;  %p6212_p12 = scmp.lt.s32.totalorder %s6203_s22, %s6203_s22 }
  0x38   : > { %p6206_p5 = pnand %p6204_p3, %p6403_p11  ;;  %p6213_p6 = por %p6212_p12, %p6211_p10 }
  0x3a   : > { %p6207_p8 = pneg %p6206_p5 }
  0x3c   : > { %p6214_p13 = pnand %p6213_p6, %p6207_p8 }
  0x3e   : > { %6217 = shalt.err (!%p6214_p13)
}
  0x3f   : > { %5326 = dma.hbm_to_vmem [thread:$0]  (!%p6387_p9), %s7699_s1, 4096, %s6391_s25, [#allocation6], %s6281_s28, %s6281_s28, %s6282_s29  }
  0x40   : > { %s6218_s10 = scalar_lea.hbm %s7702_s4, 4096 }
  0x41   : > { %p6219_p0 = scmp.ne.s32.totalorder %s7702_s4, %s6218_s10  ;;  %p6225_p3 = scmp.lt.u32.totalorder %s6218_s10, %s7702_s4 }
  0x43   : > { %p6221_p1 = pnand %p6219_p0, %p6403_p11 }
  0x45   : > { %p6222_p2 = pneg %p6221_p1 }
  0x47   : > { %p6227_p5 = pnand %p6225_p3, %p6222_p2 }
  0x49   : > { %6230 = shalt.err (!%p6227_p5)
}
  0x4a   : > { %s6231_s22 = scalar_lea.vmem %s290_s27, 4096  ;;  %p6239_p6 = scmp.lt.s32.totalorder %s290_s27, %s290_s27 }
  0x4b   : > { %p6232_p8 = scmp.ne.s32.totalorder %s290_s27, %s6231_s22  ;;  %p6240_p13 = scmp.lt.s32.totalorder %s6231_s22, %s6231_s22 }
  0x4d   : > { %p6234_p10 = pnand %p6232_p8, %p6403_p11  ;;  %p6241_p7 = por %p6240_p13, %p6239_p6 }
  0x4f   : > { %p6235_p12 = pneg %p6234_p10 }
  0x51   : > { %p6242_p4 = pnand %p6241_p7, %p6235_p12 }
  0x53   : > { %6245 = shalt.err (!%p6242_p4)
}
  0x54   : > { %5332 = dma.hbm_to_vmem [thread:$0]  (!%p6387_p9), %s7702_s4, 4096, %s290_s27, [#allocation8], %s6281_s28, %s6281_s28, %s6282_s29  }
  0x55   : > { %p4653_p0 = scmp.ge.s32.totalorder %s6276_s13, 2 }
  0x56   : > { %p7721_p11 = scmp.ne.s32.totalorder (!%p4653_p0), %s7716_s18, 0 }
  0x57   : > { %311 = sbr.rel (%p4653_p0) target bundleno = 106 (0x6a), region = 48 }
  0x5e   : > { %314 = sbr.rel (!%p7721_p11) target bundleno = 106 (0x6a), region = 52  ;;  %s316_s16 = sand.u32 (%p7721_p11), 1, %s6272_s12  }
  0x5f   : > { %s4882_s14 = sshll.u32 (%p7721_p11), %s6276_s13, 3  ;;  %s4654_s17 = sshll.u32 (%p7721_p11), %s316_s16, 7 }
  0x60   : > { %s6483_s10 = scalar_lea.vmem (%p7721_p11), %s7698_s0, %s4882_s14  ;;  %s318_s18 = scalar_lea.vmem (%p7721_p11), [#allocation4], %s4654_s17 }
  0x61   : > { %v337_v1 = vld [vmem:[%s6483_s10] sm:$0xff] (%p7721_p11)   ;;  %v341_v2 = vld [vmem:[%s6483_s10 + $0x10] sm:$0xff] (%p7721_p11)  }
  0x62   : > { %v345_v3 = vld [vmem:[%s6483_s10 + $0x20] sm:$0xff] (%p7721_p11)   ;;  %338 = vst [vmem:[%s318_s18] sm:$0xff] (%p7721_p11), %v337_v1   ;;  %342 = vst [vmem:[%s318_s18 + $0x8] sm:$0xff] (%p7721_p11), %v341_v2   ;;  %v349_v4 = vld [vmem:[%s6483_s10 + $0x30] sm:$0xff] (%p7721_p11)  }
  0x63   : > { %346 = vst [vmem:[%s318_s18 + $0x10] sm:$0xff] (%p7721_p11), %v345_v3   ;;  %v353_v5 = vld [vmem:[%s6483_s10 + $0x40] sm:$0xff] (%p7721_p11)   ;;  %v357_v6 = vld [vmem:[%s6483_s10 + $0x50] sm:$0xff] (%p7721_p11)   ;;  %350 = vst [vmem:[%s318_s18 + $0x18] sm:$0xff] (%p7721_p11), %v349_v4  }
  0x64   : > { %354 = vst [vmem:[%s318_s18 + $0x20] sm:$0xff] (%p7721_p11), %v353_v5   ;;  %358 = vst [vmem:[%s318_s18 + $0x28] sm:$0xff] (%p7721_p11), %v357_v6   ;;  %v361_v7 = vld [vmem:[%s6483_s10 + $0x60] sm:$0xff] (%p7721_p11)   ;;  %v365_v8 = vld [vmem:[%s6483_s10 + $0x70] sm:$0xff] (%p7721_p11)  }
  0x65   : > { %v369_v9 = vld [vmem:[%s6483_s10 + $0x80] sm:$0xff]   ;;  %362 = vst [vmem:[%s318_s18 + $0x30] sm:$0xff] %v361_v7   ;;  %366 = vst [vmem:[%s318_s18 + $0x38] sm:$0xff] %v365_v8   ;;  %v373_v10 = vld [vmem:[%s6483_s10 + $0x90] sm:$0xff]  }
  0x66   : > { %370 = vst [vmem:[%s318_s18 + $0x40] sm:$0xff] %v369_v9   ;;  %v377_v11 = vld [vmem:[%s6483_s10 + $0xa0] sm:$0xff]   ;;  %v381_v12 = vld [vmem:[%s6483_s10 + $0xb0] sm:$0xff]   ;;  %374 = vst [vmem:[%s318_s18 + $0x48] sm:$0xff] %v373_v10  }
  0x67   : > { %378 = vst [vmem:[%s318_s18 + $0x50] sm:$0xff] %v377_v11   ;;  %382 = vst [vmem:[%s318_s18 + $0x58] sm:$0xff] %v381_v12   ;;  %v385_v13 = vld [vmem:[%s6483_s10 + $0xc0] sm:$0xff]   ;;  %v389_v14 = vld [vmem:[%s6483_s10 + $0xd0] sm:$0xff]  }
  0x68   : > { %v393_v15 = vld [vmem:[%s6483_s10 + $0xe0] sm:$0xff]   ;;  %386 = vst [vmem:[%s318_s18 + $0x60] sm:$0xff] %v385_v13   ;;  %390 = vst [vmem:[%s318_s18 + $0x68] sm:$0xff] %v389_v14   ;;  %v397_v16 = vld [vmem:[%s6483_s10 + $0xf0] sm:$0xff]  }
  0x69   : > { %394 = vst [vmem:[%s318_s18 + $0x70] sm:$0xff] %v393_v15   ;;  %398 = vst [vmem:[%s318_s18 + $0x78] sm:$0xff] %v397_v16  }
  0x6a PF: > { %p7722_p4 = scmp.ne.s32.totalorder %s7718_s20, 0 }
  0x6b   : > { %s493_s27 = sand.u32 (!%p7722_p4), 1, %s6268_s11   ;;  %p7723_p7 = scmp.ne.s32.totalorder (!%p7722_p4), %s7717_s19, 0 }
  0x6c   : > { %490 = sbr.rel (%p7722_p4) target bundleno = 4732 (0x127c), region = 93  ;;  %s4658_s28 = sshll.u32 (!%p7722_p4), %s493_s27, 7 }
  0x6d   : > { %s6504_s29 = scalar_lea.vmem (!%p7722_p4), [#allocation4], %s4658_s28 }
  0x73   : > { %6259 = dma.done.wait (%p7723_p7), [#allocation6], 4096  }
  0x74   : > { %6261 = vsyncadd (%p7723_p7), [#allocation6], 4294963200 }
  0x75   : > { %6263 = dma.done.wait (%p7723_p7), [#allocation8], 8192  }
  0x76   : > { %6265 = vsyncadd (%p7723_p7), [#allocation8], 4294959104  ;;  %v6283_v17 = vmov 0   ;;  %v5369_v18 = vld [vmem:[#allocation5 + $0x4] ss:$16 sps:$4 sm:$0xff]   ;;  %v5421_v60 = vld [vmem:[%s6504_s29 + $0x8] sm:$0xff]  }
  0x77   : > { %922 = vmatprep.mubr.bf16.mxu0 %v6283_v17  ;;  %1115 = vmatprep.mubr.bf16.mxu1 %v6283_v17  ;;  %v5371_v19 = vld [vmem:[#allocation5 + $0xc] ss:$16 sps:$4 sm:$0xff]   ;;  %v5373_v20 = vld [vmem:[#allocation5] ss:$16 sps:$4 sm:$0xff]   ;;  %v5374_v21 = vld [vmem:[#allocation5 + $0x8] ss:$16 sps:$4 sm:$0xff]  }
  0x78   : > { %890 = vmatprep.subr.bf16.mxu0 %v5369_v18  ;;  %1083 = vmatprep.subr.bf16.mxu1 %v5371_v19  ;;  %v5375_v22 = vld [vmem:[#allocation5 + $0x24] ss:$16 sps:$4 sm:$0xff]   ;;  %v5377_v23 = vld [vmem:[#allocation5 + $0x2c] ss:$16 sps:$4 sm:$0xff]   ;;  %v5379_v24 = vld [vmem:[#allocation5 + $0x20] ss:$16 sps:$4 sm:$0xff]  }
  0x79   : > { %891 = vmatpush1.bf16.msra.mxu0 %v5373_v20  ;;  %1084 = vmatpush1.bf16.msra.mxu1 %v5374_v21  ;;  %v5380_v25 = vld [vmem:[#allocation5 + $0x28] ss:$16 sps:$4 sm:$0xff]   ;;  %v5381_v26 = vld [vmem:[#allocation5 + $0x44] ss:$16 sps:$4 sm:$0xff]   ;;  %v5383_v27 = vld [vmem:[#allocation5 + $0x4c] ss:$16 sps:$4 sm:$0xff]  }
  0x7a   : > { %892 = vmatprep.subr.bf16.mxu0 %v5375_v22  ;;  %1085 = vmatprep.subr.bf16.mxu1 %v5377_v23  ;;  %v5385_v28 = vld [vmem:[#allocation5 + $0x40] ss:$16 sps:$4 sm:$0xff]   ;;  %v5386_v29 = vld [vmem:[#allocation5 + $0x48] ss:$16 sps:$4 sm:$0xff]   ;;  %v5387_v30 = vld [vmem:[#allocation5 + $0x64] ss:$16 sps:$4 sm:$0xff]  }
  0x7b   : > { %v5389_v31 = vld [vmem:[#allocation5 + $0x6c] ss:$16 sps:$4 sm:$0xff]   ;;  %v5391_v32 = vld [vmem:[#allocation5 + $0x60] ss:$16 sps:$4 sm:$0xff]   ;;  %v5392_v33 = vld [vmem:[#allocation5 + $0x68] ss:$16 sps:$4 sm:$0xff]  }
  0x7c   : > { %v5393_v34 = vld [vmem:[#allocation5 + $0x84] ss:$16 sps:$4 sm:$0xff]   ;;  %v5395_v35 = vld [vmem:[#allocation5 + $0x8c] ss:$16 sps:$4 sm:$0xff]   ;;  %v5397_v36 = vld [vmem:[#allocation5 + $0x80] ss:$16 sps:$4 sm:$0xff]  }
  0x7d   : > { %893 = vmatpush1.bf16.msra.mxu0 %v5379_v24  ;;  %1086 = vmatpush1.bf16.msra.mxu1 %v5380_v25  ;;  %v5398_v37 = vld [vmem:[#allocation5 + $0x88] ss:$16 sps:$4 sm:$0xff]   ;;  %v5399_v38 = vld [vmem:[#allocation5 + $0xa4] ss:$16 sps:$4 sm:$0xff]   ;;  %v5401_v39 = vld [vmem:[#allocation5 + $0xac] ss:$16 sps:$4 sm:$0xff]  }
  0x7e   : > { %894 = vmatprep.subr.bf16.mxu0 %v5381_v26  ;;  %1087 = vmatprep.subr.bf16.mxu1 %v5383_v27  ;;  %v5403_v40 = vld [vmem:[#allocation5 + $0xa0] ss:$16 sps:$4 sm:$0xff]   ;;  %v5404_v41 = vld [vmem:[#allocation5 + $0xa8] ss:$16 sps:$4 sm:$0xff]   ;;  %v5405_v42 = vld [vmem:[#allocation5 + $0xc4] ss:$16 sps:$4 sm:$0xff]  }
  0x7f   : > { %v5407_v43 = vld [vmem:[#allocation5 + $0xcc] ss:$16 sps:$4 sm:$0xff]   ;;  %v5409_v44 = vld [vmem:[#allocation5 + $0xc0] ss:$16 sps:$4 sm:$0xff]   ;;  %v5410_v45 = vld [vmem:[#allocation5 + $0xc8] ss:$16 sps:$4 sm:$0xff]  }
  0x80   : > { %v5411_v46 = vld [vmem:[#allocation5 + $0xe4] ss:$16 sps:$4 sm:$0xff]   ;;  %v5413_v47 = vld [vmem:[#allocation5 + $0xec] ss:$16 sps:$4 sm:$0xff]   ;;  %v5415_v48 = vld [vmem:[#allocation5 + $0xe0] ss:$16 sps:$4 sm:$0xff]  }
  0x81   : > { %895 = vmatpush1.bf16.msra.mxu0 %v5385_v28  ;;  %1088 = vmatpush1.bf16.msra.mxu1 %v5386_v29  ;;  %v5416_v49 = vld [vmem:[#allocation5 + $0xe8] ss:$16 sps:$4 sm:$0xff]   ;;  %v6516_v50 = vld [vmem:[#allocation7 + $0x4] ss:$16 sps:$4 sm:$0xff]   ;;  %v6518_v51 = vld [vmem:[#allocation7 + $0xc] ss:$16 sps:$4 sm:$0xff]  }
  0x82   : > { %896 = vmatprep.subr.bf16.mxu0 %v5387_v30  ;;  %1089 = vmatprep.subr.bf16.mxu1 %v5389_v31  ;;  %v5417_v52 = vld [vmem:[%s6504_s29] sm:$0xff]   ;;  %v6527_v55 = vld [vmem:[#allocation7 + $0x8] ss:$16 sps:$4 sm:$0xff]   ;;  %v6529_v56 = vld [vmem:[#allocation7 + $0x2c] ss:$16 sps:$4 sm:$0xff]   ;;  %s7724_s25 = sadd.s32 4294967295, %s6276_s13  }
  0x83   : > { %v6521_v53 = vld [vmem:[#allocation7] ss:$16 sps:$4 sm:$0xff]   ;;  %v6525_v54 = vld [vmem:[#allocation7 + $0x24] ss:$16 sps:$4 sm:$0xff]   ;;  %v6540_v59 = vld [vmem:[#allocation7 + $0x28] ss:$16 sps:$4 sm:$0xff]  }
  0x84   : > { %v6533_v57 = vld [vmem:[#allocation7 + $0x20] ss:$16 sps:$4 sm:$0xff]   ;;  %v6537_v58 = vld [vmem:[#allocation7 + $0x44] ss:$16 sps:$4 sm:$0xff]   ;;  %v6548_v62 = vld [vmem:[#allocation7 + $0x4c] ss:$16 sps:$4 sm:$0xff]  }
  0x85   : > { %897 = vmatpush1.bf16.msra.mxu0 %v5391_v32  ;;  %1090 = vmatpush1.bf16.msra.mxu1 %v5392_v33  ;;  %v6545_v61 = vld [vmem:[#allocation7 + $0x40] ss:$16 sps:$4 sm:$0xff]   ;;  %v6550_v63 = vld [vmem:[#allocation7 + $0x64] ss:$16 sps:$4 sm:$0xff]   ;;  %v6553_v0 = vld [vmem:[#allocation7 + $0x48] ss:$16 sps:$4 sm:$0xff]  }
  0x86   : > { %898 = vmatprep.subr.bf16.mxu0 %v5393_v34  ;;  %1091 = vmatprep.subr.bf16.mxu1 %v5395_v35  ;;  %v6555_v1 = vld [vmem:[#allocation7 + $0x6c] ss:$16 sps:$4 sm:$0xff]   ;;  %v6561_v2 = vld [vmem:[#allocation7 + $0x60] ss:$16 sps:$4 sm:$0xff]   ;;  %v6566_v4 = vld [vmem:[#allocation7 + $0x84] ss:$16 sps:$4 sm:$0xff]   ;;  %v614_v35 = vlaneseq }
  0x87   : > { %v5424_v3 = vld [vmem:[%s6504_s29 + $0x10] sm:$0xff]   ;;  %v6568_v5 = vld [vmem:[#allocation7 + $0x68] ss:$16 sps:$4 sm:$0xff]   ;;  %v6573_v7 = vld [vmem:[#allocation7 + $0x8c] ss:$16 sps:$4 sm:$0xff]   ;;  %s4662_s8 = sshll.u32 %s7724_s25, 1 }
  0x88   : > { %v6571_v6 = vld [vmem:[#allocation7 + $0x80] ss:$16 sps:$4 sm:$0xff]   ;;  %v6576_v8 = vld [vmem:[#allocation7 + $0xa4] ss:$16 sps:$4 sm:$0xff]   ;;  %v6580_v9 = vld [vmem:[#allocation7 + $0x88] ss:$16 sps:$4 sm:$0xff]  }
  0x89   : > { %899 = vmatpush1.bf16.msra.mxu0 %v5397_v36  ;;  %1092 = vmatpush1.bf16.msra.mxu1 %v5398_v37  ;;  %v6582_v10 = vld [vmem:[#allocation7 + $0xac] ss:$16 sps:$4 sm:$0xff]   ;;  %v6586_v11 = vld [vmem:[#allocation7 + $0xa0] ss:$16 sps:$4 sm:$0xff]   ;;  %v6590_v12 = vld [vmem:[#allocation7 + $0xc4] ss:$16 sps:$4 sm:$0xff]  }
  0x8a   : > { %900 = vmatprep.subr.bf16.mxu0 %v5399_v38  ;;  %1093 = vmatprep.subr.bf16.mxu1 %v5401_v39  ;;  %v6594_v13 = vld [vmem:[#allocation7 + $0xa8] ss:$16 sps:$4 sm:$0xff]   ;;  %v6598_v15 = vld [vmem:[#allocation7 + $0xc0] ss:$16 sps:$4 sm:$0xff]   ;;  %v6601_v16 = vld [vmem:[#allocation7 + $0xcc] ss:$16 sps:$4 sm:$0xff]  }
  0x8b   : > { %v5429_v14 = vld [vmem:[%s6504_s29 + $0x18] sm:$0xff]   ;;  %v6605_v18 = vld [vmem:[#allocation7 + $0xe4] ss:$16 sps:$4 sm:$0xff]   ;;  %v6611_v21 = vld [vmem:[#allocation7 + $0xe0] ss:$16 sps:$4 sm:$0xff]   ;;  %v6698_v36 = vshrl.u32 %v614_v35, 7 }
  0x8c   : > { %v6607_v19 = vld [vmem:[#allocation7 + $0xc8] ss:$16 sps:$4 sm:$0xff]   ;;  %v6609_v20 = vld [vmem:[#allocation7 + $0xec] ss:$16 sps:$4 sm:$0xff]   ;;  %v5432_v23 = vld [vmem:[%s6504_s29 + $0x20] sm:$0xff]   ;;  %p542_p9 = scmp.lt.s32.totalorder %s4662_s8, 3 }
  0x8d   : > { %901 = vmatpush1.bf16.msra.mxu0 %v5403_v40  ;;  %1094 = vmatpush1.bf16.msra.mxu1 %v5404_v41  ;;  %v6615_v22 = vld [vmem:[#allocation7 + $0xe8] ss:$16 sps:$4 sm:$0xff]   ;;  %v5440_v25 = vld [vmem:[%s6504_s29 + $0x30] sm:$0xff]   ;;  %v5448_v27 = vld [vmem:[%s6504_s29 + $0x40] sm:$0xff]   ;;  %v616_v37 = vsub.s32 0, %v6698_v36  ;;  %v620_v39 = vsub.s32 1, %v6698_v36 }
  0x8e   : > { %902 = vmatprep.subr.bf16.mxu0 %v5405_v42  ;;  %1095 = vmatprep.subr.bf16.mxu1 %v5407_v43  ;;  %v5437_v24 = vld [vmem:[%s6504_s29 + $0x28] sm:$0xff]   ;;  %v5445_v26 = vld [vmem:[%s6504_s29 + $0x38] sm:$0xff]   ;;  %v5456_v29 = vld [vmem:[%s6504_s29 + $0x50] sm:$0xff]   ;;  %s7730_s8 = smov (!%p542_p9, %s4662_s8), 3  ;;  %vm4551_vm0 = vcmask 7168  }
  0x8f   : > { %v5453_v28 = vld [vmem:[%s6504_s29 + $0x48] sm:$0xff]   ;;  %v5461_v30 = vld [vmem:[%s6504_s29 + $0x58] sm:$0xff]   ;;  %v5464_v31 = vld [vmem:[%s6504_s29 + $0x60] sm:$0xff]   ;;  %s4663_s16 = sshll.u32 %s7730_s8, 3 }
  0x90   : > { %v5469_v32 = vld [vmem:[%s6504_s29 + $0x68] sm:$0xff]   ;;  %v5472_v33 = vld [vmem:[%s6504_s29 + $0x70] sm:$0xff]   ;;  %v5477_v34 = vld [vmem:[%s6504_s29 + $0x78] sm:$0xff]   ;;  %s545_s30 = scalar_lea.vmem %s7707_s9, %s4663_s16 }
  0x91   : > { %903 = vmatpush1.bf16.msra.mxu0 %v5409_v44  ;;  %1096 = vmatpush1.bf16.msra.mxu1 %v5410_v45  ;;  %v612_v38 = vld [vmem:[%s7701_s3] sm:$0xf]  ;;  %v628_v44 = vsub.s32 3, %v6698_v36 }
  0x92   : > { %904 = vmatprep.subr.bf16.mxu0 %v5411_v46  ;;  %1097 = vmatprep.subr.bf16.mxu1 %v5413_v47  ;;  %v6707_v40 = vrot.slane %v612_v38, %v616_v37  ;;  %v6709_v41 = vrot.slane %v612_v38, %v620_v39 }
  0x95   : > { %905 = vmatpush1.bf16.msra.mxu0 %v5415_v48  ;;  %1098 = vmatpush1.bf16.msra.mxu1 %v5416_v49 }
  0x96   : > { %1604 = vmatprep.subr.bf16.mxu0 %v6516_v50  ;;  %1647 = vmatprep.subr.bf16.mxu1 %v6518_v51 }
  0x98   : > { %923 = vmatmul.mubr.bf16.vlgmr.msra.gmra.mrb[0].mxu0 %v5417_v52  ;;  %1116 = vmatmul.mubr.bf16.vlgmr.msra.gmra.mrb[0].mxu1 %v5417_v52 }
  0x99   : > { %1605 = vmatpush1.bf16.msra.mxu0 %v6521_v53  ;;  %932 = vmatprep.mubr.bf16.mxu0 %v6283_v17 }
  0x9a   : > { %1125 = vmatprep.mubr.bf16.mxu1 %v6283_v17  ;;  %1606 = vmatprep.subr.bf16.mxu0 %v6525_v54 }
  0x9b   : > { %1648 = vmatpush1.bf16.msra.mxu1 %v6527_v55 }
  0x9c   : > { %1649 = vmatprep.subr.bf16.mxu1 %v6529_v56 }
  0x9d   : > { %1607 = vmatpush1.bf16.msra.mxu0 %v6533_v57 }
  0x9e   : > { %1608 = vmatprep.subr.bf16.mxu0 %v6537_v58 }
  0x9f   : > { %1650 = vmatpush1.bf16.msra.mxu1 %v6540_v59 }
  0xa0   : > { %933 = vmatmul.mubr.bf16.gmra.mrb[4].mxu0 %v5421_v60  ;;  %1126 = vmatmul.mubr.bf16.gmra.mrb[4].mxu1 %v5421_v60 }
  0xa1   : > { %942 = vmatprep.mubr.bf16.mxu0 %v6283_v17  ;;  %1135 = vmatprep.mubr.bf16.mxu1 %v6283_v17 }
  0xa2   : > { %1609 = vmatpush1.bf16.msra.mxu0 %v6545_v61  ;;  %1651 = vmatprep.subr.bf16.mxu1 %v6548_v62 }
  0xa3   : > { %1610 = vmatprep.subr.bf16.mxu0 %v6550_v63  ;;  %1652 = vmatpush1.bf16.msra.mxu1 %v6553_v0 }
  0xa4   : > { %1653 = vmatprep.subr.bf16.mxu1 %v6555_v1 }
  0xa6   : > { %1611 = vmatpush1.bf16.msra.mxu0 %v6561_v2 }
  0xa7   : > { %1612 = vmatprep.subr.bf16.mxu0 %v6566_v4  ;;  %1654 = vmatpush1.bf16.msra.mxu1 %v6568_v5 }
  0xa8   : > { %943 = vmatmul.mubr.bf16.gmra.mrb[8].mxu0 %v5424_v3  ;;  %1136 = vmatmul.mubr.bf16.gmra.mrb[8].mxu1 %v5424_v3  ;;  %v624_v3 = vsub.s32 2, %v6698_v36 }
  0xa9   : > { %952 = vmatprep.mubr.bf16.mxu0 %v6283_v17  ;;  %1145 = vmatprep.mubr.bf16.mxu1 %v6283_v17 }
  0xaa   : > { %1613 = vmatpush1.bf16.msra.mxu0 %v6571_v6  ;;  %1655 = vmatprep.subr.bf16.mxu1 %v6573_v7 }
  0xab   : > { %1614 = vmatprep.subr.bf16.mxu0 %v6576_v8  ;;  %1656 = vmatpush1.bf16.msra.mxu1 %v6580_v9 }
  0xac   : > { %1657 = vmatprep.subr.bf16.mxu1 %v6582_v10 }
  0xae   : > { %1615 = vmatpush1.bf16.msra.mxu0 %v6586_v11 }
  0xaf   : > { %1616 = vmatprep.subr.bf16.mxu0 %v6590_v12  ;;  %1658 = vmatpush1.bf16.msra.mxu1 %v6594_v13 }
  0xb0   : > { %953 = vmatmul.mubr.bf16.gmra.mrb[12].mxu0 %v5429_v14  ;;  %1146 = vmatmul.mubr.bf16.gmra.mrb[12].mxu1 %v5429_v14 }
  0xb1   : > { %962 = vmatprep.mubr.bf16.mxu0 %v6283_v17  ;;  %1155 = vmatprep.mubr.bf16.mxu1 %v6283_v17 }
  0xb2   : > { %1617 = vmatpush1.bf16.msra.mxu0 %v6598_v15  ;;  %1659 = vmatprep.subr.bf16.mxu1 %v6601_v16 }
  0xb3   : > { %1618 = vmatprep.subr.bf16.mxu0 %v6605_v18  ;;  %1660 = vmatpush1.bf16.msra.mxu1 %v6607_v19 }
  0xb4   : > { %1661 = vmatprep.subr.bf16.mxu1 %v6609_v20 }
  0xb6   : > { %1619 = vmatpush1.bf16.msra.mxu0 %v6611_v21 }
  0xb7   : > { %1662 = vmatpush1.bf16.msra.mxu1 %v6615_v22  ;;  %1756 = vmatprep.subr.bf16.mxu0 %v6516_v50 }
  0xb8   : > { %963 = vmatmul.mubr.bf16.gmra.mrb[16].mxu0 %v5432_v23  ;;  %1156 = vmatmul.mubr.bf16.gmra.mrb[16].mxu1 %v5432_v23 }
  0xb9   : > { %972 = vmatprep.mubr.bf16.mxu0 %v6283_v17  ;;  %1165 = vmatprep.mubr.bf16.mxu1 %v6283_v17 }
  0xba   : > { %1799 = vmatprep.subr.bf16.mxu1 %v6518_v51 }
  0xc0   : > { %973 = vmatmul.mubr.bf16.gmra.mrb[20].mxu0 %v5437_v24  ;;  %1166 = vmatmul.mubr.bf16.gmra.mrb[20].mxu1 %v5437_v24 }
  0xc1   : > { %982 = vmatprep.mubr.bf16.mxu0 %v6283_v17  ;;  %1175 = vmatprep.mubr.bf16.mxu1 %v6283_v17 }
  0xc8   : > { %983 = vmatmul.mubr.bf16.gmra.mrb[24].mxu0 %v5440_v25  ;;  %1176 = vmatmul.mubr.bf16.gmra.mrb[24].mxu1 %v5440_v25 }
  0xc9   : > { %992 = vmatprep.mubr.bf16.mxu0 %v6283_v17  ;;  %1185 = vmatprep.mubr.bf16.mxu1 %v6283_v17 }
  0xd0   : > { %993 = vmatmul.mubr.bf16.gmra.mrb[28].mxu0 %v5445_v26  ;;  %1186 = vmatmul.mubr.bf16.gmra.mrb[28].mxu1 %v5445_v26  ;;  %v6718_v26 = vrot.slane %v612_v38, %v628_v44 }
  0xd1   : > { %1002 = vmatprep.mubr.bf16.mxu0 %v6283_v17  ;;  %1195 = vmatprep.mubr.bf16.mxu1 %v6283_v17 }
  0xd8   : > { %1003 = vmatmul.mubr.bf16.gmra.mrb[32].mxu0 %v5448_v27  ;;  %1196 = vmatmul.mubr.bf16.gmra.mrb[32].mxu1 %v5448_v27 }
  0xd9   : > { %1012 = vmatprep.mubr.bf16.mxu0 %v6283_v17  ;;  %1205 = vmatprep.mubr.bf16.mxu1 %v6283_v17 }
  0xe0   : > { %1013 = vmatmul.mubr.bf16.gmra.mrb[36].mxu0 %v5453_v28  ;;  %1206 = vmatmul.mubr.bf16.gmra.mrb[36].mxu1 %v5453_v28 }
  0xe1   : > { %1022 = vmatprep.mubr.bf16.mxu0 %v6283_v17  ;;  %1215 = vmatprep.mubr.bf16.mxu1 %v6283_v17 }
  0xe8   : > { %1023 = vmatmul.mubr.bf16.gmra.mrb[40].mxu0 %v5456_v29  ;;  %1216 = vmatmul.mubr.bf16.gmra.mrb[40].mxu1 %v5456_v29 }
  0xe9   : > { %1032 = vmatprep.mubr.bf16.mxu0 %v6283_v17  ;;  %1225 = vmatprep.mubr.bf16.mxu1 %v6283_v17 }
  0xf0   : > { %1033 = vmatmul.mubr.bf16.gmra.mrb[44].mxu0 %v5461_v30  ;;  %1226 = vmatmul.mubr.bf16.gmra.mrb[44].mxu1 %v5461_v30  ;;  %v6723_v30 = vrot.slane %v612_v38, %v624_v3 }
  0xf1   : > { %1042 = vmatprep.mubr.bf16.mxu0 %v6283_v17  ;;  %1235 = vmatprep.mubr.bf16.mxu1 %v6283_v17 }
  0xf8   : > { %1043 = vmatmul.mubr.bf16.gmra.mrb[48].mxu0 %v5464_v31  ;;  %1236 = vmatmul.mubr.bf16.gmra.mrb[48].mxu1 %v5464_v31 }
  0xf9   : > { %1052 = vmatprep.mubr.bf16.mxu0 %v6283_v17  ;;  %1245 = vmatprep.mubr.bf16.mxu1 %v6283_v17 }
 0x100   : > { %1053 = vmatmul.mubr.bf16.gmra.mrb[52].mxu0 %v5469_v32  ;;  %1246 = vmatmul.mubr.bf16.gmra.mrb[52].mxu1 %v5469_v32 }
 0x101   : > { %1062 = vmatprep.mubr.bf16.mxu0 %v6283_v17  ;;  %1255 = vmatprep.mubr.bf16.mxu1 %v6283_v17 }
 0x108   : > { %1063 = vmatmul.mubr.bf16.gmra.mrb[56].mxu0 %v5472_v33  ;;  %1256 = vmatmul.mubr.bf16.gmra.mrb[56].mxu1 %v5472_v33 }
 0x109   : > { %1072 = vmatprep.mubr.bf16.mxu0 %v6283_v17  ;;  %1265 = vmatprep.mubr.bf16.mxu1 %v6283_v17 }
 0x110   : > { %1073 = vmatmul.mubr.bf16.gmra.mrb[60].mxu0 %v5477_v34  ;;  %1266 = vmatmul.mubr.bf16.gmra.mrb[60].mxu1 %v5477_v34 }
 0x111   : > { %1636 = vmatprep.mubr.bf16.mxu0 %v6283_v17  ;;  %1679 = vmatprep.mubr.bf16.mxu1 %v6283_v17 }
 0x118   : > { %1637 = vmatmul.mubr.bf16.vlgmr.msra.gmra.mrb[0].mxu0 %v6283_v17  ;;  %1680 = vmatmul.mubr.bf16.vlgmr.msra.gmra.mrb[0].mxu1 %v6283_v17 }
 0x119   : > { %1757 = vmatpush1.bf16.msra.mxu0 %v6521_v53  ;;  %1800 = vmatpush1.bf16.msra.mxu1 %v6527_v55 }
 0x11a   : > { %1758 = vmatprep.subr.bf16.mxu0 %v6525_v54  ;;  %1801 = vmatprep.subr.bf16.mxu1 %v6529_v56 }
 0x11b   : > { %1788 = vmatprep.mubr.bf16.mxu0 %v6283_v17  ;;  %1831 = vmatprep.mubr.bf16.mxu1 %v6283_v17 }
 0x11d   : > { %1759 = vmatpush1.bf16.msra.mxu0 %v6533_v57  ;;  %1802 = vmatpush1.bf16.msra.mxu1 %v6540_v59 }
 0x11e   : > { %1760 = vmatprep.subr.bf16.mxu0 %v6537_v58  ;;  %1803 = vmatprep.subr.bf16.mxu1 %v6548_v62 }
 0x121   : > { %1761 = vmatpush1.bf16.msra.mxu0 %v6545_v61  ;;  %1804 = vmatpush1.bf16.msra.mxu1 %v6553_v0 }
 0x122   : > { %1762 = vmatprep.subr.bf16.mxu0 %v6550_v63  ;;  %1805 = vmatprep.subr.bf16.mxu1 %v6555_v1 }
 0x125   : > { %1763 = vmatpush1.bf16.msra.mxu0 %v6561_v2  ;;  %1806 = vmatpush1.bf16.msra.mxu1 %v6568_v5 }
 0x126   : > { %1764 = vmatprep.subr.bf16.mxu0 %v6566_v4  ;;  %1807 = vmatprep.subr.bf16.mxu1 %v6573_v7 }
 0x129   : > { %1765 = vmatpush1.bf16.msra.mxu0 %v6571_v6  ;;  %1808 = vmatpush1.bf16.msra.mxu1 %v6580_v9 }
 0x12a   : > { %1766 = vmatprep.subr.bf16.mxu0 %v6576_v8  ;;  %1809 = vmatprep.subr.bf16.mxu1 %v6582_v10 }
 0x12d   : > { %1767 = vmatpush1.bf16.msra.mxu0 %v6586_v11  ;;  %1810 = vmatpush1.bf16.msra.mxu1 %v6594_v13 }
 0x12e   : > { %1768 = vmatprep.subr.bf16.mxu0 %v6590_v12  ;;  %1811 = vmatprep.subr.bf16.mxu1 %v6601_v16 }
 0x131   : > { %1769 = vmatpush1.bf16.msra.mxu0 %v6598_v15  ;;  %1812 = vmatpush1.bf16.msra.mxu1 %v6607_v19 }
 0x132   : > { %1770 = vmatprep.subr.bf16.mxu0 %v6605_v18  ;;  %1813 = vmatprep.subr.bf16.mxu1 %v6609_v20 }
 0x135   : > { %1771 = vmatpush1.bf16.msra.mxu0 %v6611_v21  ;;  %1814 = vmatpush1.bf16.msra.mxu1 %v6615_v22 }
 0x136   : > { %1908 = vmatprep.subr.bf16.mxu0 %v6516_v50  ;;  %1951 = vmatprep.subr.bf16.mxu1 %v6518_v51 }
 0x1eb   : > { %v1638_v42 = vpop.f32.mrb[0].mxu0  ;;  %v1681_v43 = vpop.f32.mrb[0].mxu1 }
 0x1ec   : > { %v5053_v45 = vadd.f32 %v1638_v42, %v6707_v40  ;;  %v1640_v46 = vpop.f32.mrb[1].mxu0  ;;  %v1683_v47 = vpop.f32.mrb[1].mxu1  ;;  %v5117_v32 = vadd.f32 %v1681_v43, %v6723_v30 }
 0x1ed   : > { %v5054_v48 = vadd.f32 %v1640_v46, %v6709_v41  ;;  %v1642_v49 = vpop.f32.mrb[2].mxu0  ;;  %v1685_v52 = vpop.f32.mrb[2].mxu1  ;;  %v5118_v31 = vadd.f32 %v1683_v47, %v6718_v26 }
 0x1ee   : > { %v4744_v60 = vmul.f32 -1.442695, %v5053_v45  ;;  %v5055_v14 = vadd.f32 %v1642_v49, %v6707_v40  ;;  %v1644_v23 = vpop.f32.mrb[3].mxu0  ;;  %v1687_v24 = vpop.f32.mrb[3].mxu1  ;;  %v5119_v35 = vadd.f32 %v1685_v52, %v6723_v30 }
 0x1ef   : > { %v4746_v25 = vmul.f32 -1.442695, %v5054_v48  ;;  %v5056_v27 = vadd.f32 %v1644_v23, %v6709_v41  ;;  %v4748_v33 = vmul.f32 -1.442695, %v5118_v31  ;;  %v5120_v34 = vadd.f32 %v1687_v24, %v6718_v26 }
 0x1f0   : > { %5530 = vpow2.f32 %v4744_v60  ;;  %v4745_v28 = vmul.f32 -1.442695, %v5055_v14 }
 0x1f1   : > { %5532 = vpow2.f32 %v4746_v25  ;;  %v4747_v29 = vmul.f32 -1.442695, %v5056_v27  ;;  %v4749_v46 = vmul.f32 -1.442695, %v5120_v34 }
 0x1f2   : > { %5534 = vpow2.f32 %v4745_v28 }
 0x1f3   : > { %5536 = vpow2.f32 %v4747_v29 }
 0x1f4   : > { %5538 = vtanh.f32 %v5117_v32 }
 0x1f5   : > { %5540 = vpow2.f32 %v4748_v33 }
 0x1f6   : > { %5542 = vtanh.f32 %v5119_v35 }
 0x1fa   : > { %v5531_v39 = vpop.eup %5530 }
 0x1fb   : > { %v5533_v42 = vpop.eup %5532  ;;  %v1704_v45 = vadd.f32 1.0, %v5531_v39 }
 0x1fc   : > { %v1716_v48 = vadd.f32 1.0, %v5533_v42  ;;  %v5535_v38 = vpop.eup %5534 }
 0x1fd   : > { %5544 = vrcp.f32 %v1704_v45  ;;  %v1705_v47 = vadd.f32 1.0, %v5535_v38  ;;  %v5537_v49 = vpop.eup %5536 }
 0x1fe   : > { %5546 = vrcp.f32 %v1716_v48  ;;  %v1717_v43 = vadd.f32 1.0, %v5537_v49  ;;  %v5539_v60 = vpop.eup %5538 }
 0x1ff   : > { %5548 = vpow2.f32 %v4749_v46  ;;  %v5541_v14 = vpop.eup %5540 }
 0x200   : > { %5550 = vrcp.f32 %v1705_v47  ;;  %v5543_v52 = vpop.eup %5542  ;;  %v1730_v31 = vadd.f32 1.0, %v5541_v14 }
 0x201   : > { %5552 = vrcp.f32 %v1717_v43 }
 0x202   : > { %5554 = vrcp.f32 %v1730_v31 }
 0x207   : > { %v5545_v23 = vpop.eup %5544 }
 0x208   : > { %v5547_v24 = vpop.eup %5546  ;;  %v1738_v25 = vmul.f32 %v5545_v23, %v5539_v60 }
 0x209   : > { %v5549_v27 = vpop.eup %5548  ;;  %v1736_v28 = vmul.f32 0.0, %v5547_v24 }
 0x20a   : > { %v5551_v29 = vpop.eup %5550  ;;  %v1731_v35 = vadd.f32 1.0, %v5549_v27 }
 0x20b   : > { %v6729_v32 = vadd.f32 %v1738_v25, %v1736_v28  ;;  %v1739_v33 = vmul.f32 %v5551_v29, %v5543_v52  ;;  %v5553_v34 = vpop.eup %5552 }
 0x20c   : > { %v1737_v39 = vmul.f32 0.0, %v5553_v34  ;;  %v5555_v45 = vpop.eup %5554 }
 0x20d   : > { %5556 = vtanh.f32 %v6729_v32 }
 0x20e   : > { %v6732_v42 = vadd.f32 %v1739_v33, %v1737_v39  ;;  %5558 = vrcp.f32 %v1731_v35 }
 0x210   : > { %5560 = vtanh.f32 %v6732_v42 }
 0x217   : > { %v5557_v46 = vpop.eup %5556 }
 0x218   : > { %v5559_v48 = vpop.eup %5558  ;;  %v1744_v47 = vmul.f32 %v5557_v46, %v5555_v45 }
 0x21a   : > { %v5561_v38 = vpop.eup %5560 }
 0x21b   : > { %v1745_v49 = vmul.f32 %v5561_v38, %v5559_v48 }
 0x21d   : > { %v1755_v43 = vpack.c.bf16 %v1745_v49, %v1744_v47 }
 0x21f   : > { %1789 = vmatmul.mubr.bf16.vlgmr.msra.gmra.mrb[4].mxu0 %v1755_v43  ;;  %1832 = vmatmul.mubr.bf16.vlgmr.msra.gmra.mrb[4].mxu1 %v1755_v43 }
 0x220   : > { %1909 = vmatpush1.bf16.msra.mxu0 %v6521_v53  ;;  %1952 = vmatpush1.bf16.msra.mxu1 %v6527_v55 }
 0x221   : > { %1910 = vmatprep.subr.bf16.mxu0 %v6525_v54  ;;  %1953 = vmatprep.subr.bf16.mxu1 %v6529_v56 }
 0x222   : > { %1940 = vmatprep.mubr.bf16.mxu0 %v6283_v17  ;;  %1983 = vmatprep.mubr.bf16.mxu1 %v6283_v17 }
 0x224   : > { %1911 = vmatpush1.bf16.msra.mxu0 %v6533_v57  ;;  %1954 = vmatpush1.bf16.msra.mxu1 %v6540_v59 }
 0x225   : > { %1912 = vmatprep.subr.bf16.mxu0 %v6537_v58  ;;  %1955 = vmatprep.subr.bf16.mxu1 %v6548_v62 }
 0x228   : > { %1913 = vmatpush1.bf16.msra.mxu0 %v6545_v61  ;;  %1956 = vmatpush1.bf16.msra.mxu1 %v6553_v0 }
 0x229   : > { %1914 = vmatprep.subr.bf16.mxu0 %v6550_v63  ;;  %1957 = vmatprep.subr.bf16.mxu1 %v6555_v1 }
 0x22c   : > { %1915 = vmatpush1.bf16.msra.mxu0 %v6561_v2  ;;  %1958 = vmatpush1.bf16.msra.mxu1 %v6568_v5 }
 0x22d   : > { %1916 = vmatprep.subr.bf16.mxu0 %v6566_v4  ;;  %1959 = vmatprep.subr.bf16.mxu1 %v6573_v7 }
 0x230   : > { %1917 = vmatpush1.bf16.msra.mxu0 %v6571_v6  ;;  %1960 = vmatpush1.bf16.msra.mxu1 %v6580_v9 }
 0x231   : > { %1918 = vmatprep.subr.bf16.mxu0 %v6576_v8  ;;  %1961 = vmatprep.subr.bf16.mxu1 %v6582_v10 }
 0x234   : > { %1919 = vmatpush1.bf16.msra.mxu0 %v6586_v11  ;;  %1962 = vmatpush1.bf16.msra.mxu1 %v6594_v13 }
 0x235   : > { %1920 = vmatprep.subr.bf16.mxu0 %v6590_v12  ;;  %1963 = vmatprep.subr.bf16.mxu1 %v6601_v16 }
 0x238   : > { %1921 = vmatpush1.bf16.msra.mxu0 %v6598_v15  ;;  %1964 = vmatpush1.bf16.msra.mxu1 %v6607_v19 }
 0x239   : > { %1922 = vmatprep.subr.bf16.mxu0 %v6605_v18  ;;  %1965 = vmatprep.subr.bf16.mxu1 %v6609_v20 }
 0x23c   : > { %1923 = vmatpush1.bf16.msra.mxu0 %v6611_v21  ;;  %1966 = vmatpush1.bf16.msra.mxu1 %v6615_v22 }
 0x23d   : > { %2060 = vmatprep.subr.bf16.mxu0 %v6516_v50  ;;  %2103 = vmatprep.subr.bf16.mxu1 %v6518_v51 }
 0x2f2   : > { %v1790_v60 = vpop.f32.mrb[4].mxu0  ;;  %v1833_v14 = vpop.f32.mrb[4].mxu1 }
 0x2f3   : > { %v5057_v52 = vadd.f32 %v1790_v60, %v6707_v40  ;;  %v1792_v23 = vpop.f32.mrb[5].mxu0  ;;  %v1835_v24 = vpop.f32.mrb[5].mxu1  ;;  %v5121_v38 = vadd.f32 %v1833_v14, %v6723_v30 }
 0x2f4   : > { %v5058_v25 = vadd.f32 %v1792_v23, %v6709_v41  ;;  %v1794_v27 = vpop.f32.mrb[6].mxu0  ;;  %v1837_v28 = vpop.f32.mrb[6].mxu1  ;;  %v5122_v48 = vadd.f32 %v1835_v24, %v6718_v26 }
 0x2f5   : > { %v4750_v29 = vmul.f32 -1.442695, %v5057_v52  ;;  %v5059_v31 = vadd.f32 %v1794_v27, %v6707_v40  ;;  %v1796_v33 = vpop.f32.mrb[7].mxu0  ;;  %v1839_v34 = vpop.f32.mrb[7].mxu1  ;;  %v5123_v43 = vadd.f32 %v1837_v28, %v6723_v30 }
 0x2f6   : > { %v4752_v35 = vmul.f32 -1.442695, %v5058_v25  ;;  %v5060_v39 = vadd.f32 %v1796_v33, %v6709_v41  ;;  %v4754_v47 = vmul.f32 -1.442695, %v5122_v48  ;;  %v5124_v49 = vadd.f32 %v1839_v34, %v6718_v26 }
 0x2f7   : > { %5562 = vpow2.f32 %v4750_v29  ;;  %v4751_v45 = vmul.f32 -1.442695, %v5059_v31 }
 0x2f8   : > { %5564 = vpow2.f32 %v4752_v35  ;;  %v4753_v46 = vmul.f32 -1.442695, %v5060_v39  ;;  %v4755_v25 = vmul.f32 -1.442695, %v5124_v49 }
 0x2f9   : > { %5566 = vpow2.f32 %v4751_v45 }
 0x2fa   : > { %5568 = vpow2.f32 %v4753_v46 }
 0x2fb   : > { %5570 = vtanh.f32 %v5121_v38 }
 0x2fc   : > { %5572 = vpow2.f32 %v4754_v47 }
 0x2fd   : > { %5574 = vtanh.f32 %v5123_v43 }
 0x301   : > { %v5563_v60 = vpop.eup %5562 }
 0x302   : > { %v5565_v52 = vpop.eup %5564  ;;  %v1856_v23 = vadd.f32 1.0, %v5563_v60 }
 0x303   : > { %v1868_v27 = vadd.f32 1.0, %v5565_v52  ;;  %v5567_v29 = vpop.eup %5566 }
 0x304   : > { %5576 = vrcp.f32 %v1856_v23  ;;  %v1857_v24 = vadd.f32 1.0, %v5567_v29  ;;  %v5569_v31 = vpop.eup %5568 }
 0x305   : > { %5578 = vrcp.f32 %v1868_v27  ;;  %v1869_v14 = vadd.f32 1.0, %v5569_v31  ;;  %v5571_v33 = vpop.eup %5570 }
 0x306   : > { %5580 = vpow2.f32 %v4755_v25  ;;  %v5573_v34 = vpop.eup %5572 }
 0x307   : > { %5582 = vrcp.f32 %v1857_v24  ;;  %v5575_v28 = vpop.eup %5574  ;;  %v1882_v47 = vadd.f32 1.0, %v5573_v34 }
 0x308   : > { %5584 = vrcp.f32 %v1869_v14 }
 0x309   : > { %5586 = vrcp.f32 %v1882_v47 }
 0x30e   : > { %v5577_v35 = vpop.eup %5576 }
 0x30f   : > { %v5579_v39 = vpop.eup %5578  ;;  %v1890_v45 = vmul.f32 %v5577_v35, %v5571_v33 }
 0x310   : > { %v5581_v46 = vpop.eup %5580  ;;  %v1888_v48 = vmul.f32 %v5579_v39, %v6729_v32 }
 0x311   : > { %v5583_v38 = vpop.eup %5582  ;;  %v1883_v52 = vadd.f32 1.0, %v5581_v46 }
 0x312   : > { %v6778_v49 = vadd.f32 %v1890_v45, %v1888_v48  ;;  %v1891_v43 = vmul.f32 %v5583_v38, %v5575_v28  ;;  %v5585_v60 = vpop.eup %5584 }
 0x313   : > { %v1889_v23 = vmul.f32 %v5585_v60, %v6732_v42  ;;  %v5587_v27 = vpop.eup %5586 }
 0x314   : > { %5588 = vtanh.f32 %v6778_v49 }
 0x315   : > { %v6782_v25 = vadd.f32 %v1891_v43, %v1889_v23  ;;  %5590 = vrcp.f32 %v1883_v52 }
 0x317   : > { %5592 = vtanh.f32 %v6782_v25 }
 0x31e   : > { %v5589_v29 = vpop.eup %5588 }
 0x31f   : > { %v5591_v32 = vpop.eup %5590  ;;  %v1896_v31 = vmul.f32 %v5589_v29, %v5587_v27 }
 0x321   : > { %v5593_v24 = vpop.eup %5592 }
 0x322   : > { %v1897_v14 = vmul.f32 %v5593_v24, %v5591_v32 }
 0x324   : > { %v1907_v33 = vpack.c.bf16 %v1897_v14, %v1896_v31 }
 0x326   : > { %1941 = vmatmul.mubr.bf16.vlgmr.msra.gmra.mrb[8].mxu0 %v1907_v33  ;;  %1984 = vmatmul.mubr.bf16.vlgmr.msra.gmra.mrb[8].mxu1 %v1907_v33 }
 0x327   : > { %2061 = vmatpush1.bf16.msra.mxu0 %v6521_v53  ;;  %2104 = vmatpush1.bf16.msra.mxu1 %v6527_v55 }
 0x328   : > { %2062 = vmatprep.subr.bf16.mxu0 %v6525_v54  ;;  %2105 = vmatprep.subr.bf16.mxu1 %v6529_v56 }
 0x329   : > { %2092 = vmatprep.mubr.bf16.mxu0 %v6283_v17  ;;  %2135 = vmatprep.mubr.bf16.mxu1 %v6283_v17 }
 0x32b   : > { %2063 = vmatpush1.bf16.msra.mxu0 %v6533_v57  ;;  %2106 = vmatpush1.bf16.msra.mxu1 %v6540_v59 }
 0x32c   : > { %2064 = vmatprep.subr.bf16.mxu0 %v6537_v58  ;;  %2107 = vmatprep.subr.bf16.mxu1 %v6548_v62 }
 0x32f   : > { %2065 = vmatpush1.bf16.msra.mxu0 %v6545_v61  ;;  %2108 = vmatpush1.bf16.msra.mxu1 %v6553_v0 }
 0x330   : > { %2066 = vmatprep.subr.bf16.mxu0 %v6550_v63  ;;  %2109 = vmatprep.subr.bf16.mxu1 %v6555_v1 }
 0x333   : > { %2067 = vmatpush1.bf16.msra.mxu0 %v6561_v2  ;;  %2110 = vmatpush1.bf16.msra.mxu1 %v6568_v5 }
 0x334   : > { %2068 = vmatprep.subr.bf16.mxu0 %v6566_v4  ;;  %2111 = vmatprep.subr.bf16.mxu1 %v6573_v7 }
 0x337   : > { %2069 = vmatpush1.bf16.msra.mxu0 %v6571_v6  ;;  %2112 = vmatpush1.bf16.msra.mxu1 %v6580_v9 }
 0x338   : > { %2070 = vmatprep.subr.bf16.mxu0 %v6576_v8  ;;  %2113 = vmatprep.subr.bf16.mxu1 %v6582_v10 }
 0x33b   : > { %2071 = vmatpush1.bf16.msra.mxu0 %v6586_v11  ;;  %2114 = vmatpush1.bf16.msra.mxu1 %v6594_v13 }
 0x33c   : > { %2072 = vmatprep.subr.bf16.mxu0 %v6590_v12  ;;  %2115 = vmatprep.subr.bf16.mxu1 %v6601_v16 }
 0x33f   : > { %2073 = vmatpush1.bf16.msra.mxu0 %v6598_v15  ;;  %2116 = vmatpush1.bf16.msra.mxu1 %v6607_v19 }
 0x340   : > { %2074 = vmatprep.subr.bf16.mxu0 %v6605_v18  ;;  %2117 = vmatprep.subr.bf16.mxu1 %v6609_v20 }
 0x343   : > { %2075 = vmatpush1.bf16.msra.mxu0 %v6611_v21  ;;  %2118 = vmatpush1.bf16.msra.mxu1 %v6615_v22 }
 0x344   : > { %2212 = vmatprep.subr.bf16.mxu0 %v6516_v50  ;;  %2255 = vmatprep.subr.bf16.mxu1 %v6518_v51 }
 0x3f9   : > { %v1942_v53 = vpop.f32.mrb[8].mxu0  ;;  %v1985_v54 = vpop.f32.mrb[8].mxu1 }
 0x3fa   : > { %v5061_v55 = vadd.f32 %v1942_v53, %v6707_v40  ;;  %v1944_v56 = vpop.f32.mrb[9].mxu0  ;;  %v1987_v57 = vpop.f32.mrb[9].mxu1  ;;  %v5125_v35 = vadd.f32 %v1985_v54, %v6723_v30 }
 0x3fb   : > { %v5062_v58 = vadd.f32 %v1944_v56, %v6709_v41  ;;  %v1946_v59 = vpop.f32.mrb[10].mxu0  ;;  %v1989_v61 = vpop.f32.mrb[10].mxu1  ;;  %v5126_v28 = vadd.f32 %v1987_v57, %v6718_v26 }
 0x3fc   : > { %v4756_v62 = vmul.f32 -1.442695, %v5061_v55  ;;  %v5063_v63 = vadd.f32 %v1946_v59, %v6707_v40  ;;  %v1948_v0 = vpop.f32.mrb[11].mxu0  ;;  %v1991_v1 = vpop.f32.mrb[11].mxu1  ;;  %v5127_v46 = vadd.f32 %v1989_v61, %v6723_v30 }
 0x3fd   : > { %v4758_v42 = vmul.f32 -1.442695, %v5062_v58  ;;  %v5064_v50 = vadd.f32 %v1948_v0, %v6709_v41  ;;  %v4760_v39 = vmul.f32 -1.442695, %v5126_v28  ;;  %v5128_v45 = vadd.f32 %v1991_v1, %v6718_v26 }
 0x3fe   : > { %5594 = vpow2.f32 %v4756_v62  ;;  %v4757_v51 = vmul.f32 -1.442695, %v5063_v63 }
 0x3ff   : > { %5596 = vpow2.f32 %v4758_v42  ;;  %v4759_v34 = vmul.f32 -1.442695, %v5064_v50  ;;  %v4761_v43 = vmul.f32 -1.442695, %v5128_v45  ;;  %v6844_v45 = vld [vmem:[#allocation7 + $0x2c] ss:$16 sps:$4 sm:$0xff]  }
 0x400   : > { %5598 = vpow2.f32 %v4757_v51 }
 0x401   : > { %5600 = vpow2.f32 %v4759_v34 }
 0x402   : > { %5602 = vtanh.f32 %v5125_v35  ;;  %v6835_v35 = vld [vmem:[#allocation7] ss:$16 sps:$4 sm:$0xff]  }
 0x403   : > { %5604 = vpow2.f32 %v4760_v39  ;;  %v6841_v39 = vld [vmem:[#allocation7 + $0x24] ss:$16 sps:$4 sm:$0xff]  }
 0x404   : > { %5606 = vtanh.f32 %v5127_v46  ;;  %v6849_v46 = vld [vmem:[#allocation7 + $0x20] ss:$16 sps:$4 sm:$0xff]  }
 0x408   : > { %v5595_v48 = vpop.eup %5594 }
 0x409   : > { %v5597_v38 = vpop.eup %5596  ;;  %v2008_v47 = vadd.f32 1.0, %v5595_v48  ;;  %v6852_v48 = vld [vmem:[#allocation7 + $0x28] ss:$16 sps:$4 sm:$0xff]  }
 0x40a   : > { %v2020_v60 = vadd.f32 1.0, %v5597_v38  ;;  %v5599_v52 = vpop.eup %5598  ;;  %v6855_v38 = vld [vmem:[#allocation7 + $0x44] ss:$16 sps:$4 sm:$0xff]  }
 0x40b   : > { %5608 = vrcp.f32 %v2008_v47  ;;  %v2009_v23 = vadd.f32 1.0, %v5599_v52  ;;  %v5601_v27 = vpop.eup %5600  ;;  %v6858_v47 = vld [vmem:[#allocation7 + $0x4c] ss:$16 sps:$4 sm:$0xff]   ;;  %v6867_v52 = vld [vmem:[#allocation7 + $0x64] ss:$16 sps:$4 sm:$0xff]  }
 0x40c   : > { %5610 = vrcp.f32 %v2020_v60  ;;  %v2021_v29 = vadd.f32 1.0, %v5601_v27  ;;  %v5603_v32 = vpop.eup %5602  ;;  %v6864_v60 = vld [vmem:[#allocation7 + $0x48] ss:$16 sps:$4 sm:$0xff]  }
 0x40d   : > { %5612 = vpow2.f32 %v4761_v43  ;;  %v5605_v24 = vpop.eup %5604  ;;  %v6861_v43 = vld [vmem:[#allocation7 + $0x40] ss:$16 sps:$4 sm:$0xff]  }
 0x40e   : > { %5614 = vrcp.f32 %v2009_v23  ;;  %v5607_v31 = vpop.eup %5606  ;;  %v2034_v57 = vadd.f32 1.0, %v5605_v24  ;;  %v6870_v23 = vld [vmem:[#allocation7 + $0x6c] ss:$16 sps:$4 sm:$0xff]  }
 0x40f   : > { %5616 = vrcp.f32 %v2021_v29 }
 0x410   : > { %5618 = vrcp.f32 %v2034_v57 }
 0x415   : > { %v5609_v14 = vpop.eup %5608 }
 0x416   : > { %v5611_v33 = vpop.eup %5610  ;;  %v2042_v53 = vmul.f32 %v5609_v14, %v5603_v32 }
 0x417   : > { %v5613_v54 = vpop.eup %5612  ;;  %v2040_v55 = vmul.f32 %v5611_v33, %v6778_v49 }
 0x418   : > { %v5615_v56 = vpop.eup %5614  ;;  %v2035_v62 = vadd.f32 1.0, %v5613_v54 }
 0x419   : > { %v6828_v58 = vadd.f32 %v2042_v53, %v2040_v55  ;;  %v2043_v59 = vmul.f32 %v5615_v56, %v5607_v31  ;;  %v5617_v61 = vpop.eup %5616 }
 0x41a   : > { %v2041_v63 = vmul.f32 %v5617_v61, %v6782_v25  ;;  %v5619_v1 = vpop.eup %5618  ;;  %v6838_v25 = vld [vmem:[#allocation7 + $0x8] ss:$16 sps:$4 sm:$0xff]  }
 0x41b   : > { %5620 = vtanh.f32 %v6828_v58 }
 0x41c   : > { %v6832_v0 = vadd.f32 %v2043_v59, %v2041_v63  ;;  %5622 = vrcp.f32 %v2035_v62 }
 0x41e   : > { %5624 = vtanh.f32 %v6832_v0 }
 0x425   : > { %v5621_v42 = vpop.eup %5620 }
 0x426   : > { %v5623_v49 = vpop.eup %5622  ;;  %v2048_v51 = vmul.f32 %v5621_v42, %v5619_v1 }
 0x428   : > { %v5625_v50 = vpop.eup %5624 }
 0x429   : > { %v2049_v34 = vmul.f32 %v5625_v50, %v5623_v49 }
 0x42b   : > { %v2059_v28 = vpack.c.bf16 %v2049_v34, %v2048_v51 }
 0x42d   : > { %2093 = vmatmul.mubr.bf16.vlgmr.msra.gmra.mrb[12].mxu0 %v2059_v28  ;;  %2136 = vmatmul.mubr.bf16.vlgmr.msra.gmra.mrb[12].mxu1 %v2059_v28 }
 0x42e   : > { %2213 = vmatpush1.bf16.msra.mxu0 %v6835_v35  ;;  %2256 = vmatpush1.bf16.msra.mxu1 %v6838_v25 }
 0x42f   : > { %2214 = vmatprep.subr.bf16.mxu0 %v6841_v39  ;;  %2257 = vmatprep.subr.bf16.mxu1 %v6844_v45 }
 0x430   : > { %2244 = vmatprep.mubr.bf16.mxu0 %v6283_v17  ;;  %2287 = vmatprep.mubr.bf16.mxu1 %v6283_v17 }
 0x432   : > { %2215 = vmatpush1.bf16.msra.mxu0 %v6849_v46  ;;  %2258 = vmatpush1.bf16.msra.mxu1 %v6852_v48 }
 0x433   : > { %2216 = vmatprep.subr.bf16.mxu0 %v6855_v38  ;;  %2259 = vmatprep.subr.bf16.mxu1 %v6858_v47 }
 0x436   : > { %2217 = vmatpush1.bf16.msra.mxu0 %v6861_v43  ;;  %2260 = vmatpush1.bf16.msra.mxu1 %v6864_v60 }
 0x437   : > { %2218 = vmatprep.subr.bf16.mxu0 %v6867_v52  ;;  %2261 = vmatprep.subr.bf16.mxu1 %v6870_v23 }
 0x43a   : > { %2219 = vmatpush1.bf16.msra.mxu0 %v6561_v2  ;;  %2262 = vmatpush1.bf16.msra.mxu1 %v6568_v5  ;;  %v6891_v2 = vld [vmem:[#allocation7 + $0x4] ss:$16 sps:$4 sm:$0xff]  }
 0x43b   : > { %2220 = vmatprep.subr.bf16.mxu0 %v6566_v4  ;;  %2263 = vmatprep.subr.bf16.mxu1 %v6573_v7  ;;  %v6894_v4 = vld [vmem:[#allocation7 + $0xc] ss:$16 sps:$4 sm:$0xff]  }
 0x43e   : > { %2221 = vmatpush1.bf16.msra.mxu0 %v6571_v6  ;;  %2264 = vmatpush1.bf16.msra.mxu1 %v6580_v9 }
 0x43f   : > { %2222 = vmatprep.subr.bf16.mxu0 %v6576_v8  ;;  %2265 = vmatprep.subr.bf16.mxu1 %v6582_v10 }
 0x442   : > { %2223 = vmatpush1.bf16.msra.mxu0 %v6586_v11  ;;  %2266 = vmatpush1.bf16.msra.mxu1 %v6594_v13 }
 0x443   : > { %2224 = vmatprep.subr.bf16.mxu0 %v6590_v12  ;;  %2267 = vmatprep.subr.bf16.mxu1 %v6601_v16 }
 0x446   : > { %2225 = vmatpush1.bf16.msra.mxu0 %v6598_v15  ;;  %2268 = vmatpush1.bf16.msra.mxu1 %v6607_v19 }
 0x447   : > { %2226 = vmatprep.subr.bf16.mxu0 %v6605_v18  ;;  %2269 = vmatprep.subr.bf16.mxu1 %v6609_v20 }
 0x44a   : > { %2227 = vmatpush1.bf16.msra.mxu0 %v6611_v21  ;;  %2270 = vmatpush1.bf16.msra.mxu1 %v6615_v22 }
 0x44b   : > { %2364 = vmatprep.subr.bf16.mxu0 %v6891_v2  ;;  %2407 = vmatprep.subr.bf16.mxu1 %v6894_v4 }
 0x500   : > { %v2094_v5 = vpop.f32.mrb[12].mxu0  ;;  %v2137_v6 = vpop.f32.mrb[12].mxu1 }
 0x501   : > { %v5065_v7 = vadd.f32 %v2094_v5, %v6707_v40  ;;  %v2096_v8 = vpop.f32.mrb[13].mxu0  ;;  %v2139_v9 = vpop.f32.mrb[13].mxu1  ;;  %v5129_v29 = vadd.f32 %v2137_v6, %v6723_v30 }
 0x502   : > { %v5066_v10 = vadd.f32 %v2096_v8, %v6709_v41  ;;  %v2098_v11 = vpop.f32.mrb[14].mxu0  ;;  %v2141_v12 = vpop.f32.mrb[14].mxu1  ;;  %v5130_v27 = vadd.f32 %v2139_v9, %v6718_v26 }
 0x503   : > { %v4762_v13 = vmul.f32 -1.442695, %v5065_v7  ;;  %v5067_v15 = vadd.f32 %v2098_v11, %v6707_v40  ;;  %v2100_v16 = vpop.f32.mrb[15].mxu0  ;;  %v2143_v18 = vpop.f32.mrb[15].mxu1  ;;  %v5131_v31 = vadd.f32 %v2141_v12, %v6723_v30 }
 0x504   : > { %v4764_v19 = vmul.f32 -1.442695, %v5066_v10  ;;  %v5068_v20 = vadd.f32 %v2100_v16, %v6709_v41  ;;  %v4766_v32 = vmul.f32 -1.442695, %v5130_v27  ;;  %v5132_v24 = vadd.f32 %v2143_v18, %v6718_v26  ;;  %v6939_v27 = vld [vmem:[#allocation7 + $0x80] ss:$16 sps:$4 sm:$0xff]  }
 0x505   : > { %5626 = vpow2.f32 %v4762_v13  ;;  %v4763_v21 = vmul.f32 -1.442695, %v5067_v15 }
 0x506   : > { %5628 = vpow2.f32 %v4764_v19  ;;  %v4765_v22 = vmul.f32 -1.442695, %v5068_v20  ;;  %v4767_v54 = vmul.f32 -1.442695, %v5132_v24  ;;  %v6930_v20 = vld [vmem:[#allocation7 + $0x68] ss:$16 sps:$4 sm:$0xff]  }
 0x507   : > { %5630 = vpow2.f32 %v4763_v21  ;;  %v6933_v21 = vld [vmem:[#allocation7 + $0x84] ss:$16 sps:$4 sm:$0xff]   ;;  %v6948_v24 = vld [vmem:[#allocation7 + $0xac] ss:$16 sps:$4 sm:$0xff]  }
 0x508   : > { %5632 = vpow2.f32 %v4765_v22  ;;  %v6936_v22 = vld [vmem:[#allocation7 + $0x8c] ss:$16 sps:$4 sm:$0xff]  }
 0x509   : > { %5634 = vtanh.f32 %v5129_v29  ;;  %v6942_v29 = vld [vmem:[#allocation7 + $0x88] ss:$16 sps:$4 sm:$0xff]  }
 0x50a   : > { %5636 = vpow2.f32 %v4766_v32  ;;  %v6945_v32 = vld [vmem:[#allocation7 + $0xa4] ss:$16 sps:$4 sm:$0xff]  }
 0x50b   : > { %5638 = vtanh.f32 %v5131_v31  ;;  %v6951_v31 = vld [vmem:[#allocation7 + $0xa0] ss:$16 sps:$4 sm:$0xff]  }
 0x50f   : > { %v5627_v14 = vpop.eup %5626 }
 0x510   : > { %v5629_v33 = vpop.eup %5628  ;;  %v2160_v53 = vadd.f32 1.0, %v5627_v14  ;;  %v6954_v14 = vld [vmem:[#allocation7 + $0xa8] ss:$16 sps:$4 sm:$0xff]  }
 0x511   : > { %v2172_v55 = vadd.f32 1.0, %v5629_v33  ;;  %v5631_v56 = vpop.eup %5630  ;;  %v6957_v33 = vld [vmem:[#allocation7 + $0xc4] ss:$16 sps:$4 sm:$0xff]  }
 0x512   : > { %5640 = vrcp.f32 %v2160_v53  ;;  %v2161_v57 = vadd.f32 1.0, %v5631_v56  ;;  %v5633_v59 = vpop.eup %5632  ;;  %v6960_v53 = vld [vmem:[#allocation7 + $0xcc] ss:$16 sps:$4 sm:$0xff]   ;;  %v6969_v56 = vld [vmem:[#allocation7 + $0xe4] ss:$16 sps:$4 sm:$0xff]  }
 0x513   : > { %5642 = vrcp.f32 %v2172_v55  ;;  %v2173_v61 = vadd.f32 1.0, %v5633_v59  ;;  %v5635_v62 = vpop.eup %5634  ;;  %v6966_v55 = vld [vmem:[#allocation7 + $0xc8] ss:$16 sps:$4 sm:$0xff]   ;;  %v6975_v59 = vld [vmem:[#allocation7 + $0xe0] ss:$16 sps:$4 sm:$0xff]  }
 0x514   : > { %5644 = vpow2.f32 %v4767_v54  ;;  %v5637_v63 = vpop.eup %5636  ;;  %v6963_v54 = vld [vmem:[#allocation7 + $0xc0] ss:$16 sps:$4 sm:$0xff]  }
 0x515   : > { %5646 = vrcp.f32 %v2161_v57  ;;  %v5639_v1 = vpop.eup %5638  ;;  %v2186_v5 = vadd.f32 1.0, %v5637_v63  ;;  %v6972_v57 = vld [vmem:[#allocation7 + $0xec] ss:$16 sps:$4 sm:$0xff]  }
 0x516   : > { %5648 = vrcp.f32 %v2173_v61  ;;  %v6978_v61 = vld [vmem:[#allocation7 + $0xe8] ss:$16 sps:$4 sm:$0xff]  }
 0x517   : > { %5650 = vrcp.f32 %v2186_v5 }
 0x51c   : > { %v5641_v42 = vpop.eup %5640 }
 0x51d   : > { %v5643_v49 = vpop.eup %5642  ;;  %v2194_v50 = vmul.f32 %v5641_v42, %v5635_v62 }
 0x51e   : > { %v5645_v51 = vpop.eup %5644  ;;  %v2192_v34 = vmul.f32 %v5643_v49, %v6828_v58 }
 0x51f   : > { %v5647_v28 = vpop.eup %5646  ;;  %v2187_v9 = vadd.f32 1.0, %v5645_v51 }
 0x520   : > { %v6906_v6 = vadd.f32 %v2194_v50, %v2192_v34  ;;  %v2195_v7 = vmul.f32 %v5647_v28, %v5639_v1  ;;  %v5649_v8 = vpop.eup %5648 }
 0x521   : > { %v2193_v10 = vmul.f32 %v5649_v8, %v6832_v0  ;;  %v5651_v12 = vpop.eup %5650  ;;  %v6927_v0 = vld [vmem:[#allocation7 + $0x60] ss:$16 sps:$4 sm:$0xff]  }
 0x522   : > { %5652 = vtanh.f32 %v6906_v6 }
 0x523   : > { %v6910_v11 = vadd.f32 %v2195_v7, %v2193_v10  ;;  %5654 = vrcp.f32 %v2187_v9 }
 0x525   : > { %5656 = vtanh.f32 %v6910_v11 }
 0x52c   : > { %v5653_v13 = vpop.eup %5652 }
 0x52d   : > { %v5655_v58 = vpop.eup %5654  ;;  %v2200_v16 = vmul.f32 %v5653_v13, %v5651_v12 }
 0x52f   : > { %v5657_v15 = vpop.eup %5656 }
 0x530   : > { %v2201_v18 = vmul.f32 %v5657_v15, %v5655_v58 }
 0x532   : > { %v2211_v19 = vpack.c.bf16 %v2201_v18, %v2200_v16 }
 0x534   : > { %2245 = vmatmul.mubr.bf16.vlgmr.msra.gmra.mrb[16].mxu0 %v2211_v19  ;;  %2288 = vmatmul.mubr.bf16.vlgmr.msra.gmra.mrb[16].mxu1 %v2211_v19 }
 0x535   : > { %2365 = vmatpush1.bf16.msra.mxu0 %v6835_v35  ;;  %2408 = vmatpush1.bf16.msra.mxu1 %v6838_v25 }
 0x536   : > { %2366 = vmatprep.subr.bf16.mxu0 %v6841_v39  ;;  %2409 = vmatprep.subr.bf16.mxu1 %v6844_v45 }
 0x537   : > { %2396 = vmatprep.mubr.bf16.mxu0 %v6283_v17  ;;  %2439 = vmatprep.mubr.bf16.mxu1 %v6283_v17 }
 0x539   : > { %2367 = vmatpush1.bf16.msra.mxu0 %v6849_v46  ;;  %2410 = vmatpush1.bf16.msra.mxu1 %v6852_v48 }
 0x53a   : > { %2368 = vmatprep.subr.bf16.mxu0 %v6855_v38  ;;  %2411 = vmatprep.subr.bf16.mxu1 %v6858_v47 }
 0x53d   : > { %2369 = vmatpush1.bf16.msra.mxu0 %v6861_v43  ;;  %2412 = vmatpush1.bf16.msra.mxu1 %v6864_v60 }
 0x53e   : > { %2370 = vmatprep.subr.bf16.mxu0 %v6867_v52  ;;  %2413 = vmatprep.subr.bf16.mxu1 %v6870_v23 }
 0x541   : > { %2371 = vmatpush1.bf16.msra.mxu0 %v6927_v0  ;;  %2414 = vmatpush1.bf16.msra.mxu1 %v6930_v20 }
 0x542   : > { %2372 = vmatprep.subr.bf16.mxu0 %v6933_v21  ;;  %2415 = vmatprep.subr.bf16.mxu1 %v6936_v22 }
 0x545   : > { %2373 = vmatpush1.bf16.msra.mxu0 %v6939_v27  ;;  %2416 = vmatpush1.bf16.msra.mxu1 %v6942_v29 }
 0x546   : > { %2374 = vmatprep.subr.bf16.mxu0 %v6945_v32  ;;  %2417 = vmatprep.subr.bf16.mxu1 %v6948_v24 }
 0x549   : > { %2375 = vmatpush1.bf16.msra.mxu0 %v6951_v31  ;;  %2418 = vmatpush1.bf16.msra.mxu1 %v6954_v14 }
 0x54a   : > { %2376 = vmatprep.subr.bf16.mxu0 %v6957_v33  ;;  %2419 = vmatprep.subr.bf16.mxu1 %v6960_v53 }
 0x54d   : > { %2377 = vmatpush1.bf16.msra.mxu0 %v6963_v54  ;;  %2420 = vmatpush1.bf16.msra.mxu1 %v6966_v55 }
 0x54e   : > { %2378 = vmatprep.subr.bf16.mxu0 %v6969_v56  ;;  %2421 = vmatprep.subr.bf16.mxu1 %v6972_v57 }
 0x551   : > { %2379 = vmatpush1.bf16.msra.mxu0 %v6975_v59  ;;  %2422 = vmatpush1.bf16.msra.mxu1 %v6978_v61 }
 0x552   : > { %2516 = vmatprep.subr.bf16.mxu0 %v6891_v2  ;;  %2559 = vmatprep.subr.bf16.mxu1 %v6894_v4 }
 0x607   : > { %v2246_v62 = vpop.f32.mrb[16].mxu0  ;;  %v2289_v63 = vpop.f32.mrb[16].mxu1 }
 0x608   : > { %v5069_v1 = vadd.f32 %v2246_v62, %v6707_v40  ;;  %v2248_v42 = vpop.f32.mrb[17].mxu0  ;;  %v2291_v49 = vpop.f32.mrb[17].mxu1  ;;  %v5133_v15 = vadd.f32 %v2289_v63, %v6723_v30 }
 0x609   : > { %v5070_v50 = vadd.f32 %v2248_v42, %v6709_v41  ;;  %v2250_v51 = vpop.f32.mrb[18].mxu0  ;;  %v2293_v34 = vpop.f32.mrb[18].mxu1  ;;  %v5134_v58 = vadd.f32 %v2291_v49, %v6718_v26 }
 0x60a   : > { %v4768_v28 = vmul.f32 -1.442695, %v5069_v1  ;;  %v5071_v5 = vadd.f32 %v2250_v51, %v6707_v40  ;;  %v2252_v7 = vpop.f32.mrb[19].mxu0  ;;  %v2295_v8 = vpop.f32.mrb[19].mxu1  ;;  %v5135_v19 = vadd.f32 %v2293_v34, %v6723_v30 }
 0x60b   : > { %v4770_v9 = vmul.f32 -1.442695, %v5070_v50  ;;  %v5072_v10 = vadd.f32 %v2252_v7, %v6709_v41  ;;  %v4772_v16 = vmul.f32 -1.442695, %v5134_v58  ;;  %v5136_v18 = vadd.f32 %v2295_v8, %v6718_v26 }
 0x60c   : > { %5658 = vpow2.f32 %v4768_v28  ;;  %v4769_v12 = vmul.f32 -1.442695, %v5071_v5 }
 0x60d   : > { %5660 = vpow2.f32 %v4770_v9  ;;  %v4771_v13 = vmul.f32 -1.442695, %v5072_v10  ;;  %v4773_v50 = vmul.f32 -1.442695, %v5136_v18 }
 0x60e   : > { %5662 = vpow2.f32 %v4769_v12 }
 0x60f   : > { %5664 = vpow2.f32 %v4771_v13 }
 0x610   : > { %5666 = vtanh.f32 %v5133_v15 }
 0x611   : > { %5668 = vpow2.f32 %v4772_v16 }
 0x612   : > { %5670 = vtanh.f32 %v5135_v19 }
 0x616   : > { %v5659_v62 = vpop.eup %5658 }
 0x617   : > { %v5661_v1 = vpop.eup %5660  ;;  %v2312_v42 = vadd.f32 1.0, %v5659_v62 }
 0x618   : > { %v2324_v51 = vadd.f32 1.0, %v5661_v1  ;;  %v5663_v28 = vpop.eup %5662 }
 0x619   : > { %5672 = vrcp.f32 %v2312_v42  ;;  %v2313_v49 = vadd.f32 1.0, %v5663_v28  ;;  %v5665_v5 = vpop.eup %5664 }
 0x61a   : > { %5674 = vrcp.f32 %v2324_v51  ;;  %v2325_v63 = vadd.f32 1.0, %v5665_v5  ;;  %v5667_v7 = vpop.eup %5666 }
 0x61b   : > { %5676 = vpow2.f32 %v4773_v50  ;;  %v5669_v8 = vpop.eup %5668 }
 0x61c   : > { %5678 = vrcp.f32 %v2313_v49  ;;  %v5671_v34 = vpop.eup %5670  ;;  %v2338_v16 = vadd.f32 1.0, %v5669_v8 }
 0x61d   : > { %5680 = vrcp.f32 %v2325_v63 }
 0x61e   : > { %5682 = vrcp.f32 %v2338_v16 }
 0x623   : > { %v5673_v9 = vpop.eup %5672 }
 0x624   : > { %v5675_v10 = vpop.eup %5674  ;;  %v2346_v12 = vmul.f32 %v5673_v9, %v5667_v7 }
 0x625   : > { %v5677_v13 = vpop.eup %5676  ;;  %v2344_v58 = vmul.f32 %v5675_v10, %v6906_v6 }
 0x626   : > { %v5679_v15 = vpop.eup %5678  ;;  %v2339_v1 = vadd.f32 1.0, %v5677_v13 }
 0x627   : > { %v6992_v18 = vadd.f32 %v2346_v12, %v2344_v58  ;;  %v2347_v19 = vmul.f32 %v5679_v15, %v5671_v34  ;;  %v5681_v62 = vpop.eup %5680 }
 0x628   : > { %v2345_v42 = vmul.f32 %v5681_v62, %v6910_v11  ;;  %v5683_v51 = vpop.eup %5682 }
 0x629   : > { %5684 = vtanh.f32 %v6992_v18 }
 0x62a   : > { %v6996_v50 = vadd.f32 %v2347_v19, %v2345_v42  ;;  %5686 = vrcp.f32 %v2339_v1 }
 0x62c   : > { %5688 = vtanh.f32 %v6996_v50 }
 0x633   : > { %v5685_v28 = vpop.eup %5684 }
 0x634   : > { %v5687_v6 = vpop.eup %5686  ;;  %v2352_v5 = vmul.f32 %v5685_v28, %v5683_v51 }
 0x636   : > { %v5689_v49 = vpop.eup %5688 }
 0x637   : > { %v2353_v63 = vmul.f32 %v5689_v49, %v5687_v6 }
 0x639   : > { %v2363_v7 = vpack.c.bf16 %v2353_v63, %v2352_v5 }
 0x63b   : > { %2397 = vmatmul.mubr.bf16.vlgmr.msra.gmra.mrb[20].mxu0 %v2363_v7  ;;  %2440 = vmatmul.mubr.bf16.vlgmr.msra.gmra.mrb[20].mxu1 %v2363_v7 }
 0x63c   : > { %2517 = vmatpush1.bf16.msra.mxu0 %v6835_v35  ;;  %2560 = vmatpush1.bf16.msra.mxu1 %v6838_v25 }
 0x63d   : > { %2518 = vmatprep.subr.bf16.mxu0 %v6841_v39  ;;  %2561 = vmatprep.subr.bf16.mxu1 %v6844_v45 }
 0x63e   : > { %2548 = vmatprep.mubr.bf16.mxu0 %v6283_v17  ;;  %2591 = vmatprep.mubr.bf16.mxu1 %v6283_v17 }
 0x640   : > { %2519 = vmatpush1.bf16.msra.mxu0 %v6849_v46  ;;  %2562 = vmatpush1.bf16.msra.mxu1 %v6852_v48 }
 0x641   : > { %2520 = vmatprep.subr.bf16.mxu0 %v6855_v38  ;;  %2563 = vmatprep.subr.bf16.mxu1 %v6858_v47 }
 0x644   : > { %2521 = vmatpush1.bf16.msra.mxu0 %v6861_v43  ;;  %2564 = vmatpush1.bf16.msra.mxu1 %v6864_v60 }
 0x645   : > { %2522 = vmatprep.subr.bf16.mxu0 %v6867_v52  ;;  %2565 = vmatprep.subr.bf16.mxu1 %v6870_v23 }
 0x648   : > { %2523 = vmatpush1.bf16.msra.mxu0 %v6927_v0  ;;  %2566 = vmatpush1.bf16.msra.mxu1 %v6930_v20 }
 0x649   : > { %2524 = vmatprep.subr.bf16.mxu0 %v6933_v21  ;;  %2567 = vmatprep.subr.bf16.mxu1 %v6936_v22 }
 0x64c   : > { %2525 = vmatpush1.bf16.msra.mxu0 %v6939_v27  ;;  %2568 = vmatpush1.bf16.msra.mxu1 %v6942_v29 }
 0x64d   : > { %2526 = vmatprep.subr.bf16.mxu0 %v6945_v32  ;;  %2569 = vmatprep.subr.bf16.mxu1 %v6948_v24 }
 0x650   : > { %2527 = vmatpush1.bf16.msra.mxu0 %v6951_v31  ;;  %2570 = vmatpush1.bf16.msra.mxu1 %v6954_v14 }
 0x651   : > { %2528 = vmatprep.subr.bf16.mxu0 %v6957_v33  ;;  %2571 = vmatprep.subr.bf16.mxu1 %v6960_v53 }
 0x654   : > { %2529 = vmatpush1.bf16.msra.mxu0 %v6963_v54  ;;  %2572 = vmatpush1.bf16.msra.mxu1 %v6966_v55 }
 0x655   : > { %2530 = vmatprep.subr.bf16.mxu0 %v6969_v56  ;;  %2573 = vmatprep.subr.bf16.mxu1 %v6972_v57 }
 0x658   : > { %2531 = vmatpush1.bf16.msra.mxu0 %v6975_v59  ;;  %2574 = vmatpush1.bf16.msra.mxu1 %v6978_v61 }
 0x659   : > { %2668 = vmatprep.subr.bf16.mxu0 %v6891_v2  ;;  %2711 = vmatprep.subr.bf16.mxu1 %v6894_v4 }
 0x70e   : > { %v2398_v11 = vpop.f32.mrb[20].mxu0  ;;  %v2441_v8 = vpop.f32.mrb[20].mxu1 }
 0x70f   : > { %v5073_v34 = vadd.f32 %v2398_v11, %v6707_v40  ;;  %v2400_v9 = vpop.f32.mrb[21].mxu0  ;;  %v2443_v10 = vpop.f32.mrb[21].mxu1  ;;  %v5137_v49 = vadd.f32 %v2441_v8, %v6723_v30 }
 0x710   : > { %v5074_v12 = vadd.f32 %v2400_v9, %v6709_v41  ;;  %v2402_v13 = vpop.f32.mrb[22].mxu0  ;;  %v2445_v58 = vpop.f32.mrb[22].mxu1  ;;  %v5138_v6 = vadd.f32 %v2443_v10, %v6718_v26 }
 0x711   : > { %v4774_v15 = vmul.f32 -1.442695, %v5073_v34  ;;  %v5075_v16 = vadd.f32 %v2402_v13, %v6707_v40  ;;  %v2404_v19 = vpop.f32.mrb[23].mxu0  ;;  %v2447_v62 = vpop.f32.mrb[23].mxu1  ;;  %v5139_v7 = vadd.f32 %v2445_v58, %v6723_v30 }
 0x712   : > { %v4776_v1 = vmul.f32 -1.442695, %v5074_v12  ;;  %v5076_v42 = vadd.f32 %v2404_v19, %v6709_v41  ;;  %v4778_v5 = vmul.f32 -1.442695, %v5138_v6  ;;  %v5140_v63 = vadd.f32 %v2447_v62, %v6718_v26 }
 0x713   : > { %5690 = vpow2.f32 %v4774_v15  ;;  %v4775_v51 = vmul.f32 -1.442695, %v5075_v16 }
 0x714   : > { %5692 = vpow2.f32 %v4776_v1  ;;  %v4777_v28 = vmul.f32 -1.442695, %v5076_v42  ;;  %v4779_v12 = vmul.f32 -1.442695, %v5140_v63 }
 0x715   : > { %5694 = vpow2.f32 %v4775_v51 }
 0x716   : > { %5696 = vpow2.f32 %v4777_v28 }
 0x717   : > { %5698 = vtanh.f32 %v5137_v49 }
 0x718   : > { %5700 = vpow2.f32 %v4778_v5 }
 0x719   : > { %5702 = vtanh.f32 %v5139_v7 }
 0x71d   : > { %v5691_v11 = vpop.eup %5690 }
 0x71e   : > { %v5693_v34 = vpop.eup %5692  ;;  %v2464_v9 = vadd.f32 1.0, %v5691_v11 }
 0x71f   : > { %v2476_v13 = vadd.f32 1.0, %v5693_v34  ;;  %v5695_v15 = vpop.eup %5694 }
 0x720   : > { %5704 = vrcp.f32 %v2464_v9  ;;  %v2465_v10 = vadd.f32 1.0, %v5695_v15  ;;  %v5697_v16 = vpop.eup %5696 }
 0x721   : > { %5706 = vrcp.f32 %v2476_v13  ;;  %v2477_v8 = vadd.f32 1.0, %v5697_v16  ;;  %v5699_v19 = vpop.eup %5698 }
 0x722   : > { %5708 = vpow2.f32 %v4779_v12  ;;  %v5701_v62 = vpop.eup %5700 }
 0x723   : > { %5710 = vrcp.f32 %v2465_v10  ;;  %v5703_v58 = vpop.eup %5702  ;;  %v2490_v5 = vadd.f32 1.0, %v5701_v62 }
 0x724   : > { %5712 = vrcp.f32 %v2477_v8 }
 0x725   : > { %5714 = vrcp.f32 %v2490_v5 }
 0x72a   : > { %v5705_v1 = vpop.eup %5704 }
 0x72b   : > { %v5707_v42 = vpop.eup %5706  ;;  %v2498_v51 = vmul.f32 %v5705_v1, %v5699_v19 }
 0x72c   : > { %v5709_v28 = vpop.eup %5708  ;;  %v2496_v6 = vmul.f32 %v5707_v42, %v6992_v18 }
 0x72d   : > { %v5711_v49 = vpop.eup %5710  ;;  %v2491_v34 = vadd.f32 1.0, %v5709_v28 }
 0x72e   : > { %v7042_v63 = vadd.f32 %v2498_v51, %v2496_v6  ;;  %v2499_v7 = vmul.f32 %v5711_v49, %v5703_v58  ;;  %v5713_v11 = vpop.eup %5712 }
 0x72f   : > { %v2497_v9 = vmul.f32 %v5713_v11, %v6996_v50  ;;  %v5715_v13 = vpop.eup %5714 }
 0x730   : > { %5716 = vtanh.f32 %v7042_v63 }
 0x731   : > { %v7046_v12 = vadd.f32 %v2499_v7, %v2497_v9  ;;  %5718 = vrcp.f32 %v2491_v34 }
 0x733   : > { %5720 = vtanh.f32 %v7046_v12 }
 0x73a   : > { %v5717_v15 = vpop.eup %5716 }
 0x73b   : > { %v5719_v18 = vpop.eup %5718  ;;  %v2504_v16 = vmul.f32 %v5717_v15, %v5715_v13 }
 0x73d   : > { %v5721_v10 = vpop.eup %5720 }
 0x73e   : > { %v2505_v8 = vmul.f32 %v5721_v10, %v5719_v18 }
 0x740   : > { %v2515_v19 = vpack.c.bf16 %v2505_v8, %v2504_v16 }
 0x742   : > { %2549 = vmatmul.mubr.bf16.vlgmr.msra.gmra.mrb[24].mxu0 %v2515_v19  ;;  %2592 = vmatmul.mubr.bf16.vlgmr.msra.gmra.mrb[24].mxu1 %v2515_v19 }
 0x743   : > { %2669 = vmatpush1.bf16.msra.mxu0 %v6835_v35  ;;  %2712 = vmatpush1.bf16.msra.mxu1 %v6838_v25 }
 0x744   : > { %2670 = vmatprep.subr.bf16.mxu0 %v6841_v39  ;;  %2713 = vmatprep.subr.bf16.mxu1 %v6844_v45 }
 0x745   : > { %2700 = vmatprep.mubr.bf16.mxu0 %v6283_v17  ;;  %2743 = vmatprep.mubr.bf16.mxu1 %v6283_v17 }
 0x747   : > { %2671 = vmatpush1.bf16.msra.mxu0 %v6849_v46  ;;  %2714 = vmatpush1.bf16.msra.mxu1 %v6852_v48 }
 0x748   : > { %2672 = vmatprep.subr.bf16.mxu0 %v6855_v38  ;;  %2715 = vmatprep.subr.bf16.mxu1 %v6858_v47 }
 0x74b   : > { %2673 = vmatpush1.bf16.msra.mxu0 %v6861_v43  ;;  %2716 = vmatpush1.bf16.msra.mxu1 %v6864_v60 }
 0x74c   : > { %2674 = vmatprep.subr.bf16.mxu0 %v6867_v52  ;;  %2717 = vmatprep.subr.bf16.mxu1 %v6870_v23 }
 0x74f   : > { %2675 = vmatpush1.bf16.msra.mxu0 %v6927_v0  ;;  %2718 = vmatpush1.bf16.msra.mxu1 %v6930_v20 }
 0x750   : > { %2676 = vmatprep.subr.bf16.mxu0 %v6933_v21  ;;  %2719 = vmatprep.subr.bf16.mxu1 %v6936_v22 }
 0x753   : > { %2677 = vmatpush1.bf16.msra.mxu0 %v6939_v27  ;;  %2720 = vmatpush1.bf16.msra.mxu1 %v6942_v29 }
 0x754   : > { %2678 = vmatprep.subr.bf16.mxu0 %v6945_v32  ;;  %2721 = vmatprep.subr.bf16.mxu1 %v6948_v24 }
 0x757   : > { %2679 = vmatpush1.bf16.msra.mxu0 %v6951_v31  ;;  %2722 = vmatpush1.bf16.msra.mxu1 %v6954_v14 }
 0x758   : > { %2680 = vmatprep.subr.bf16.mxu0 %v6957_v33  ;;  %2723 = vmatprep.subr.bf16.mxu1 %v6960_v53 }
 0x75b   : > { %2681 = vmatpush1.bf16.msra.mxu0 %v6963_v54  ;;  %2724 = vmatpush1.bf16.msra.mxu1 %v6966_v55 }
 0x75c   : > { %2682 = vmatprep.subr.bf16.mxu0 %v6969_v56  ;;  %2725 = vmatprep.subr.bf16.mxu1 %v6972_v57 }
 0x75f   : > { %2683 = vmatpush1.bf16.msra.mxu0 %v6975_v59  ;;  %2726 = vmatpush1.bf16.msra.mxu1 %v6978_v61 }
 0x760   : > { %2820 = vmatprep.subr.bf16.mxu0 %v6891_v2  ;;  %2863 = vmatprep.subr.bf16.mxu1 %v6894_v4 }
 0x815   : > { %v2550_v50 = vpop.f32.mrb[24].mxu0  ;;  %v2593_v62 = vpop.f32.mrb[24].mxu1 }
 0x816   : > { %v5077_v58 = vadd.f32 %v2550_v50, %v6707_v40  ;;  %v2552_v1 = vpop.f32.mrb[25].mxu0  ;;  %v2595_v42 = vpop.f32.mrb[25].mxu1  ;;  %v5141_v10 = vadd.f32 %v2593_v62, %v6723_v30 }
 0x817   : > { %v5078_v51 = vadd.f32 %v2552_v1, %v6709_v41  ;;  %v2554_v28 = vpop.f32.mrb[26].mxu0  ;;  %v2597_v6 = vpop.f32.mrb[26].mxu1  ;;  %v5142_v18 = vadd.f32 %v2595_v42, %v6718_v26 }
 0x818   : > { %v4780_v49 = vmul.f32 -1.442695, %v5077_v58  ;;  %v5079_v5 = vadd.f32 %v2554_v28, %v6707_v40  ;;  %v2556_v7 = vpop.f32.mrb[27].mxu0  ;;  %v2599_v11 = vpop.f32.mrb[27].mxu1  ;;  %v5143_v19 = vadd.f32 %v2597_v6, %v6723_v30 }
 0x819   : > { %v4782_v34 = vmul.f32 -1.442695, %v5078_v51  ;;  %v5080_v9 = vadd.f32 %v2556_v7, %v6709_v41  ;;  %v4784_v16 = vmul.f32 -1.442695, %v5142_v18  ;;  %v5144_v8 = vadd.f32 %v2599_v11, %v6718_v26 }
 0x81a   : > { %5722 = vpow2.f32 %v4780_v49  ;;  %v4781_v13 = vmul.f32 -1.442695, %v5079_v5 }
 0x81b   : > { %5724 = vpow2.f32 %v4782_v34  ;;  %v4783_v15 = vmul.f32 -1.442695, %v5080_v9  ;;  %v4785_v51 = vmul.f32 -1.442695, %v5144_v8 }
 0x81c   : > { %5726 = vpow2.f32 %v4781_v13 }
 0x81d   : > { %5728 = vpow2.f32 %v4783_v15 }
 0x81e   : > { %5730 = vtanh.f32 %v5141_v10 }
 0x81f   : > { %5732 = vpow2.f32 %v4784_v16 }
 0x820   : > { %5734 = vtanh.f32 %v5143_v19 }
 0x824   : > { %v5723_v50 = vpop.eup %5722 }
 0x825   : > { %v5725_v58 = vpop.eup %5724  ;;  %v2616_v1 = vadd.f32 1.0, %v5723_v50 }
 0x826   : > { %v2628_v28 = vadd.f32 1.0, %v5725_v58  ;;  %v5727_v49 = vpop.eup %5726 }
 0x827   : > { %5736 = vrcp.f32 %v2616_v1  ;;  %v2617_v42 = vadd.f32 1.0, %v5727_v49  ;;  %v5729_v5 = vpop.eup %5728 }
 0x828   : > { %5738 = vrcp.f32 %v2628_v28  ;;  %v2629_v62 = vadd.f32 1.0, %v5729_v5  ;;  %v5731_v7 = vpop.eup %5730 }
 0x829   : > { %5740 = vpow2.f32 %v4785_v51  ;;  %v5733_v11 = vpop.eup %5732 }
 0x82a   : > { %5742 = vrcp.f32 %v2617_v42  ;;  %v5735_v6 = vpop.eup %5734  ;;  %v2642_v16 = vadd.f32 1.0, %v5733_v11 }
 0x82b   : > { %5744 = vrcp.f32 %v2629_v62 }
 0x82c   : > { %5746 = vrcp.f32 %v2642_v16 }
 0x831   : > { %v5737_v34 = vpop.eup %5736 }
 0x832   : > { %v5739_v9 = vpop.eup %5738  ;;  %v2650_v13 = vmul.f32 %v5737_v34, %v5731_v7 }
 0x833   : > { %v5741_v15 = vpop.eup %5740  ;;  %v2648_v18 = vmul.f32 %v5739_v9, %v7042_v63 }
 0x834   : > { %v5743_v10 = vpop.eup %5742  ;;  %v2643_v58 = vadd.f32 1.0, %v5741_v15 }
 0x835   : > { %v7092_v8 = vadd.f32 %v2650_v13, %v2648_v18  ;;  %v2651_v19 = vmul.f32 %v5743_v10, %v5735_v6  ;;  %v5745_v50 = vpop.eup %5744 }
 0x836   : > { %v2649_v1 = vmul.f32 %v5745_v50, %v7046_v12  ;;  %v5747_v28 = vpop.eup %5746 }
 0x837   : > { %5748 = vtanh.f32 %v7092_v8 }
 0x838   : > { %v7096_v51 = vadd.f32 %v2651_v19, %v2649_v1  ;;  %5750 = vrcp.f32 %v2643_v58 }
 0x83a   : > { %5752 = vtanh.f32 %v7096_v51 }
 0x841   : > { %v5749_v49 = vpop.eup %5748 }
 0x842   : > { %v5751_v63 = vpop.eup %5750  ;;  %v2656_v5 = vmul.f32 %v5749_v49, %v5747_v28 }
 0x844   : > { %v5753_v42 = vpop.eup %5752 }
 0x845   : > { %v2657_v62 = vmul.f32 %v5753_v42, %v5751_v63 }
 0x847   : > { %v2667_v7 = vpack.c.bf16 %v2657_v62, %v2656_v5 }
 0x849   : > { %2701 = vmatmul.mubr.bf16.vlgmr.msra.gmra.mrb[28].mxu0 %v2667_v7  ;;  %2744 = vmatmul.mubr.bf16.vlgmr.msra.gmra.mrb[28].mxu1 %v2667_v7 }
 0x84a   : > { %2821 = vmatpush1.bf16.msra.mxu0 %v6835_v35  ;;  %2864 = vmatpush1.bf16.msra.mxu1 %v6838_v25 }
 0x84b   : > { %2822 = vmatprep.subr.bf16.mxu0 %v6841_v39  ;;  %2865 = vmatprep.subr.bf16.mxu1 %v6844_v45 }
 0x84c   : > { %2852 = vmatprep.mubr.bf16.mxu0 %v6283_v17  ;;  %2895 = vmatprep.mubr.bf16.mxu1 %v6283_v17 }
 0x84e   : > { %2823 = vmatpush1.bf16.msra.mxu0 %v6849_v46  ;;  %2866 = vmatpush1.bf16.msra.mxu1 %v6852_v48 }
 0x84f   : > { %2824 = vmatprep.subr.bf16.mxu0 %v6855_v38  ;;  %2867 = vmatprep.subr.bf16.mxu1 %v6858_v47 }
 0x852   : > { %2825 = vmatpush1.bf16.msra.mxu0 %v6861_v43  ;;  %2868 = vmatpush1.bf16.msra.mxu1 %v6864_v60 }
 0x853   : > { %2826 = vmatprep.subr.bf16.mxu0 %v6867_v52  ;;  %2869 = vmatprep.subr.bf16.mxu1 %v6870_v23 }
 0x856   : > { %2827 = vmatpush1.bf16.msra.mxu0 %v6927_v0  ;;  %2870 = vmatpush1.bf16.msra.mxu1 %v6930_v20 }
 0x857   : > { %2828 = vmatprep.subr.bf16.mxu0 %v6933_v21  ;;  %2871 = vmatprep.subr.bf16.mxu1 %v6936_v22 }
 0x85a   : > { %2829 = vmatpush1.bf16.msra.mxu0 %v6939_v27  ;;  %2872 = vmatpush1.bf16.msra.mxu1 %v6942_v29 }
 0x85b   : > { %2830 = vmatprep.subr.bf16.mxu0 %v6945_v32  ;;  %2873 = vmatprep.subr.bf16.mxu1 %v6948_v24 }
 0x85e   : > { %2831 = vmatpush1.bf16.msra.mxu0 %v6951_v31  ;;  %2874 = vmatpush1.bf16.msra.mxu1 %v6954_v14 }
 0x85f   : > { %2832 = vmatprep.subr.bf16.mxu0 %v6957_v33  ;;  %2875 = vmatprep.subr.bf16.mxu1 %v6960_v53 }
 0x862   : > { %2833 = vmatpush1.bf16.msra.mxu0 %v6963_v54  ;;  %2876 = vmatpush1.bf16.msra.mxu1 %v6966_v55 }
 0x863   : > { %2834 = vmatprep.subr.bf16.mxu0 %v6969_v56  ;;  %2877 = vmatprep.subr.bf16.mxu1 %v6972_v57 }
 0x866   : > { %2835 = vmatpush1.bf16.msra.mxu0 %v6975_v59  ;;  %2878 = vmatpush1.bf16.msra.mxu1 %v6978_v61 }
 0x867   : > { %2972 = vmatprep.subr.bf16.mxu0 %v6891_v2  ;;  %3015 = vmatprep.subr.bf16.mxu1 %v6894_v4 }
 0x91c   : > { %v2702_v35 = vpop.f32.mrb[28].mxu0  ;;  %v2745_v25 = vpop.f32.mrb[28].mxu1 }
 0x91d   : > { %v5081_v39 = vadd.f32 %v2702_v35, %v6707_v40  ;;  %v2704_v45 = vpop.f32.mrb[29].mxu0  ;;  %v2747_v46 = vpop.f32.mrb[29].mxu1  ;;  %v5145_v34 = vadd.f32 %v2745_v25, %v6723_v30 }
 0x91e   : > { %v5082_v48 = vadd.f32 %v2704_v45, %v6709_v41  ;;  %v2706_v38 = vpop.f32.mrb[30].mxu0  ;;  %v2749_v47 = vpop.f32.mrb[30].mxu1  ;;  %v5146_v6 = vadd.f32 %v2747_v46, %v6718_v26 }
 0x91f   : > { %v4786_v43 = vmul.f32 -1.442695, %v5081_v39  ;;  %v5083_v60 = vadd.f32 %v2706_v38, %v6707_v40  ;;  %v2708_v52 = vpop.f32.mrb[31].mxu0  ;;  %v2751_v23 = vpop.f32.mrb[31].mxu1  ;;  %v5147_v15 = vadd.f32 %v2749_v47, %v6723_v30 }
 0x920   : > { %v4788_v12 = vmul.f32 -1.442695, %v5082_v48  ;;  %v5084_v2 = vadd.f32 %v2708_v52, %v6709_v41  ;;  %v4790_v9 = vmul.f32 -1.442695, %v5146_v6  ;;  %v5148_v13 = vadd.f32 %v2751_v23, %v6718_v26 }
 0x921   : > { %5754 = vpow2.f32 %v4786_v43  ;;  %v4787_v4 = vmul.f32 -1.442695, %v5083_v60 }
 0x922   : > { %5756 = vpow2.f32 %v4788_v12  ;;  %v4789_v11 = vmul.f32 -1.442695, %v5084_v2  ;;  %v4791_v19 = vmul.f32 -1.442695, %v5148_v13  ;;  %v7158_v13 = vld [vmem:[#allocation7 + $0x2c] ss:$16 sps:$4 sm:$0xff]  }
 0x923   : > { %5758 = vpow2.f32 %v4787_v4 }
 0x924   : > { %5760 = vpow2.f32 %v4789_v11 }
 0x925   : > { %5762 = vtanh.f32 %v5145_v34  ;;  %v7149_v34 = vld [vmem:[#allocation7] ss:$16 sps:$4 sm:$0xff]  }
 0x926   : > { %5764 = vpow2.f32 %v4790_v9  ;;  %v7155_v9 = vld [vmem:[#allocation7 + $0x24] ss:$16 sps:$4 sm:$0xff]  }
 0x927   : > { %5766 = vtanh.f32 %v5147_v15  ;;  %v7163_v15 = vld [vmem:[#allocation7 + $0x20] ss:$16 sps:$4 sm:$0xff]  }
 0x92b   : > { %v5755_v18 = vpop.eup %5754 }
 0x92c   : > { %v5757_v10 = vpop.eup %5756  ;;  %v2768_v16 = vadd.f32 1.0, %v5755_v18  ;;  %v7166_v18 = vld [vmem:[#allocation7 + $0x28] ss:$16 sps:$4 sm:$0xff]  }
 0x92d   : > { %v2780_v50 = vadd.f32 1.0, %v5757_v10  ;;  %v5759_v58 = vpop.eup %5758  ;;  %v7169_v10 = vld [vmem:[#allocation7 + $0x44] ss:$16 sps:$4 sm:$0xff]  }
 0x92e   : > { %5768 = vrcp.f32 %v2768_v16  ;;  %v2769_v1 = vadd.f32 1.0, %v5759_v58  ;;  %v5761_v28 = vpop.eup %5760  ;;  %v7172_v16 = vld [vmem:[#allocation7 + $0x4c] ss:$16 sps:$4 sm:$0xff]   ;;  %v7181_v58 = vld [vmem:[#allocation7 + $0x64] ss:$16 sps:$4 sm:$0xff]  }
 0x92f   : > { %5770 = vrcp.f32 %v2780_v50  ;;  %v2781_v49 = vadd.f32 1.0, %v5761_v28  ;;  %v5763_v63 = vpop.eup %5762  ;;  %v7178_v50 = vld [vmem:[#allocation7 + $0x48] ss:$16 sps:$4 sm:$0xff]  }
 0x930   : > { %5772 = vpow2.f32 %v4791_v19  ;;  %v5765_v42 = vpop.eup %5764  ;;  %v7175_v19 = vld [vmem:[#allocation7 + $0x40] ss:$16 sps:$4 sm:$0xff]  }
 0x931   : > { %5774 = vrcp.f32 %v2769_v1  ;;  %v5767_v5 = vpop.eup %5766  ;;  %v2794_v46 = vadd.f32 1.0, %v5765_v42  ;;  %v7184_v1 = vld [vmem:[#allocation7 + $0x6c] ss:$16 sps:$4 sm:$0xff]  }
 0x932   : > { %5776 = vrcp.f32 %v2781_v49 }
 0x933   : > { %5778 = vrcp.f32 %v2794_v46 }
 0x938   : > { %v5769_v62 = vpop.eup %5768 }
 0x939   : > { %v5771_v7 = vpop.eup %5770  ;;  %v2802_v35 = vmul.f32 %v5769_v62, %v5763_v63 }
 0x93a   : > { %v5773_v25 = vpop.eup %5772  ;;  %v2800_v39 = vmul.f32 %v5771_v7, %v7092_v8 }
 0x93b   : > { %v5775_v45 = vpop.eup %5774  ;;  %v2795_v43 = vadd.f32 1.0, %v5773_v25 }
 0x93c   : > { %v7142_v48 = vadd.f32 %v2802_v35, %v2800_v39  ;;  %v2803_v38 = vmul.f32 %v5775_v45, %v5767_v5  ;;  %v5777_v47 = vpop.eup %5776 }
 0x93d   : > { %v2801_v60 = vmul.f32 %v5777_v47, %v7096_v51  ;;  %v5779_v23 = vpop.eup %5778  ;;  %v7152_v51 = vld [vmem:[#allocation7 + $0x8] ss:$16 sps:$4 sm:$0xff]  }
 0x93e   : > { %5780 = vtanh.f32 %v7142_v48 }
 0x93f   : > { %v7146_v52 = vadd.f32 %v2803_v38, %v2801_v60  ;;  %5782 = vrcp.f32 %v2795_v43 }
 0x941   : > { %5784 = vtanh.f32 %v7146_v52 }
 0x948   : > { %v5781_v12 = vpop.eup %5780 }
 0x949   : > { %v5783_v8 = vpop.eup %5782  ;;  %v2808_v4 = vmul.f32 %v5781_v12, %v5779_v23 }
 0x94b   : > { %v5785_v2 = vpop.eup %5784 }
 0x94c   : > { %v2809_v11 = vmul.f32 %v5785_v2, %v5783_v8 }
 0x94e   : > { %v2819_v6 = vpack.c.bf16 %v2809_v11, %v2808_v4 }
 0x950   : > { %2853 = vmatmul.mubr.bf16.vlgmr.msra.gmra.mrb[32].mxu0 %v2819_v6  ;;  %2896 = vmatmul.mubr.bf16.vlgmr.msra.gmra.mrb[32].mxu1 %v2819_v6 }
 0x951   : > { %2973 = vmatpush1.bf16.msra.mxu0 %v7149_v34  ;;  %3016 = vmatpush1.bf16.msra.mxu1 %v7152_v51 }
 0x952   : > { %2974 = vmatprep.subr.bf16.mxu0 %v7155_v9  ;;  %3017 = vmatprep.subr.bf16.mxu1 %v7158_v13 }
 0x953   : > { %3004 = vmatprep.mubr.bf16.mxu0 %v6283_v17  ;;  %3047 = vmatprep.mubr.bf16.mxu1 %v6283_v17 }
 0x955   : > { %2975 = vmatpush1.bf16.msra.mxu0 %v7163_v15  ;;  %3018 = vmatpush1.bf16.msra.mxu1 %v7166_v18 }
 0x956   : > { %2976 = vmatprep.subr.bf16.mxu0 %v7169_v10  ;;  %3019 = vmatprep.subr.bf16.mxu1 %v7172_v16 }
 0x959   : > { %2977 = vmatpush1.bf16.msra.mxu0 %v7175_v19  ;;  %3020 = vmatpush1.bf16.msra.mxu1 %v7178_v50 }
 0x95a   : > { %2978 = vmatprep.subr.bf16.mxu0 %v7181_v58  ;;  %3021 = vmatprep.subr.bf16.mxu1 %v7184_v1 }
 0x95d   : > { %2979 = vmatpush1.bf16.msra.mxu0 %v6927_v0  ;;  %3022 = vmatpush1.bf16.msra.mxu1 %v6930_v20  ;;  %v7205_v0 = vld [vmem:[#allocation7 + $0x4] ss:$16 sps:$4 sm:$0xff]   ;;  %v7208_v20 = vld [vmem:[#allocation7 + $0xc] ss:$16 sps:$4 sm:$0xff]  }
 0x95e   : > { %2980 = vmatprep.subr.bf16.mxu0 %v6933_v21  ;;  %3023 = vmatprep.subr.bf16.mxu1 %v6936_v22 }
 0x961   : > { %2981 = vmatpush1.bf16.msra.mxu0 %v6939_v27  ;;  %3024 = vmatpush1.bf16.msra.mxu1 %v6942_v29 }
 0x962   : > { %2982 = vmatprep.subr.bf16.mxu0 %v6945_v32  ;;  %3025 = vmatprep.subr.bf16.mxu1 %v6948_v24 }
 0x965   : > { %2983 = vmatpush1.bf16.msra.mxu0 %v6951_v31  ;;  %3026 = vmatpush1.bf16.msra.mxu1 %v6954_v14 }
 0x966   : > { %2984 = vmatprep.subr.bf16.mxu0 %v6957_v33  ;;  %3027 = vmatprep.subr.bf16.mxu1 %v6960_v53 }
 0x969   : > { %2985 = vmatpush1.bf16.msra.mxu0 %v6963_v54  ;;  %3028 = vmatpush1.bf16.msra.mxu1 %v6966_v55 }
 0x96a   : > { %2986 = vmatprep.subr.bf16.mxu0 %v6969_v56  ;;  %3029 = vmatprep.subr.bf16.mxu1 %v6972_v57 }
 0x96d   : > { %2987 = vmatpush1.bf16.msra.mxu0 %v6975_v59  ;;  %3030 = vmatpush1.bf16.msra.mxu1 %v6978_v61 }
 0x96e   : > { %3124 = vmatprep.subr.bf16.mxu0 %v7205_v0  ;;  %3167 = vmatprep.subr.bf16.mxu1 %v7208_v20 }
 0xa23   : > { %v2854_v21 = vpop.f32.mrb[32].mxu0  ;;  %v2897_v22 = vpop.f32.mrb[32].mxu1 }
 0xa24   : > { %v5085_v27 = vadd.f32 %v2854_v21, %v6707_v40  ;;  %v2856_v29 = vpop.f32.mrb[33].mxu0  ;;  %v2899_v32 = vpop.f32.mrb[33].mxu1  ;;  %v5149_v49 = vadd.f32 %v2897_v22, %v6723_v30 }
 0xa25   : > { %v5086_v24 = vadd.f32 %v2856_v29, %v6709_v41  ;;  %v2858_v31 = vpop.f32.mrb[34].mxu0  ;;  %v2901_v14 = vpop.f32.mrb[34].mxu1  ;;  %v5150_v28 = vadd.f32 %v2899_v32, %v6718_v26 }
 0xa26   : > { %v4792_v33 = vmul.f32 -1.442695, %v5085_v27  ;;  %v5087_v53 = vadd.f32 %v2858_v31, %v6707_v40  ;;  %v2860_v54 = vpop.f32.mrb[35].mxu0  ;;  %v2903_v55 = vpop.f32.mrb[35].mxu1  ;;  %v5151_v5 = vadd.f32 %v2901_v14, %v6723_v30 }
 0xa27   : > { %v4794_v56 = vmul.f32 -1.442695, %v5086_v24  ;;  %v5088_v57 = vadd.f32 %v2860_v54, %v6709_v41  ;;  %v4796_v63 = vmul.f32 -1.442695, %v5150_v28  ;;  %v5152_v42 = vadd.f32 %v2903_v55, %v6718_v26  ;;  %v7253_v28 = vld [vmem:[#allocation7 + $0x80] ss:$16 sps:$4 sm:$0xff]  }
 0xa28   : > { %5786 = vpow2.f32 %v4792_v33  ;;  %v4793_v59 = vmul.f32 -1.442695, %v5087_v53 }
 0xa29   : > { %5788 = vpow2.f32 %v4794_v56  ;;  %v4795_v61 = vmul.f32 -1.442695, %v5088_v57  ;;  %v4797_v25 = vmul.f32 -1.442695, %v5152_v42  ;;  %v7244_v57 = vld [vmem:[#allocation7 + $0x68] ss:$16 sps:$4 sm:$0xff]  }
 0xa2a   : > { %5790 = vpow2.f32 %v4793_v59  ;;  %v7247_v59 = vld [vmem:[#allocation7 + $0x84] ss:$16 sps:$4 sm:$0xff]   ;;  %v7262_v42 = vld [vmem:[#allocation7 + $0xac] ss:$16 sps:$4 sm:$0xff]  }
 0xa2b   : > { %5792 = vpow2.f32 %v4795_v61  ;;  %v7250_v61 = vld [vmem:[#allocation7 + $0x8c] ss:$16 sps:$4 sm:$0xff]  }
 0xa2c   : > { %5794 = vtanh.f32 %v5149_v49  ;;  %v7256_v49 = vld [vmem:[#allocation7 + $0x88] ss:$16 sps:$4 sm:$0xff]  }
 0xa2d   : > { %5796 = vpow2.f32 %v4796_v63  ;;  %v7259_v63 = vld [vmem:[#allocation7 + $0xa4] ss:$16 sps:$4 sm:$0xff]  }
 0xa2e   : > { %5798 = vtanh.f32 %v5151_v5  ;;  %v7265_v5 = vld [vmem:[#allocation7 + $0xa0] ss:$16 sps:$4 sm:$0xff]  }
 0xa32   : > { %v5787_v62 = vpop.eup %5786 }
 0xa33   : > { %v5789_v7 = vpop.eup %5788  ;;  %v2920_v35 = vadd.f32 1.0, %v5787_v62  ;;  %v7268_v62 = vld [vmem:[#allocation7 + $0xa8] ss:$16 sps:$4 sm:$0xff]  }
 0xa34   : > { %v2932_v39 = vadd.f32 1.0, %v5789_v7  ;;  %v5791_v45 = vpop.eup %5790  ;;  %v7271_v7 = vld [vmem:[#allocation7 + $0xc4] ss:$16 sps:$4 sm:$0xff]  }
 0xa35   : > { %5800 = vrcp.f32 %v2920_v35  ;;  %v2921_v46 = vadd.f32 1.0, %v5791_v45  ;;  %v5793_v38 = vpop.eup %5792  ;;  %v7274_v35 = vld [vmem:[#allocation7 + $0xcc] ss:$16 sps:$4 sm:$0xff]   ;;  %v7283_v45 = vld [vmem:[#allocation7 + $0xe4] ss:$16 sps:$4 sm:$0xff]  }
 0xa36   : > { %5802 = vrcp.f32 %v2932_v39  ;;  %v2933_v47 = vadd.f32 1.0, %v5793_v38  ;;  %v5795_v43 = vpop.eup %5794  ;;  %v7280_v39 = vld [vmem:[#allocation7 + $0xc8] ss:$16 sps:$4 sm:$0xff]   ;;  %v7289_v38 = vld [vmem:[#allocation7 + $0xe0] ss:$16 sps:$4 sm:$0xff]  }
 0xa37   : > { %5804 = vpow2.f32 %v4797_v25  ;;  %v5797_v60 = vpop.eup %5796  ;;  %v7277_v25 = vld [vmem:[#allocation7 + $0xc0] ss:$16 sps:$4 sm:$0xff]  }
 0xa38   : > { %5806 = vrcp.f32 %v2921_v46  ;;  %v5799_v23 = vpop.eup %5798  ;;  %v2946_v21 = vadd.f32 1.0, %v5797_v60  ;;  %v7286_v46 = vld [vmem:[#allocation7 + $0xec] ss:$16 sps:$4 sm:$0xff]  }
 0xa39   : > { %5808 = vrcp.f32 %v2933_v47  ;;  %v7292_v47 = vld [vmem:[#allocation7 + $0xe8] ss:$16 sps:$4 sm:$0xff]  }
 0xa3a   : > { %5810 = vrcp.f32 %v2946_v21 }
 0xa3f   : > { %v5801_v12 = vpop.eup %5800 }
 0xa40   : > { %v5803_v8 = vpop.eup %5802  ;;  %v2954_v2 = vmul.f32 %v5801_v12, %v5795_v43 }
 0xa41   : > { %v5805_v4 = vpop.eup %5804  ;;  %v2952_v11 = vmul.f32 %v5803_v8, %v7142_v48 }
 0xa42   : > { %v5807_v6 = vpop.eup %5806  ;;  %v2947_v32 = vadd.f32 1.0, %v5805_v4 }
 0xa43   : > { %v7220_v22 = vadd.f32 %v2954_v2, %v2952_v11  ;;  %v2955_v27 = vmul.f32 %v5807_v6, %v5799_v23  ;;  %v5809_v29 = vpop.eup %5808 }
 0xa44   : > { %v2953_v24 = vmul.f32 %v5809_v29, %v7146_v52  ;;  %v5811_v14 = vpop.eup %5810  ;;  %v7241_v52 = vld [vmem:[#allocation7 + $0x60] ss:$16 sps:$4 sm:$0xff]  }
 0xa45   : > { %5812 = vtanh.f32 %v7220_v22 }
 0xa46   : > { %v7224_v31 = vadd.f32 %v2955_v27, %v2953_v24  ;;  %5814 = vrcp.f32 %v2947_v32 }
 0xa48   : > { %5816 = vtanh.f32 %v7224_v31 }
 0xa4f   : > { %v5813_v33 = vpop.eup %5812 }
 0xa50   : > { %v5815_v48 = vpop.eup %5814  ;;  %v2960_v54 = vmul.f32 %v5813_v33, %v5811_v14 }
 0xa52   : > { %v5817_v53 = vpop.eup %5816 }
 0xa53   : > { %v2961_v55 = vmul.f32 %v5817_v53, %v5815_v48 }
 0xa55   : > { %v2971_v56 = vpack.c.bf16 %v2961_v55, %v2960_v54 }
 0xa57   : > { %3005 = vmatmul.mubr.bf16.vlgmr.msra.gmra.mrb[36].mxu0 %v2971_v56  ;;  %3048 = vmatmul.mubr.bf16.vlgmr.msra.gmra.mrb[36].mxu1 %v2971_v56 }
 0xa58   : > { %3125 = vmatpush1.bf16.msra.mxu0 %v7149_v34  ;;  %3168 = vmatpush1.bf16.msra.mxu1 %v7152_v51 }
 0xa59   : > { %3126 = vmatprep.subr.bf16.mxu0 %v7155_v9  ;;  %3169 = vmatprep.subr.bf16.mxu1 %v7158_v13 }
 0xa5a   : > { %3156 = vmatprep.mubr.bf16.mxu0 %v6283_v17  ;;  %3199 = vmatprep.mubr.bf16.mxu1 %v6283_v17 }
 0xa5c   : > { %3127 = vmatpush1.bf16.msra.mxu0 %v7163_v15  ;;  %3170 = vmatpush1.bf16.msra.mxu1 %v7166_v18 }
 0xa5d   : > { %3128 = vmatprep.subr.bf16.mxu0 %v7169_v10  ;;  %3171 = vmatprep.subr.bf16.mxu1 %v7172_v16 }
 0xa60   : > { %3129 = vmatpush1.bf16.msra.mxu0 %v7175_v19  ;;  %3172 = vmatpush1.bf16.msra.mxu1 %v7178_v50 }
 0xa61   : > { %3130 = vmatprep.subr.bf16.mxu0 %v7181_v58  ;;  %3173 = vmatprep.subr.bf16.mxu1 %v7184_v1 }
 0xa64   : > { %3131 = vmatpush1.bf16.msra.mxu0 %v7241_v52  ;;  %3174 = vmatpush1.bf16.msra.mxu1 %v7244_v57 }
 0xa65   : > { %3132 = vmatprep.subr.bf16.mxu0 %v7247_v59  ;;  %3175 = vmatprep.subr.bf16.mxu1 %v7250_v61 }
 0xa68   : > { %3133 = vmatpush1.bf16.msra.mxu0 %v7253_v28  ;;  %3176 = vmatpush1.bf16.msra.mxu1 %v7256_v49 }
 0xa69   : > { %3134 = vmatprep.subr.bf16.mxu0 %v7259_v63  ;;  %3177 = vmatprep.subr.bf16.mxu1 %v7262_v42 }
 0xa6c   : > { %3135 = vmatpush1.bf16.msra.mxu0 %v7265_v5  ;;  %3178 = vmatpush1.bf16.msra.mxu1 %v7268_v62 }
 0xa6d   : > { %3136 = vmatprep.subr.bf16.mxu0 %v7271_v7  ;;  %3179 = vmatprep.subr.bf16.mxu1 %v7274_v35 }
 0xa70   : > { %3137 = vmatpush1.bf16.msra.mxu0 %v7277_v25  ;;  %3180 = vmatpush1.bf16.msra.mxu1 %v7280_v39 }
 0xa71   : > { %3138 = vmatprep.subr.bf16.mxu0 %v7283_v45  ;;  %3181 = vmatprep.subr.bf16.mxu1 %v7286_v46 }
 0xa74   : > { %3139 = vmatpush1.bf16.msra.mxu0 %v7289_v38  ;;  %3182 = vmatpush1.bf16.msra.mxu1 %v7292_v47 }
 0xa75   : > { %3276 = vmatprep.subr.bf16.mxu0 %v7205_v0  ;;  %3319 = vmatprep.subr.bf16.mxu1 %v7208_v20 }
 0xb2a   : > { %v3006_v43 = vpop.f32.mrb[36].mxu0  ;;  %v3049_v60 = vpop.f32.mrb[36].mxu1 }
 0xb2b   : > { %v5089_v23 = vadd.f32 %v3006_v43, %v6707_v40  ;;  %v3008_v12 = vpop.f32.mrb[37].mxu0  ;;  %v3051_v8 = vpop.f32.mrb[37].mxu1  ;;  %v5153_v53 = vadd.f32 %v3049_v60, %v6723_v30 }
 0xb2c   : > { %v5090_v2 = vadd.f32 %v3008_v12, %v6709_v41  ;;  %v3010_v4 = vpop.f32.mrb[38].mxu0  ;;  %v3053_v11 = vpop.f32.mrb[38].mxu1  ;;  %v5154_v48 = vadd.f32 %v3051_v8, %v6718_v26 }
 0xb2d   : > { %v4798_v6 = vmul.f32 -1.442695, %v5089_v23  ;;  %v5091_v21 = vadd.f32 %v3010_v4, %v6707_v40  ;;  %v3012_v27 = vpop.f32.mrb[39].mxu0  ;;  %v3055_v29 = vpop.f32.mrb[39].mxu1  ;;  %v5155_v56 = vadd.f32 %v3053_v11, %v6723_v30 }
 0xb2e   : > { %v4800_v32 = vmul.f32 -1.442695, %v5090_v2  ;;  %v5092_v24 = vadd.f32 %v3012_v27, %v6709_v41  ;;  %v4802_v54 = vmul.f32 -1.442695, %v5154_v48  ;;  %v5156_v55 = vadd.f32 %v3055_v29, %v6718_v26 }
 0xb2f   : > { %5818 = vpow2.f32 %v4798_v6  ;;  %v4799_v14 = vmul.f32 -1.442695, %v5091_v21 }
 0xb30   : > { %5820 = vpow2.f32 %v4800_v32  ;;  %v4801_v33 = vmul.f32 -1.442695, %v5092_v24  ;;  %v4803_v2 = vmul.f32 -1.442695, %v5156_v55 }
 0xb31   : > { %5822 = vpow2.f32 %v4799_v14 }
 0xb32   : > { %5824 = vpow2.f32 %v4801_v33 }
 0xb33   : > { %5826 = vtanh.f32 %v5153_v53 }
 0xb34   : > { %5828 = vpow2.f32 %v4802_v54 }
 0xb35   : > { %5830 = vtanh.f32 %v5155_v56 }
 0xb39   : > { %v5819_v43 = vpop.eup %5818 }
 0xb3a   : > { %v5821_v23 = vpop.eup %5820  ;;  %v3072_v12 = vadd.f32 1.0, %v5819_v43 }
 0xb3b   : > { %v3084_v4 = vadd.f32 1.0, %v5821_v23  ;;  %v5823_v6 = vpop.eup %5822 }
 0xb3c   : > { %5832 = vrcp.f32 %v3072_v12  ;;  %v3073_v8 = vadd.f32 1.0, %v5823_v6  ;;  %v5825_v21 = vpop.eup %5824 }
 0xb3d   : > { %5834 = vrcp.f32 %v3084_v4  ;;  %v3085_v60 = vadd.f32 1.0, %v5825_v21  ;;  %v5827_v27 = vpop.eup %5826 }
 0xb3e   : > { %5836 = vpow2.f32 %v4803_v2  ;;  %v5829_v29 = vpop.eup %5828 }
 0xb3f   : > { %5838 = vrcp.f32 %v3073_v8  ;;  %v5831_v11 = vpop.eup %5830  ;;  %v3098_v54 = vadd.f32 1.0, %v5829_v29 }
 0xb40   : > { %5840 = vrcp.f32 %v3085_v60 }
 0xb41   : > { %5842 = vrcp.f32 %v3098_v54 }
 0xb46   : > { %v5833_v32 = vpop.eup %5832 }
 0xb47   : > { %v5835_v24 = vpop.eup %5834  ;;  %v3106_v14 = vmul.f32 %v5833_v32, %v5827_v27 }
 0xb48   : > { %v5837_v33 = vpop.eup %5836  ;;  %v3104_v48 = vmul.f32 %v5835_v24, %v7220_v22 }
 0xb49   : > { %v5839_v53 = vpop.eup %5838  ;;  %v3099_v23 = vadd.f32 1.0, %v5837_v33 }
 0xb4a   : > { %v7306_v55 = vadd.f32 %v3106_v14, %v3104_v48  ;;  %v3107_v56 = vmul.f32 %v5839_v53, %v5831_v11  ;;  %v5841_v43 = vpop.eup %5840 }
 0xb4b   : > { %v3105_v12 = vmul.f32 %v5841_v43, %v7224_v31  ;;  %v5843_v4 = vpop.eup %5842 }
 0xb4c   : > { %5844 = vtanh.f32 %v7306_v55 }
 0xb4d   : > { %v7310_v2 = vadd.f32 %v3107_v56, %v3105_v12  ;;  %5846 = vrcp.f32 %v3099_v23 }
 0xb4f   : > { %5848 = vtanh.f32 %v7310_v2 }
 0xb56   : > { %v5845_v6 = vpop.eup %5844 }
 0xb57   : > { %v5847_v22 = vpop.eup %5846  ;;  %v3112_v21 = vmul.f32 %v5845_v6, %v5843_v4 }
 0xb59   : > { %v5849_v8 = vpop.eup %5848 }
 0xb5a   : > { %v3113_v60 = vmul.f32 %v5849_v8, %v5847_v22 }
 0xb5c   : > { %v3123_v27 = vpack.c.bf16 %v3113_v60, %v3112_v21 }
 0xb5e   : > { %3157 = vmatmul.mubr.bf16.vlgmr.msra.gmra.mrb[40].mxu0 %v3123_v27  ;;  %3200 = vmatmul.mubr.bf16.vlgmr.msra.gmra.mrb[40].mxu1 %v3123_v27 }
 0xb5f   : > { %3277 = vmatpush1.bf16.msra.mxu0 %v7149_v34  ;;  %3320 = vmatpush1.bf16.msra.mxu1 %v7152_v51 }
 0xb60   : > { %3278 = vmatprep.subr.bf16.mxu0 %v7155_v9  ;;  %3321 = vmatprep.subr.bf16.mxu1 %v7158_v13 }
 0xb61   : > { %3308 = vmatprep.mubr.bf16.mxu0 %v6283_v17  ;;  %3351 = vmatprep.mubr.bf16.mxu1 %v6283_v17 }
 0xb63   : > { %3279 = vmatpush1.bf16.msra.mxu0 %v7163_v15  ;;  %3322 = vmatpush1.bf16.msra.mxu1 %v7166_v18 }
 0xb64   : > { %3280 = vmatprep.subr.bf16.mxu0 %v7169_v10  ;;  %3323 = vmatprep.subr.bf16.mxu1 %v7172_v16 }
 0xb67   : > { %3281 = vmatpush1.bf16.msra.mxu0 %v7175_v19  ;;  %3324 = vmatpush1.bf16.msra.mxu1 %v7178_v50 }
 0xb68   : > { %3282 = vmatprep.subr.bf16.mxu0 %v7181_v58  ;;  %3325 = vmatprep.subr.bf16.mxu1 %v7184_v1 }
 0xb6b   : > { %3283 = vmatpush1.bf16.msra.mxu0 %v7241_v52  ;;  %3326 = vmatpush1.bf16.msra.mxu1 %v7244_v57 }
 0xb6c   : > { %3284 = vmatprep.subr.bf16.mxu0 %v7247_v59  ;;  %3327 = vmatprep.subr.bf16.mxu1 %v7250_v61 }
 0xb6f   : > { %3285 = vmatpush1.bf16.msra.mxu0 %v7253_v28  ;;  %3328 = vmatpush1.bf16.msra.mxu1 %v7256_v49 }
 0xb70   : > { %3286 = vmatprep.subr.bf16.mxu0 %v7259_v63  ;;  %3329 = vmatprep.subr.bf16.mxu1 %v7262_v42 }
 0xb73   : > { %3287 = vmatpush1.bf16.msra.mxu0 %v7265_v5  ;;  %3330 = vmatpush1.bf16.msra.mxu1 %v7268_v62 }
 0xb74   : > { %3288 = vmatprep.subr.bf16.mxu0 %v7271_v7  ;;  %3331 = vmatprep.subr.bf16.mxu1 %v7274_v35 }
 0xb77   : > { %3289 = vmatpush1.bf16.msra.mxu0 %v7277_v25  ;;  %3332 = vmatpush1.bf16.msra.mxu1 %v7280_v39 }
 0xb78   : > { %3290 = vmatprep.subr.bf16.mxu0 %v7283_v45  ;;  %3333 = vmatprep.subr.bf16.mxu1 %v7286_v46 }
 0xb7b   : > { %3291 = vmatpush1.bf16.msra.mxu0 %v7289_v38  ;;  %3334 = vmatpush1.bf16.msra.mxu1 %v7292_v47 }
 0xb7c   : > { %3428 = vmatprep.subr.bf16.mxu0 %v7205_v0  ;;  %3471 = vmatprep.subr.bf16.mxu1 %v7208_v20 }
 0xc31   : > { %v3158_v31 = vpop.f32.mrb[40].mxu0  ;;  %v3201_v29 = vpop.f32.mrb[40].mxu1 }
 0xc32   : > { %v5093_v11 = vadd.f32 %v3158_v31, %v6707_v40  ;;  %v3160_v32 = vpop.f32.mrb[41].mxu0  ;;  %v3203_v24 = vpop.f32.mrb[41].mxu1  ;;  %v5157_v8 = vadd.f32 %v3201_v29, %v6723_v30 }
 0xc33   : > { %v5094_v14 = vadd.f32 %v3160_v32, %v6709_v41  ;;  %v3162_v33 = vpop.f32.mrb[42].mxu0  ;;  %v3205_v48 = vpop.f32.mrb[42].mxu1  ;;  %v5158_v22 = vadd.f32 %v3203_v24, %v6718_v26 }
 0xc34   : > { %v4804_v53 = vmul.f32 -1.442695, %v5093_v11  ;;  %v5095_v54 = vadd.f32 %v3162_v33, %v6707_v40  ;;  %v3164_v56 = vpop.f32.mrb[43].mxu0  ;;  %v3207_v43 = vpop.f32.mrb[43].mxu1  ;;  %v5159_v27 = vadd.f32 %v3205_v48, %v6723_v30 }
 0xc35   : > { %v4806_v23 = vmul.f32 -1.442695, %v5094_v14  ;;  %v5096_v12 = vadd.f32 %v3164_v56, %v6709_v41  ;;  %v4808_v21 = vmul.f32 -1.442695, %v5158_v22  ;;  %v5160_v60 = vadd.f32 %v3207_v43, %v6718_v26 }
 0xc36   : > { %5850 = vpow2.f32 %v4804_v53  ;;  %v4805_v4 = vmul.f32 -1.442695, %v5095_v54 }
 0xc37   : > { %5852 = vpow2.f32 %v4806_v23  ;;  %v4807_v6 = vmul.f32 -1.442695, %v5096_v12  ;;  %v4809_v14 = vmul.f32 -1.442695, %v5160_v60 }
 0xc38   : > { %5854 = vpow2.f32 %v4805_v4 }
 0xc39   : > { %5856 = vpow2.f32 %v4807_v6 }
 0xc3a   : > { %5858 = vtanh.f32 %v5157_v8 }
 0xc3b   : > { %5860 = vpow2.f32 %v4808_v21 }
 0xc3c   : > { %5862 = vtanh.f32 %v5159_v27 }
 0xc40   : > { %v5851_v31 = vpop.eup %5850 }
 0xc41   : > { %v5853_v11 = vpop.eup %5852  ;;  %v3224_v32 = vadd.f32 1.0, %v5851_v31 }
 0xc42   : > { %v3236_v33 = vadd.f32 1.0, %v5853_v11  ;;  %v5855_v53 = vpop.eup %5854 }
 0xc43   : > { %5864 = vrcp.f32 %v3224_v32  ;;  %v3225_v24 = vadd.f32 1.0, %v5855_v53  ;;  %v5857_v54 = vpop.eup %5856 }
 0xc44   : > { %5866 = vrcp.f32 %v3236_v33  ;;  %v3237_v29 = vadd.f32 1.0, %v5857_v54  ;;  %v5859_v56 = vpop.eup %5858 }
 0xc45   : > { %5868 = vpow2.f32 %v4809_v14  ;;  %v5861_v43 = vpop.eup %5860 }
 0xc46   : > { %5870 = vrcp.f32 %v3225_v24  ;;  %v5863_v48 = vpop.eup %5862  ;;  %v3250_v21 = vadd.f32 1.0, %v5861_v43 }
 0xc47   : > { %5872 = vrcp.f32 %v3237_v29 }
 0xc48   : > { %5874 = vrcp.f32 %v3250_v21 }
 0xc4d   : > { %v5865_v23 = vpop.eup %5864 }
 0xc4e   : > { %v5867_v12 = vpop.eup %5866  ;;  %v3258_v4 = vmul.f32 %v5865_v23, %v5859_v56 }
 0xc4f   : > { %v5869_v6 = vpop.eup %5868  ;;  %v3256_v22 = vmul.f32 %v5867_v12, %v7306_v55 }
 0xc50   : > { %v5871_v8 = vpop.eup %5870  ;;  %v3251_v11 = vadd.f32 1.0, %v5869_v6 }
 0xc51   : > { %v7356_v60 = vadd.f32 %v3258_v4, %v3256_v22  ;;  %v3259_v27 = vmul.f32 %v5871_v8, %v5863_v48  ;;  %v5873_v31 = vpop.eup %5872 }
 0xc52   : > { %v3257_v32 = vmul.f32 %v5873_v31, %v7310_v2  ;;  %v5875_v33 = vpop.eup %5874 }
 0xc53   : > { %5876 = vtanh.f32 %v7356_v60 }
 0xc54   : > { %v7360_v14 = vadd.f32 %v3259_v27, %v3257_v32  ;;  %5878 = vrcp.f32 %v3251_v11 }
 0xc56   : > { %5880 = vtanh.f32 %v7360_v14 }
 0xc5d   : > { %v5877_v53 = vpop.eup %5876 }
 0xc5e   : > { %v5879_v55 = vpop.eup %5878  ;;  %v3264_v54 = vmul.f32 %v5877_v53, %v5875_v33 }
 0xc60   : > { %v5881_v24 = vpop.eup %5880 }
 0xc61   : > { %v3265_v29 = vmul.f32 %v5881_v24, %v5879_v55 }
 0xc63   : > { %v3275_v56 = vpack.c.bf16 %v3265_v29, %v3264_v54 }
 0xc65   : > { %3309 = vmatmul.mubr.bf16.vlgmr.msra.gmra.mrb[44].mxu0 %v3275_v56  ;;  %3352 = vmatmul.mubr.bf16.vlgmr.msra.gmra.mrb[44].mxu1 %v3275_v56 }
 0xc66   : > { %3429 = vmatpush1.bf16.msra.mxu0 %v7149_v34  ;;  %3472 = vmatpush1.bf16.msra.mxu1 %v7152_v51 }
 0xc67   : > { %3430 = vmatprep.subr.bf16.mxu0 %v7155_v9  ;;  %3473 = vmatprep.subr.bf16.mxu1 %v7158_v13 }
 0xc68   : > { %3460 = vmatprep.mubr.bf16.mxu0 %v6283_v17  ;;  %3503 = vmatprep.mubr.bf16.mxu1 %v6283_v17 }
 0xc6a   : > { %3431 = vmatpush1.bf16.msra.mxu0 %v7163_v15  ;;  %3474 = vmatpush1.bf16.msra.mxu1 %v7166_v18 }
 0xc6b   : > { %3432 = vmatprep.subr.bf16.mxu0 %v7169_v10  ;;  %3475 = vmatprep.subr.bf16.mxu1 %v7172_v16 }
 0xc6e   : > { %3433 = vmatpush1.bf16.msra.mxu0 %v7175_v19  ;;  %3476 = vmatpush1.bf16.msra.mxu1 %v7178_v50 }
 0xc6f   : > { %3434 = vmatprep.subr.bf16.mxu0 %v7181_v58  ;;  %3477 = vmatprep.subr.bf16.mxu1 %v7184_v1 }
 0xc72   : > { %3435 = vmatpush1.bf16.msra.mxu0 %v7241_v52  ;;  %3478 = vmatpush1.bf16.msra.mxu1 %v7244_v57 }
 0xc73   : > { %3436 = vmatprep.subr.bf16.mxu0 %v7247_v59  ;;  %3479 = vmatprep.subr.bf16.mxu1 %v7250_v61 }
 0xc76   : > { %3437 = vmatpush1.bf16.msra.mxu0 %v7253_v28  ;;  %3480 = vmatpush1.bf16.msra.mxu1 %v7256_v49 }
 0xc77   : > { %3438 = vmatprep.subr.bf16.mxu0 %v7259_v63  ;;  %3481 = vmatprep.subr.bf16.mxu1 %v7262_v42 }
 0xc7a   : > { %3439 = vmatpush1.bf16.msra.mxu0 %v7265_v5  ;;  %3482 = vmatpush1.bf16.msra.mxu1 %v7268_v62 }
 0xc7b   : > { %3440 = vmatprep.subr.bf16.mxu0 %v7271_v7  ;;  %3483 = vmatprep.subr.bf16.mxu1 %v7274_v35 }
 0xc7e   : > { %3441 = vmatpush1.bf16.msra.mxu0 %v7277_v25  ;;  %3484 = vmatpush1.bf16.msra.mxu1 %v7280_v39 }
 0xc7f   : > { %3442 = vmatprep.subr.bf16.mxu0 %v7283_v45  ;;  %3485 = vmatprep.subr.bf16.mxu1 %v7286_v46 }
 0xc82   : > { %3443 = vmatpush1.bf16.msra.mxu0 %v7289_v38  ;;  %3486 = vmatpush1.bf16.msra.mxu1 %v7292_v47 }
 0xc83   : > { %3580 = vmatprep.subr.bf16.mxu0 %v7205_v0  ;;  %3623 = vmatprep.subr.bf16.mxu1 %v7208_v20 }
 0xd38   : > { %v3310_v2 = vpop.f32.mrb[44].mxu0  ;;  %v3353_v43 = vpop.f32.mrb[44].mxu1 }
 0xd39   : > { %v5097_v48 = vadd.f32 %v3310_v2, %v6707_v40  ;;  %v3312_v23 = vpop.f32.mrb[45].mxu0  ;;  %v3355_v12 = vpop.f32.mrb[45].mxu1  ;;  %v5161_v24 = vadd.f32 %v3353_v43, %v6723_v30 }
 0xd3a   : > { %v5098_v4 = vadd.f32 %v3312_v23, %v6709_v41  ;;  %v3314_v6 = vpop.f32.mrb[46].mxu0  ;;  %v3357_v22 = vpop.f32.mrb[46].mxu1  ;;  %v5162_v55 = vadd.f32 %v3355_v12, %v6718_v26 }
 0xd3b   : > { %v4810_v8 = vmul.f32 -1.442695, %v5097_v48  ;;  %v5099_v21 = vadd.f32 %v3314_v6, %v6707_v40  ;;  %v3316_v27 = vpop.f32.mrb[47].mxu0  ;;  %v3359_v31 = vpop.f32.mrb[47].mxu1  ;;  %v5163_v56 = vadd.f32 %v3357_v22, %v6723_v30 }
 0xd3c   : > { %v4812_v11 = vmul.f32 -1.442695, %v5098_v4  ;;  %v5100_v32 = vadd.f32 %v3316_v27, %v6709_v41  ;;  %v4814_v54 = vmul.f32 -1.442695, %v5162_v55  ;;  %v5164_v29 = vadd.f32 %v3359_v31, %v6718_v26 }
 0xd3d   : > { %5882 = vpow2.f32 %v4810_v8  ;;  %v4811_v33 = vmul.f32 -1.442695, %v5099_v21 }
 0xd3e   : > { %5884 = vpow2.f32 %v4812_v11  ;;  %v4813_v53 = vmul.f32 -1.442695, %v5100_v32  ;;  %v4815_v4 = vmul.f32 -1.442695, %v5164_v29 }
 0xd3f   : > { %5886 = vpow2.f32 %v4811_v33 }
 0xd40   : > { %5888 = vpow2.f32 %v4813_v53 }
 0xd41   : > { %5890 = vtanh.f32 %v5161_v24 }
 0xd42   : > { %5892 = vpow2.f32 %v4814_v54 }
 0xd43   : > { %5894 = vtanh.f32 %v5163_v56 }
 0xd47   : > { %v5883_v2 = vpop.eup %5882 }
 0xd48   : > { %v5885_v48 = vpop.eup %5884  ;;  %v3376_v23 = vadd.f32 1.0, %v5883_v2 }
 0xd49   : > { %v3388_v6 = vadd.f32 1.0, %v5885_v48  ;;  %v5887_v8 = vpop.eup %5886 }
 0xd4a   : > { %5896 = vrcp.f32 %v3376_v23  ;;  %v3377_v12 = vadd.f32 1.0, %v5887_v8  ;;  %v5889_v21 = vpop.eup %5888 }
 0xd4b   : > { %5898 = vrcp.f32 %v3388_v6  ;;  %v3389_v43 = vadd.f32 1.0, %v5889_v21  ;;  %v5891_v27 = vpop.eup %5890 }
 0xd4c   : > { %5900 = vpow2.f32 %v4815_v4  ;;  %v5893_v31 = vpop.eup %5892 }
 0xd4d   : > { %5902 = vrcp.f32 %v3377_v12  ;;  %v5895_v22 = vpop.eup %5894  ;;  %v3402_v54 = vadd.f32 1.0, %v5893_v31 }
 0xd4e   : > { %5904 = vrcp.f32 %v3389_v43 }
 0xd4f   : > { %5906 = vrcp.f32 %v3402_v54 }
 0xd54   : > { %v5897_v11 = vpop.eup %5896 }
 0xd55   : > { %v5899_v32 = vpop.eup %5898  ;;  %v3410_v33 = vmul.f32 %v5897_v11, %v5891_v27 }
 0xd56   : > { %v5901_v53 = vpop.eup %5900  ;;  %v3408_v55 = vmul.f32 %v5899_v32, %v7356_v60 }
 0xd57   : > { %v5903_v24 = vpop.eup %5902  ;;  %v3403_v48 = vadd.f32 1.0, %v5901_v53 }
 0xd58   : > { %v7406_v29 = vadd.f32 %v3410_v33, %v3408_v55  ;;  %v3411_v56 = vmul.f32 %v5903_v24, %v5895_v22  ;;  %v5905_v2 = vpop.eup %5904 }
 0xd59   : > { %v3409_v23 = vmul.f32 %v5905_v2, %v7360_v14  ;;  %v5907_v6 = vpop.eup %5906 }
 0xd5a   : > { %5908 = vtanh.f32 %v7406_v29 }
 0xd5b   : > { %v7410_v4 = vadd.f32 %v3411_v56, %v3409_v23  ;;  %5910 = vrcp.f32 %v3403_v48 }
 0xd5d   : > { %5912 = vtanh.f32 %v7410_v4 }
 0xd64   : > { %v5909_v8 = vpop.eup %5908 }
 0xd65   : > { %v5911_v60 = vpop.eup %5910  ;;  %v3416_v21 = vmul.f32 %v5909_v8, %v5907_v6 }
 0xd67   : > { %v5913_v12 = vpop.eup %5912 }
 0xd68   : > { %v3417_v43 = vmul.f32 %v5913_v12, %v5911_v60 }
 0xd6a   : > { %v3427_v27 = vpack.c.bf16 %v3417_v43, %v3416_v21 }
 0xd6c   : > { %3461 = vmatmul.mubr.bf16.vlgmr.msra.gmra.mrb[48].mxu0 %v3427_v27  ;;  %3504 = vmatmul.mubr.bf16.vlgmr.msra.gmra.mrb[48].mxu1 %v3427_v27 }
 0xd6d   : > { %3581 = vmatpush1.bf16.msra.mxu0 %v7149_v34  ;;  %3624 = vmatpush1.bf16.msra.mxu1 %v7152_v51 }
 0xd6e   : > { %3582 = vmatprep.subr.bf16.mxu0 %v7155_v9  ;;  %3625 = vmatprep.subr.bf16.mxu1 %v7158_v13 }
 0xd6f   : > { %3612 = vmatprep.mubr.bf16.mxu0 %v6283_v17  ;;  %3655 = vmatprep.mubr.bf16.mxu1 %v6283_v17 }
 0xd71   : > { %3583 = vmatpush1.bf16.msra.mxu0 %v7163_v15  ;;  %3626 = vmatpush1.bf16.msra.mxu1 %v7166_v18 }
 0xd72   : > { %3584 = vmatprep.subr.bf16.mxu0 %v7169_v10  ;;  %3627 = vmatprep.subr.bf16.mxu1 %v7172_v16 }
 0xd75   : > { %3585 = vmatpush1.bf16.msra.mxu0 %v7175_v19  ;;  %3628 = vmatpush1.bf16.msra.mxu1 %v7178_v50 }
 0xd76   : > { %3586 = vmatprep.subr.bf16.mxu0 %v7181_v58  ;;  %3629 = vmatprep.subr.bf16.mxu1 %v7184_v1 }
 0xd79   : > { %3587 = vmatpush1.bf16.msra.mxu0 %v7241_v52  ;;  %3630 = vmatpush1.bf16.msra.mxu1 %v7244_v57 }
 0xd7a   : > { %3588 = vmatprep.subr.bf16.mxu0 %v7247_v59  ;;  %3631 = vmatprep.subr.bf16.mxu1 %v7250_v61 }
 0xd7d   : > { %3589 = vmatpush1.bf16.msra.mxu0 %v7253_v28  ;;  %3632 = vmatpush1.bf16.msra.mxu1 %v7256_v49 }
 0xd7e   : > { %3590 = vmatprep.subr.bf16.mxu0 %v7259_v63  ;;  %3633 = vmatprep.subr.bf16.mxu1 %v7262_v42 }
 0xd81   : > { %3591 = vmatpush1.bf16.msra.mxu0 %v7265_v5  ;;  %3634 = vmatpush1.bf16.msra.mxu1 %v7268_v62 }
 0xd82   : > { %3592 = vmatprep.subr.bf16.mxu0 %v7271_v7  ;;  %3635 = vmatprep.subr.bf16.mxu1 %v7274_v35 }
 0xd85   : > { %3593 = vmatpush1.bf16.msra.mxu0 %v7277_v25  ;;  %3636 = vmatpush1.bf16.msra.mxu1 %v7280_v39 }
 0xd86   : > { %3594 = vmatprep.subr.bf16.mxu0 %v7283_v45  ;;  %3637 = vmatprep.subr.bf16.mxu1 %v7286_v46 }
 0xd89   : > { %3595 = vmatpush1.bf16.msra.mxu0 %v7289_v38  ;;  %3638 = vmatpush1.bf16.msra.mxu1 %v7292_v47 }
 0xd8a   : > { %3732 = vmatprep.subr.bf16.mxu0 %v7205_v0  ;;  %3775 = vmatprep.subr.bf16.mxu1 %v7208_v20 }
 0xe3f   : > { %v3462_v34 = vpop.f32.mrb[48].mxu0  ;;  %v3505_v51 = vpop.f32.mrb[48].mxu1 }
 0xe40   : > { %v5101_v9 = vadd.f32 %v3462_v34, %v6707_v40  ;;  %v3464_v13 = vpop.f32.mrb[49].mxu0  ;;  %v3507_v15 = vpop.f32.mrb[49].mxu1  ;;  %v5165_v11 = vadd.f32 %v3505_v51, %v6723_v30 }
 0xe41   : > { %v5102_v18 = vadd.f32 %v3464_v13, %v6709_v41  ;;  %v3466_v10 = vpop.f32.mrb[50].mxu0  ;;  %v3509_v16 = vpop.f32.mrb[50].mxu1  ;;  %v5166_v22 = vadd.f32 %v3507_v15, %v6718_v26 }
 0xe42   : > { %v4816_v19 = vmul.f32 -1.442695, %v5101_v9  ;;  %v5103_v50 = vadd.f32 %v3466_v10, %v6707_v40  ;;  %v3468_v58 = vpop.f32.mrb[51].mxu0  ;;  %v3511_v1 = vpop.f32.mrb[51].mxu1  ;;  %v5167_v53 = vadd.f32 %v3509_v16, %v6723_v30 }
 0xe43   : > { %v4818_v14 = vmul.f32 -1.442695, %v5102_v18  ;;  %v5104_v0 = vadd.f32 %v3468_v58, %v6709_v41  ;;  %v4820_v32 = vmul.f32 -1.442695, %v5166_v22  ;;  %v5168_v33 = vadd.f32 %v3511_v1, %v6718_v26 }
 0xe44   : > { %5914 = vpow2.f32 %v4816_v19  ;;  %v4817_v20 = vmul.f32 -1.442695, %v5103_v50 }
 0xe45   : > { %5916 = vpow2.f32 %v4818_v14  ;;  %v4819_v31 = vmul.f32 -1.442695, %v5104_v0  ;;  %v4821_v56 = vmul.f32 -1.442695, %v5168_v33  ;;  %v7472_v33 = vld [vmem:[#allocation7 + $0x2c] ss:$16 sps:$4 sm:$0xff]  }
 0xe46   : > { %5918 = vpow2.f32 %v4817_v20 }
 0xe47   : > { %5920 = vpow2.f32 %v4819_v31 }
 0xe48   : > { %5922 = vtanh.f32 %v5165_v11  ;;  %v7463_v11 = vld [vmem:[#allocation7] ss:$16 sps:$4 sm:$0xff]  }
 0xe49   : > { %5924 = vpow2.f32 %v4820_v32  ;;  %v7469_v32 = vld [vmem:[#allocation7 + $0x24] ss:$16 sps:$4 sm:$0xff]  }
 0xe4a   : > { %5926 = vtanh.f32 %v5167_v53  ;;  %v7477_v53 = vld [vmem:[#allocation7 + $0x20] ss:$16 sps:$4 sm:$0xff]  }
 0xe4e   : > { %v5915_v55 = vpop.eup %5914 }
 0xe4f   : > { %v5917_v24 = vpop.eup %5916  ;;  %v3528_v54 = vadd.f32 1.0, %v5915_v55  ;;  %v7480_v55 = vld [vmem:[#allocation7 + $0x28] ss:$16 sps:$4 sm:$0xff]  }
 0xe50   : > { %v3540_v2 = vadd.f32 1.0, %v5917_v24  ;;  %v5919_v48 = vpop.eup %5918  ;;  %v7483_v24 = vld [vmem:[#allocation7 + $0x44] ss:$16 sps:$4 sm:$0xff]  }
 0xe51   : > { %5928 = vrcp.f32 %v3528_v54  ;;  %v3529_v23 = vadd.f32 1.0, %v5919_v48  ;;  %v5921_v6 = vpop.eup %5920  ;;  %v7486_v54 = vld [vmem:[#allocation7 + $0x4c] ss:$16 sps:$4 sm:$0xff]   ;;  %v7495_v48 = vld [vmem:[#allocation7 + $0x64] ss:$16 sps:$4 sm:$0xff]  }
 0xe52   : > { %5930 = vrcp.f32 %v3540_v2  ;;  %v3541_v8 = vadd.f32 1.0, %v5921_v6  ;;  %v5923_v60 = vpop.eup %5922  ;;  %v7492_v2 = vld [vmem:[#allocation7 + $0x48] ss:$16 sps:$4 sm:$0xff]  }
 0xe53   : > { %5932 = vpow2.f32 %v4821_v56  ;;  %v5925_v12 = vpop.eup %5924  ;;  %v7489_v56 = vld [vmem:[#allocation7 + $0x40] ss:$16 sps:$4 sm:$0xff]  }
 0xe54   : > { %5934 = vrcp.f32 %v3529_v23  ;;  %v5927_v21 = vpop.eup %5926  ;;  %v3554_v15 = vadd.f32 1.0, %v5925_v12  ;;  %v7498_v23 = vld [vmem:[#allocation7 + $0x6c] ss:$16 sps:$4 sm:$0xff]  }
 0xe55   : > { %5936 = vrcp.f32 %v3541_v8 }
 0xe56   : > { %5938 = vrcp.f32 %v3554_v15 }
 0xe5b   : > { %v5929_v43 = vpop.eup %5928 }
 0xe5c   : > { %v5931_v27 = vpop.eup %5930  ;;  %v3562_v34 = vmul.f32 %v5929_v43, %v5923_v60 }
 0xe5d   : > { %v5933_v51 = vpop.eup %5932  ;;  %v3560_v9 = vmul.f32 %v5931_v27, %v7406_v29 }
 0xe5e   : > { %v5935_v13 = vpop.eup %5934  ;;  %v3555_v19 = vadd.f32 1.0, %v5933_v51 }
 0xe5f   : > { %v7456_v18 = vadd.f32 %v3562_v34, %v3560_v9  ;;  %v3563_v10 = vmul.f32 %v5935_v13, %v5927_v21  ;;  %v5937_v16 = vpop.eup %5936 }
 0xe60   : > { %v3561_v50 = vmul.f32 %v5937_v16, %v7410_v4  ;;  %v5939_v1 = vpop.eup %5938  ;;  %v7466_v4 = vld [vmem:[#allocation7 + $0x8] ss:$16 sps:$4 sm:$0xff]  }
 0xe61   : > { %5940 = vtanh.f32 %v7456_v18 }
 0xe62   : > { %v7460_v58 = vadd.f32 %v3563_v10, %v3561_v50  ;;  %5942 = vrcp.f32 %v3555_v19 }
 0xe64   : > { %5944 = vtanh.f32 %v7460_v58 }
 0xe6b   : > { %v5941_v14 = vpop.eup %5940 }
 0xe6c   : > { %v5943_v29 = vpop.eup %5942  ;;  %v3568_v20 = vmul.f32 %v5941_v14, %v5939_v1 }
 0xe6e   : > { %v5945_v0 = vpop.eup %5944 }
 0xe6f   : > { %v3569_v31 = vmul.f32 %v5945_v0, %v5943_v29 }
 0xe71   : > { %v3579_v22 = vpack.c.bf16 %v3569_v31, %v3568_v20 }
 0xe73   : > { %3613 = vmatmul.mubr.bf16.vlgmr.msra.gmra.mrb[52].mxu0 %v3579_v22  ;;  %3656 = vmatmul.mubr.bf16.vlgmr.msra.gmra.mrb[52].mxu1 %v3579_v22 }
 0xe74   : > { %3733 = vmatpush1.bf16.msra.mxu0 %v7463_v11  ;;  %3776 = vmatpush1.bf16.msra.mxu1 %v7466_v4 }
 0xe75   : > { %3734 = vmatprep.subr.bf16.mxu0 %v7469_v32  ;;  %3777 = vmatprep.subr.bf16.mxu1 %v7472_v33 }
 0xe76   : > { %3764 = vmatprep.mubr.bf16.mxu0 %v6283_v17  ;;  %3807 = vmatprep.mubr.bf16.mxu1 %v6283_v17 }
 0xe78   : > { %3735 = vmatpush1.bf16.msra.mxu0 %v7477_v53  ;;  %3778 = vmatpush1.bf16.msra.mxu1 %v7480_v55 }
 0xe79   : > { %3736 = vmatprep.subr.bf16.mxu0 %v7483_v24  ;;  %3779 = vmatprep.subr.bf16.mxu1 %v7486_v54 }
 0xe7c   : > { %3737 = vmatpush1.bf16.msra.mxu0 %v7489_v56  ;;  %3780 = vmatpush1.bf16.msra.mxu1 %v7492_v2 }
 0xe7d   : > { %3738 = vmatprep.subr.bf16.mxu0 %v7495_v48  ;;  %3781 = vmatprep.subr.bf16.mxu1 %v7498_v23 }
 0xe80   : > { %3739 = vmatpush1.bf16.msra.mxu0 %v7241_v52  ;;  %3782 = vmatpush1.bf16.msra.mxu1 %v7244_v57  ;;  %v6142_v52 = vld [vmem:[#allocation7 + $0x4] ss:$16 sps:$4 sm:$0xff]   ;;  %v6143_v57 = vld [vmem:[#allocation7 + $0xc] ss:$16 sps:$4 sm:$0xff]  }
 0xe81   : > { %3740 = vmatprep.subr.bf16.mxu0 %v7247_v59  ;;  %3783 = vmatprep.subr.bf16.mxu1 %v7250_v61 }
 0xe84   : > { %3741 = vmatpush1.bf16.msra.mxu0 %v7253_v28  ;;  %3784 = vmatpush1.bf16.msra.mxu1 %v7256_v49 }
 0xe85   : > { %3742 = vmatprep.subr.bf16.mxu0 %v7259_v63  ;;  %3785 = vmatprep.subr.bf16.mxu1 %v7262_v42 }
 0xe88   : > { %3743 = vmatpush1.bf16.msra.mxu0 %v7265_v5  ;;  %3786 = vmatpush1.bf16.msra.mxu1 %v7268_v62 }
 0xe89   : > { %3744 = vmatprep.subr.bf16.mxu0 %v7271_v7  ;;  %3787 = vmatprep.subr.bf16.mxu1 %v7274_v35 }
 0xe8c   : > { %3745 = vmatpush1.bf16.msra.mxu0 %v7277_v25  ;;  %3788 = vmatpush1.bf16.msra.mxu1 %v7280_v39 }
 0xe8d   : > { %3746 = vmatprep.subr.bf16.mxu0 %v7283_v45  ;;  %3789 = vmatprep.subr.bf16.mxu1 %v7286_v46 }
 0xe90   : > { %3747 = vmatpush1.bf16.msra.mxu0 %v7289_v38  ;;  %3790 = vmatpush1.bf16.msra.mxu1 %v7292_v47 }
 0xe91   : > { %3884 = vmatprep.subr.bf16.mxu0 %v6142_v52  ;;  %3927 = vmatprep.subr.bf16.mxu1 %v6143_v57 }
 0xf46   : > { %v3614_v59 = vpop.f32.mrb[52].mxu0  ;;  %v3657_v61 = vpop.f32.mrb[52].mxu1 }
 0xf47   : > { %v5105_v28 = vadd.f32 %v3614_v59, %v6707_v40  ;;  %v3616_v49 = vpop.f32.mrb[53].mxu0  ;;  %v3659_v63 = vpop.f32.mrb[53].mxu1  ;;  %v5169_v8 = vadd.f32 %v3657_v61, %v6723_v30 }
 0xf48   : > { %v5106_v42 = vadd.f32 %v3616_v49, %v6709_v41  ;;  %v3618_v5 = vpop.f32.mrb[54].mxu0  ;;  %v3661_v62 = vpop.f32.mrb[54].mxu1  ;;  %v5170_v6 = vadd.f32 %v3659_v63, %v6718_v26 }
 0xf49   : > { %v4822_v7 = vmul.f32 -1.442695, %v5105_v28  ;;  %v5107_v35 = vadd.f32 %v3618_v5, %v6707_v40  ;;  %v3620_v25 = vpop.f32.mrb[55].mxu0  ;;  %v3663_v39 = vpop.f32.mrb[55].mxu1  ;;  %v5171_v21 = vadd.f32 %v3661_v62, %v6723_v30 }
 0xf4a   : > { %v4824_v45 = vmul.f32 -1.442695, %v5106_v42  ;;  %v5108_v46 = vadd.f32 %v3620_v25, %v6709_v41  ;;  %v4826_v60 = vmul.f32 -1.442695, %v5170_v6  ;;  %v5172_v12 = vadd.f32 %v3663_v39, %v6718_v26  ;;  %v6157_v39 = vld [vmem:[#allocation7 + $0xc8] ss:$16 sps:$4 sm:$0xff]  }
 0xf4b   : > { %5946 = vpow2.f32 %v4822_v7  ;;  %v4823_v38 = vmul.f32 -1.442695, %v5107_v35  ;;  %v5483_v6 = vld [vmem:[#allocation9 + $0x4] ss:$16 sps:$4 sm:$0xff]  }
 0xf4c   : > { %5948 = vpow2.f32 %v4824_v45  ;;  %v4825_v47 = vmul.f32 -1.442695, %v5108_v46  ;;  %v4827_v51 = vmul.f32 -1.442695, %v5172_v12  ;;  %v6158_v45 = vld [vmem:[#allocation7 + $0xe4] ss:$16 sps:$4 sm:$0xff]  }
 0xf4d   : > { %5950 = vpow2.f32 %v4823_v38  ;;  %v6159_v46 = vld [vmem:[#allocation7 + $0xec] ss:$16 sps:$4 sm:$0xff]   ;;  %v6160_v38 = vld [vmem:[#allocation7 + $0xe0] ss:$16 sps:$4 sm:$0xff]  }
 0xf4e   : > { %5952 = vpow2.f32 %v4825_v47  ;;  %v6161_v47 = vld [vmem:[#allocation7 + $0xe8] ss:$16 sps:$4 sm:$0xff]  }
 0xf4f   : > { %5954 = vtanh.f32 %v5169_v8  ;;  %v5492_v8 = vld [vmem:[#allocation9 + $0xc] ss:$16 sps:$4 sm:$0xff]  }
 0xf50   : > { %5956 = vpow2.f32 %v4826_v60 }
 0xf51   : > { %5958 = vtanh.f32 %v5171_v21 }
 0xf55   : > { %v5947_v43 = vpop.eup %5946 }
 0xf56   : > { %v5949_v27 = vpop.eup %5948  ;;  %v3680_v34 = vadd.f32 1.0, %v5947_v43 }
 0xf57   : > { %v3692_v9 = vadd.f32 1.0, %v5949_v27  ;;  %v5951_v13 = vpop.eup %5950 }
 0xf58   : > { %5960 = vrcp.f32 %v3680_v34  ;;  %v3681_v15 = vadd.f32 1.0, %v5951_v13  ;;  %v5953_v10 = vpop.eup %5952 }
 0xf59   : > { %5962 = vrcp.f32 %v3692_v9  ;;  %v3693_v16 = vadd.f32 1.0, %v5953_v10  ;;  %v5955_v19 = vpop.eup %5954 }
 0xf5a   : > { %5964 = vpow2.f32 %v4827_v51  ;;  %v5957_v50 = vpop.eup %5956 }
 0xf5b   : > { %5966 = vrcp.f32 %v3681_v15  ;;  %v5959_v1 = vpop.eup %5958  ;;  %v3706_v52 = vadd.f32 1.0, %v5957_v50 }
 0xf5c   : > { %5968 = vrcp.f32 %v3693_v16 }
 0xf5d   : > { %5970 = vrcp.f32 %v3706_v52 }
 0xf62   : > { %v5961_v14 = vpop.eup %5960 }
 0xf63   : > { %v5963_v29 = vpop.eup %5962  ;;  %v3714_v0 = vmul.f32 %v5961_v14, %v5955_v19 }
 0xf64   : > { %v5965_v20 = vpop.eup %5964  ;;  %v3712_v31 = vmul.f32 %v5963_v29, %v7456_v18 }
 0xf65   : > { %v5967_v22 = vpop.eup %5966  ;;  %v3707_v28 = vadd.f32 1.0, %v5965_v20 }
 0xf66   : > { %v7528_v57 = vadd.f32 %v3714_v0, %v3712_v31  ;;  %v3715_v59 = vmul.f32 %v5967_v22, %v5959_v1  ;;  %v5969_v61 = vpop.eup %5968 }
 0xf67   : > { %v3713_v49 = vmul.f32 %v5969_v61, %v7460_v58  ;;  %v5971_v42 = vpop.eup %5970  ;;  %v6144_v58 = vld [vmem:[#allocation7 + $0x60] ss:$16 sps:$4 sm:$0xff]  }
 0xf68   : > { %5972 = vtanh.f32 %v7528_v57 }
 0xf69   : > { %v7532_v63 = vadd.f32 %v3715_v59, %v3713_v49  ;;  %5974 = vrcp.f32 %v3707_v28 }
 0xf6b   : > { %5976 = vtanh.f32 %v7532_v63 }
 0xf72   : > { %v5973_v5 = vpop.eup %5972 }
 0xf73   : > { %v5975_v18 = vpop.eup %5974  ;;  %v3720_v7 = vmul.f32 %v5973_v5, %v5971_v42 }
 0xf75   : > { %v5977_v62 = vpop.eup %5976 }
 0xf76   : > { %v3721_v35 = vmul.f32 %v5977_v62, %v5975_v18 }
 0xf78   : > { %v3731_v25 = vpack.c.bf16 %v3721_v35, %v3720_v7 }
 0xf7a   : > { %3765 = vmatmul.mubr.bf16.vlgmr.msra.gmra.mrb[56].mxu0 %v3731_v25  ;;  %3808 = vmatmul.mubr.bf16.vlgmr.msra.gmra.mrb[56].mxu1 %v3731_v25 }
 0xf7b   : > { %3885 = vmatpush1.bf16.msra.mxu0 %v7463_v11  ;;  %3928 = vmatpush1.bf16.msra.mxu1 %v7466_v4  ;;  %v6145_v11 = vld [vmem:[#allocation7 + $0x68] ss:$16 sps:$4 sm:$0xff]   ;;  %v6146_v4 = vld [vmem:[#allocation7 + $0x84] ss:$16 sps:$4 sm:$0xff]  }
 0xf7c   : > { %3886 = vmatprep.subr.bf16.mxu0 %v7469_v32  ;;  %3929 = vmatprep.subr.bf16.mxu1 %v7472_v33  ;;  %v6147_v32 = vld [vmem:[#allocation7 + $0x8c] ss:$16 sps:$4 sm:$0xff]   ;;  %v6148_v33 = vld [vmem:[#allocation7 + $0x80] ss:$16 sps:$4 sm:$0xff]  }
 0xf7d   : > { %3916 = vmatprep.mubr.bf16.mxu0 %v6283_v17  ;;  %3959 = vmatprep.mubr.bf16.mxu1 %v6283_v17 }
 0xf7f   : > { %3887 = vmatpush1.bf16.msra.mxu0 %v7477_v53  ;;  %3930 = vmatpush1.bf16.msra.mxu1 %v7480_v55  ;;  %v6149_v53 = vld [vmem:[#allocation7 + $0x88] ss:$16 sps:$4 sm:$0xff]   ;;  %v6150_v55 = vld [vmem:[#allocation7 + $0xa4] ss:$16 sps:$4 sm:$0xff]  }
 0xf80   : > { %3888 = vmatprep.subr.bf16.mxu0 %v7483_v24  ;;  %3931 = vmatprep.subr.bf16.mxu1 %v7486_v54  ;;  %v6151_v24 = vld [vmem:[#allocation7 + $0xac] ss:$16 sps:$4 sm:$0xff]   ;;  %v6152_v54 = vld [vmem:[#allocation7 + $0xa0] ss:$16 sps:$4 sm:$0xff]  }
 0xf83   : > { %3889 = vmatpush1.bf16.msra.mxu0 %v7489_v56  ;;  %3932 = vmatpush1.bf16.msra.mxu1 %v7492_v2  ;;  %v6153_v56 = vld [vmem:[#allocation7 + $0xa8] ss:$16 sps:$4 sm:$0xff]   ;;  %v6154_v2 = vld [vmem:[#allocation7 + $0xc4] ss:$16 sps:$4 sm:$0xff]  }
 0xf84   : > { %3890 = vmatprep.subr.bf16.mxu0 %v7495_v48  ;;  %3933 = vmatprep.subr.bf16.mxu1 %v7498_v23  ;;  %v6155_v48 = vld [vmem:[#allocation7 + $0xcc] ss:$16 sps:$4 sm:$0xff]   ;;  %v6156_v23 = vld [vmem:[#allocation7 + $0xc0] ss:$16 sps:$4 sm:$0xff]  }
 0xf87   : > { %3891 = vmatpush1.bf16.msra.mxu0 %v6144_v58  ;;  %3934 = vmatpush1.bf16.msra.mxu1 %v6145_v11 }
 0xf88   : > { %3892 = vmatprep.subr.bf16.mxu0 %v6146_v4  ;;  %3935 = vmatprep.subr.bf16.mxu1 %v6147_v32 }
 0xf8b   : > { %3893 = vmatpush1.bf16.msra.mxu0 %v6148_v33  ;;  %3936 = vmatpush1.bf16.msra.mxu1 %v6149_v53 }
 0xf8c   : > { %3894 = vmatprep.subr.bf16.mxu0 %v6150_v55  ;;  %3937 = vmatprep.subr.bf16.mxu1 %v6151_v24 }
 0xf8f   : > { %3895 = vmatpush1.bf16.msra.mxu0 %v6152_v54  ;;  %3938 = vmatpush1.bf16.msra.mxu1 %v6153_v56 }
 0xf90   : > { %3896 = vmatprep.subr.bf16.mxu0 %v6154_v2  ;;  %3939 = vmatprep.subr.bf16.mxu1 %v6155_v48 }
 0xf93   : > { %3897 = vmatpush1.bf16.msra.mxu0 %v6156_v23  ;;  %3940 = vmatpush1.bf16.msra.mxu1 %v6157_v39 }
 0xf94   : > { %3898 = vmatprep.subr.bf16.mxu0 %v6158_v45  ;;  %3941 = vmatprep.subr.bf16.mxu1 %v6159_v46 }
 0xf97   : > { %3899 = vmatpush1.bf16.msra.mxu0 %v6160_v38  ;;  %3942 = vmatpush1.bf16.msra.mxu1 %v6161_v47 }
 0xf98   : > { %4244 = vmatprep.subr.bf16.mxu0 %v5483_v6  ;;  %4285 = vmatprep.subr.bf16.mxu1 %v5492_v8  ;;  %v5481_v6 = vld [vmem:[#allocation9] ss:$16 sps:$4 sm:$0xff]   ;;  %v5490_v8 = vld [vmem:[#allocation9 + $0x8] ss:$16 sps:$4 sm:$0xff]  }
0x104d   : > { %v3766_v60 = vpop.f32.mrb[56].mxu0  ;;  %v3809_v12 = vpop.f32.mrb[56].mxu1 }
0x104e   : > { %v5109_v21 = vadd.f32 %v3766_v60, %v6707_v40  ;;  %v3768_v43 = vpop.f32.mrb[57].mxu0  ;;  %v3811_v27 = vpop.f32.mrb[57].mxu1  ;;  %v5173_v0 = vadd.f32 %v3809_v12, %v6723_v30  ;;  %v5486_v12 = vld [vmem:[#allocation9 + $0x24] ss:$16 sps:$4 sm:$0xff]  }
0x104f   : > { %v5110_v34 = vadd.f32 %v3768_v43, %v6709_v41  ;;  %v3770_v51 = vpop.f32.mrb[58].mxu0  ;;  %v3813_v9 = vpop.f32.mrb[58].mxu1  ;;  %v5174_v29 = vadd.f32 %v3811_v27, %v6718_v26  ;;  %v5496_v43 = vld [vmem:[#allocation9 + $0x28] ss:$16 sps:$4 sm:$0xff]   ;;  %v5489_v27 = vld [vmem:[#allocation9 + $0x44] ss:$16 sps:$4 sm:$0xff]  }
0x1050   : > { %v4828_v13 = vmul.f32 -1.442695, %v5109_v21  ;;  %v5111_v15 = vadd.f32 %v3770_v51, %v6707_v40  ;;  %v3772_v10 = vpop.f32.mrb[59].mxu0  ;;  %v3815_v16 = vpop.f32.mrb[59].mxu1  ;;  %v5175_v22 = vadd.f32 %v3813_v9, %v6723_v30  ;;  %v5498_v21 = vld [vmem:[#allocation9 + $0x2c] ss:$16 sps:$4 sm:$0xff]  }
0x1051   : > { %v4830_v19 = vmul.f32 -1.442695, %v5110_v34  ;;  %v5112_v50 = vadd.f32 %v3772_v10, %v6709_v41  ;;  %v4832_v20 = vmul.f32 -1.442695, %v5174_v29  ;;  %v5176_v31 = vadd.f32 %v3815_v16, %v6718_v26  ;;  %v5504_v34 = vld [vmem:[#allocation9 + $0x4c] ss:$16 sps:$4 sm:$0xff]  }
0x1052   : > { %5978 = vpow2.f32 %v4828_v13  ;;  %v4829_v1 = vmul.f32 -1.442695, %v5111_v15  ;;  %v5487_v51 = vld [vmem:[#allocation9 + $0x40] ss:$16 sps:$4 sm:$0xff]   ;;  %v5502_v9 = vld [vmem:[#allocation9 + $0x48] ss:$16 sps:$4 sm:$0xff]  }
0x1053   : > { %5980 = vpow2.f32 %v4830_v19  ;;  %v4831_v14 = vmul.f32 -1.442695, %v5112_v50  ;;  %v4833_v28 = vmul.f32 -1.442695, %v5176_v31  ;;  %v5495_v13 = vld [vmem:[#allocation9 + $0x64] ss:$16 sps:$4 sm:$0xff]  }
0x1054   : > { %5982 = vpow2.f32 %v4829_v1  ;;  %v5510_v15 = vld [vmem:[#allocation9 + $0x6c] ss:$16 sps:$4 sm:$0xff]   ;;  %v5493_v10 = vld [vmem:[#allocation9 + $0x60] ss:$16 sps:$4 sm:$0xff]   ;;  %v5508_v16 = vld [vmem:[#allocation9 + $0x68] ss:$16 sps:$4 sm:$0xff]  }
0x1055   : > { %5984 = vpow2.f32 %v4831_v14  ;;  %v5501_v19 = vld [vmem:[#allocation9 + $0x84] ss:$16 sps:$4 sm:$0xff]   ;;  %v5516_v50 = vld [vmem:[#allocation9 + $0x8c] ss:$16 sps:$4 sm:$0xff]   ;;  %v5499_v1 = vld [vmem:[#allocation9 + $0x80] ss:$16 sps:$4 sm:$0xff]  }
0x1056   : > { %5986 = vtanh.f32 %v5173_v0  ;;  %v5507_v14 = vld [vmem:[#allocation9 + $0xa4] ss:$16 sps:$4 sm:$0xff]   ;;  %v5522_v29 = vld [vmem:[#allocation9 + $0xac] ss:$16 sps:$4 sm:$0xff]   ;;  %v5505_v0 = vld [vmem:[#allocation9 + $0xa0] ss:$16 sps:$4 sm:$0xff]  }
0x1057   : > { %5988 = vpow2.f32 %v4832_v20  ;;  %v5520_v20 = vld [vmem:[#allocation9 + $0xa8] ss:$16 sps:$4 sm:$0xff]   ;;  %v5513_v31 = vld [vmem:[#allocation9 + $0xc4] ss:$16 sps:$4 sm:$0xff]  }
0x1058   : > { %5990 = vtanh.f32 %v5175_v22  ;;  %v5526_v22 = vld [vmem:[#allocation9 + $0xcc] ss:$16 sps:$4 sm:$0xff]  }
0x105c   : > { %v5979_v52 = vpop.eup %5978 }
0x105d   : > { %v5981_v59 = vpop.eup %5980  ;;  %v3832_v61 = vadd.f32 1.0, %v5979_v52  ;;  %v5511_v52 = vld [vmem:[#allocation9 + $0xc0] ss:$16 sps:$4 sm:$0xff]  }
0x105e   : > { %v3844_v49 = vadd.f32 1.0, %v5981_v59  ;;  %v5983_v42 = vpop.eup %5982  ;;  %v5524_v59 = vld [vmem:[#allocation9 + $0xc8] ss:$16 sps:$4 sm:$0xff]  }
0x105f   : > { %5992 = vrcp.f32 %v3832_v61  ;;  %v3833_v5 = vadd.f32 1.0, %v5983_v42  ;;  %v5985_v18 = vpop.eup %5984  ;;  %v5519_v61 = vld [vmem:[#allocation9 + $0xe4] ss:$16 sps:$4 sm:$0xff]   ;;  %v5527_v42 = vld [vmem:[#allocation9 + $0xe8] ss:$16 sps:$4 sm:$0xff]  }
0x1060   : > { %5994 = vrcp.f32 %v3844_v49  ;;  %v3845_v62 = vadd.f32 1.0, %v5985_v18  ;;  %v5987_v7 = vpop.eup %5986  ;;  %v5517_v49 = vld [vmem:[#allocation9 + $0xe0] ss:$16 sps:$4 sm:$0xff]  }
0x1061   : > { %5996 = vpow2.f32 %v4833_v28  ;;  %v5989_v35 = vpop.eup %5988  ;;  %v5529_v28 = vld [vmem:[#allocation9 + $0xec] ss:$16 sps:$4 sm:$0xff]  }
0x1062   : > { %5998 = vrcp.f32 %v3833_v5  ;;  %v5991_v25 = vpop.eup %5990  ;;  %v3858_v55 = vadd.f32 1.0, %v5989_v35  ;;  %v5523_v5 = vld [vmem:[%s6504_s29 + $0x78] sm:$0xff]   ;;  %v4362_v35 = vld [vmem:[%s7704_s6 + $0x10] sm:$0xff] }
0x1063   : > { %6000 = vrcp.f32 %v3845_v62  ;;  %v4360_v18 = vld [vmem:[%s7704_s6] sm:$0xff]  ;;  %v4361_v62 = vld [vmem:[%s7704_s6 + $0x8] sm:$0xff] }
0x1064   : > { %6002 = vrcp.f32 %v3858_v55 }
0x1069   : > { %v5993_v58 = vpop.eup %5992 }
0x106a   : > { %v5995_v11 = vpop.eup %5994  ;;  %v3866_v4 = vmul.f32 %v5993_v58, %v5987_v7  ;;  %v5021_v7 = vpack.c.bf16 %v4361_v62, %v4360_v18 }
0x106b   : > { %v5997_v32 = vpop.eup %5996  ;;  %v3864_v33 = vmul.f32 %v5995_v11, %v7528_v57  ;;  %v4364_v11 = vld [vmem:[%s7704_s6 + $0x20] sm:$0xff] }
0x106c   : > { %v5999_v53 = vpop.eup %5998  ;;  %v3859_v2 = vadd.f32 1.0, %v5997_v32 }
0x106d   : > { %v7558_v24 = vadd.f32 %v3866_v4, %v3864_v33  ;;  %v3867_v54 = vmul.f32 %v5999_v53, %v5991_v25  ;;  %v6001_v56 = vpop.eup %6000  ;;  %v4363_v25 = vld [vmem:[%s7704_s6 + $0x18] sm:$0xff]  ;;  %v4365_v4 = vld [vmem:[%s7704_s6 + $0x28] sm:$0xff]  ;;  %v4366_v33 = vld [vmem:[%s7704_s6 + $0x30] sm:$0xff] }
0x106e   : > { %v3865_v48 = vmul.f32 %v6001_v56, %v7532_v63  ;;  %v6003_v39 = vpop.eup %6002  ;;  %v5484_v63 = vld [vmem:[#allocation9 + $0x20] ss:$16 sps:$4 sm:$0xff]   ;;  %v5025_v58 = vpack.c.bf16 %v4363_v25, %v4362_v35  ;;  %v5029_v32 = vpack.c.bf16 %v4365_v4, %v4364_v11  ;;  %v4367_v53 = vld [vmem:[%s7704_s6 + $0x38] sm:$0xff]  ;;  %v4369_v56 = vld [vmem:[%s7704_s6 + $0x48] sm:$0xff] }
0x106f   : > { %6004 = vtanh.f32 %v7558_v24  ;;  %v5033_v55 = vpack.c.bf16 %v4367_v53, %v4366_v33 }
0x1070   : > { %v7562_v23 = vadd.f32 %v3867_v54, %v3865_v48  ;;  %6006 = vrcp.f32 %v3859_v2  ;;  %v4368_v54 = vld [vmem:[%s7704_s6 + $0x40] sm:$0xff]  ;;  %v4370_v48 = vld [vmem:[%s7704_s6 + $0x50] sm:$0xff] }
0x1071   : > { %v5037_v2 = vpack.c.bf16 %v4369_v56, %v4368_v54 }
0x1072   : > { %6008 = vtanh.f32 %v7562_v23 }
0x1079   : > { %v6005_v45 = vpop.eup %6004 }
0x107a   : > { %v6007_v57 = vpop.eup %6006  ;;  %v3872_v38 = vmul.f32 %v6005_v45, %v6003_v39  ;;  %v4371_v39 = vld [vmem:[%s7704_s6 + $0x58] sm:$0xff] }
0x107b   : > { %v5041_v45 = vpack.c.bf16 %v4371_v39, %v4370_v48 }
0x107c   : > { %v6009_v46 = vpop.eup %6008 }
0x107d   : > { %v3873_v47 = vmul.f32 %v6009_v46, %v6007_v57  ;;  %v4372_v57 = vld [vmem:[%s7704_s6 + $0x60] sm:$0xff]  ;;  %v4373_v46 = vld [vmem:[%s7704_s6 + $0x68] sm:$0xff] }
0x107f   : > { %v3883_v60 = vpack.c.bf16 %v3873_v47, %v3872_v38  ;;  %v5045_v38 = vpack.c.bf16 %v4373_v46, %v4372_v57  ;;  %v4376_v47 = vld [vmem:[%s7705_s7] sm:$0xff] }
0x1081   : > { %3917 = vmatmul.mubr.bf16.vlgmr.msra.gmra.mrb[60].mxu0 %v3883_v60  ;;  %3960 = vmatmul.mubr.bf16.vlgmr.msra.gmra.mrb[60].mxu1 %v3883_v60 }
0x1082   : > { %4245 = vmatpush1.bf16.msra.mxu0 %v5481_v6  ;;  %4286 = vmatpush1.bf16.msra.mxu1 %v5490_v8  ;;  %v4377_v6 = vld [vmem:[%s7705_s7 + $0x8] sm:$0xff]  ;;  %v4374_v8 = vld [vmem:[%s7704_s6 + $0x70] sm:$0xff] }
0x1083   : > { %4246 = vmatprep.subr.bf16.mxu0 %v5486_v12  ;;  %4287 = vmatprep.subr.bf16.mxu1 %v5498_v21  ;;  %v4989_v60 = vpack.c.bf16 %v4377_v6, %v4376_v47  ;;  %v4375_v12 = vld [vmem:[%s7704_s6 + $0x78] sm:$0xff] }
0x1084   : > { %4276 = vmatprep.mubr.bf16.mxu0 %v6283_v17  ;;  %4317 = vmatprep.mubr.bf16.mxu1 %v6283_v17  ;;  %v5514_v17 = vld [vmem:[#allocation9 + $0x88] ss:$16 sps:$4 sm:$0xff]   ;;  %v5049_v21 = vpack.c.bf16 %v4375_v12, %v4374_v8  ;;  %v4061_v8 = vld [vmem:[%s7703_s5] sm:$0xf] }
0x1086   : > { %4247 = vmatpush1.bf16.msra.mxu0 %v5484_v63  ;;  %4288 = vmatpush1.bf16.msra.mxu1 %v5496_v43  ;;  %v4378_v63 = vld [vmem:[%s7705_s7 + $0x10] sm:$0xff]  ;;  %v4379_v43 = vld [vmem:[%s7705_s7 + $0x18] sm:$0xff] }
0x1087   : > { %4248 = vmatprep.subr.bf16.mxu0 %v5489_v27  ;;  %4289 = vmatprep.subr.bf16.mxu1 %v5504_v34  ;;  %v4993_v27 = vpack.c.bf16 %v4379_v43, %v4378_v63  ;;  %v4380_v34 = vld [vmem:[%s7705_s7 + $0x20] sm:$0xff]  ;;  %v4066_v43 = vrot.slane %v4061_v8, %v616_v37 }
0x108a   : > { %4249 = vmatpush1.bf16.msra.mxu0 %v5487_v51  ;;  %4290 = vmatpush1.bf16.msra.mxu1 %v5502_v9  ;;  %v4381_v51 = vld [vmem:[%s7705_s7 + $0x28] sm:$0xff] }
0x108b   : > { %4250 = vmatprep.subr.bf16.mxu0 %v5495_v13  ;;  %4291 = vmatprep.subr.bf16.mxu1 %v5510_v15  ;;  %v4997_v9 = vpack.c.bf16 %v4381_v51, %v4380_v34  ;;  %v4382_v13 = vld [vmem:[%s7705_s7 + $0x30] sm:$0xff]  ;;  %v4383_v15 = vld [vmem:[%s7705_s7 + $0x38] sm:$0xff] }
0x108e   : > { %4251 = vmatpush1.bf16.msra.mxu0 %v5493_v10  ;;  %4292 = vmatpush1.bf16.msra.mxu1 %v5508_v16  ;;  %v5001_v10 = vpack.c.bf16 %v4383_v15, %v4382_v13  ;;  %v4384_v16 = vld [vmem:[%s7705_s7 + $0x40] sm:$0xff] }
0x108f   : > { %4252 = vmatprep.subr.bf16.mxu0 %v5501_v19  ;;  %4293 = vmatprep.subr.bf16.mxu1 %v5516_v50  ;;  %v4385_v19 = vld [vmem:[%s7705_s7 + $0x48] sm:$0xff] }
0x1090   : > { %v5005_v50 = vpack.c.bf16 %v4385_v19, %v4384_v16  ;;  %v4074_v16 = vrot.slane %v4061_v8, %v628_v44 }
0x1092   : > { %4253 = vmatpush1.bf16.msra.mxu0 %v5499_v1  ;;  %4294 = vmatpush1.bf16.msra.mxu1 %v5514_v17  ;;  %v4386_v1 = vld [vmem:[%s7705_s7 + $0x50] sm:$0xff]  ;;  %v4387_v17 = vld [vmem:[%s7705_s7 + $0x58] sm:$0xff] }
0x1093   : > { %4254 = vmatprep.subr.bf16.mxu0 %v5507_v14  ;;  %4295 = vmatprep.subr.bf16.mxu1 %v5522_v29  ;;  %v4388_v14 = vld [vmem:[%s7705_s7 + $0x60] sm:$0xff]  ;;  %v5009_v29 = vpack.c.bf16 %v4387_v17, %v4386_v1 }
0x1096   : > { %4255 = vmatpush1.bf16.msra.mxu0 %v5505_v0  ;;  %4296 = vmatpush1.bf16.msra.mxu1 %v5520_v20  ;;  %v4389_v0 = vld [vmem:[%s7705_s7 + $0x68] sm:$0xff] }
0x1097   : > { %4256 = vmatprep.subr.bf16.mxu0 %v5513_v31  ;;  %4297 = vmatprep.subr.bf16.mxu1 %v5526_v22  ;;  %v5013_v20 = vpack.c.bf16 %v4389_v0, %v4388_v14  ;;  %v4390_v31 = vld [vmem:[%s7705_s7 + $0x70] sm:$0xff]  ;;  %v4391_v22 = vld [vmem:[%s7705_s7 + $0x78] sm:$0xff] }
0x109a   : > { %4257 = vmatpush1.bf16.msra.mxu0 %v5511_v52  ;;  %4298 = vmatpush1.bf16.msra.mxu1 %v5524_v59  ;;  %v5017_v52 = vpack.c.bf16 %v4391_v22, %v4390_v31 }
0x109b   : > { %4258 = vmatprep.subr.bf16.mxu0 %v5519_v61  ;;  %4299 = vmatprep.subr.bf16.mxu1 %v5529_v28 }
0x109e   : > { %4259 = vmatpush1.bf16.msra.mxu0 %v5517_v49  ;;  %4300 = vmatpush1.bf16.msra.mxu1 %v5527_v42 }
0x109f   : > { %5022 = vmatprep.subr.bf16.mxu0 %v5021_v7  ;;  %4990 = vmatprep.subr.bf16.mxu1 %v4989_v60 }
0x10a1   : > { %4277 = vmatmul.mubr.bf16.vlgmr.msra.gmra.mrb[64].mxu0 %v5523_v5  ;;  %4318 = vmatmul.mubr.bf16.vlgmr.msra.gmra.mrb[64].mxu1 %v5523_v5 }
0x10a2   : > { %5024 = vmatpush3.bf16.msra.mxu0 %v5021_v7  ;;  %4992 = vmatpush3.bf16.msra.mxu1 %v4989_v60 }
0x10a3   : > { %5026 = vmatprep.subr.bf16.mxu0 %v5025_v58  ;;  %4994 = vmatprep.subr.bf16.mxu1 %v4993_v27 }
0x10a6   : > { %5028 = vmatpush3.bf16.msra.mxu0 %v5025_v58  ;;  %4996 = vmatpush3.bf16.msra.mxu1 %v4993_v27 }
0x10a7   : > { %5030 = vmatprep.subr.bf16.mxu0 %v5029_v32  ;;  %4998 = vmatprep.subr.bf16.mxu1 %v4997_v9 }
0x10aa   : > { %5032 = vmatpush3.bf16.msra.mxu0 %v5029_v32  ;;  %5000 = vmatpush3.bf16.msra.mxu1 %v4997_v9 }
0x10ab   : > { %5034 = vmatprep.subr.bf16.mxu0 %v5033_v55  ;;  %5002 = vmatprep.subr.bf16.mxu1 %v5001_v10 }
0x10ae   : > { %5036 = vmatpush3.bf16.msra.mxu0 %v5033_v55  ;;  %5004 = vmatpush3.bf16.msra.mxu1 %v5001_v10 }
0x10af   : > { %5038 = vmatprep.subr.bf16.mxu0 %v5037_v2  ;;  %5006 = vmatprep.subr.bf16.mxu1 %v5005_v50 }
0x10b2   : > { %5040 = vmatpush3.bf16.msra.mxu0 %v5037_v2  ;;  %5008 = vmatpush3.bf16.msra.mxu1 %v5005_v50 }
0x10b3   : > { %5042 = vmatprep.subr.bf16.mxu0 %v5041_v45  ;;  %5010 = vmatprep.subr.bf16.mxu1 %v5009_v29 }
0x10b6   : > { %5044 = vmatpush3.bf16.msra.mxu0 %v5041_v45  ;;  %5012 = vmatpush3.bf16.msra.mxu1 %v5009_v29 }
0x10b7   : > { %5046 = vmatprep.subr.bf16.mxu0 %v5045_v38  ;;  %5014 = vmatprep.subr.bf16.mxu1 %v5013_v20 }
0x10ba   : > { %5048 = vmatpush3.bf16.msra.mxu0 %v5045_v38  ;;  %5016 = vmatpush3.bf16.msra.mxu1 %v5013_v20 }
0x10bb   : > { %5050 = vmatprep.subr.bf16.mxu0 %v5049_v21  ;;  %5018 = vmatprep.subr.bf16.mxu1 %v5017_v52 }
0x10be   : > { %5052 = vmatpush3.bf16.msra.mxu0 %v5049_v21  ;;  %5020 = vmatpush3.bf16.msra.mxu1 %v5017_v52 }
0x1154   : > { %v3918_v59 = vpop.f32.mrb[60].mxu0  ;;  %v3961_v61 = vpop.f32.mrb[60].mxu1 }
0x1155   : > { %v5113_v28 = vadd.f32 %v3918_v59, %v6707_v40  ;;  %v3920_v49 = vpop.f32.mrb[61].mxu0  ;;  %v3963_v42 = vpop.f32.mrb[61].mxu1  ;;  %v5177_v54 = vadd.f32 %v3961_v61, %v6723_v30 }
0x1156   : > { %v5114_v5 = vadd.f32 %v3920_v49, %v6709_v41  ;;  %v3922_v18 = vpop.f32.mrb[62].mxu0  ;;  %v3965_v62 = vpop.f32.mrb[62].mxu1  ;;  %v5178_v53 = vadd.f32 %v3963_v42, %v6718_v26  ;;  %v4070_v49 = vrot.slane %v4061_v8, %v624_v3 }
0x1157   : > { %v4834_v7 = vmul.f32 -1.442695, %v5113_v28  ;;  %v5115_v35 = vadd.f32 %v3922_v18, %v6707_v40  ;;  %v3924_v25 = vpop.f32.mrb[63].mxu0  ;;  %v3967_v58 = vpop.f32.mrb[63].mxu1 }
0x1158   : > { %v4836_v11 = vmul.f32 -1.442695, %v5114_v5  ;;  %v5116_v4 = vadd.f32 %v3924_v25, %v6709_v41  ;;  %v5180_v55 = vadd.f32 %v3967_v58, %v6718_v26  ;;  %v4838_v56 = vmul.f32 -1.442695, %v5178_v53 }
0x1159   : > { %6010 = vpow2.f32 %v4834_v7  ;;  %v4835_v32 = vmul.f32 -1.442695, %v5115_v35  ;;  %v5179_v41 = vadd.f32 %v3965_v62, %v6723_v30 }
0x115a   : > { %6012 = vpow2.f32 %v4836_v11  ;;  %v4837_v33 = vmul.f32 -1.442695, %v5116_v4  ;;  %v4839_v2 = vmul.f32 -1.442695, %v5180_v55 }
0x115b   : > { %6014 = vpow2.f32 %v4835_v32 }
0x115c   : > { %6016 = vpow2.f32 %v4837_v33 }
0x115d   : > { %6018 = vtanh.f32 %v5177_v54 }
0x115e   : > { %6020 = vpow2.f32 %v4838_v56 }
0x115f   : > { %6022 = vpow2.f32 %v4839_v2 }
0x1163   : > { %v6011_v40 = vpop.eup %6010 }
0x1164   : > { %v6013_v48 = vpop.eup %6012  ;;  %v3984_v39 = vadd.f32 1.0, %v6011_v40 }
0x1165   : > { %v3996_v45 = vadd.f32 1.0, %v6013_v48  ;;  %v6015_v57 = vpop.eup %6014 }
0x1166   : > { %6024 = vrcp.f32 %v3984_v39  ;;  %v3985_v46 = vadd.f32 1.0, %v6015_v57  ;;  %v6017_v38 = vpop.eup %6016 }
0x1167   : > { %6026 = vrcp.f32 %v3996_v45  ;;  %v3997_v26 = vadd.f32 1.0, %v6017_v38  ;;  %v6019_v47 = vpop.eup %6018 }
0x1168   : > { %6028 = vtanh.f32 %v5179_v41  ;;  %v6021_v6 = vpop.eup %6020 }
0x1169   : > { %6030 = vrcp.f32 %v3985_v46  ;;  %v6023_v60 = vpop.eup %6022  ;;  %v4010_v63 = vadd.f32 1.0, %v6021_v6 }
0x116a   : > { %6032 = vrcp.f32 %v3997_v26  ;;  %v4011_v13 = vadd.f32 1.0, %v6023_v60 }
0x116b   : > { %6034 = vrcp.f32 %v4010_v63 }
0x1170   : > { %v6025_v12 = vpop.eup %6024 }
0x1171   : > { %v6027_v30 = vpop.eup %6026  ;;  %v4018_v21 = vmul.f32 %v6025_v12, %v6019_v47  ;;  %v4879_v12 = vld [vmem:[#allocation3] ss:$0 sm:$0xff] }
0x1172   : > { %v6029_v27 = vpop.eup %6028  ;;  %v4016_v34 = vmul.f32 %v6027_v30, %v7558_v24 }
0x1173   : > { %v6031_v51 = vpop.eup %6030 }
0x1174   : > { %v4019_v9 = vmul.f32 %v6031_v51, %v6029_v27  ;;  %v4278_v15 = vpop.f32.mrb[64].mxu0  ;;  %v4319_v10 = vpop.f32.mrb[64].mxu1  ;;  %v4020_v19 = vadd.f32 %v4018_v21, %v4016_v34 }
0x1175   : > { %v6033_v50 = vpop.eup %6032  ;;  %v4279_v1 = vadd.f32 %v4278_v15, %v4066_v43  ;;  %v4280_v17 = vpop.f32.mrb[65].mxu0  ;;  %v4320_v18 = vadd.f32 %v4319_v10, %v4070_v49 }
0x1176   : > { %v4321_v14 = vpop.f32.mrb[65].mxu1  ;;  %v4017_v29 = vmul.f32 %v6033_v50, %v7562_v23  ;;  %v4281_v37 = vpop.f32.mrb[66].mxu0  ;;  %6036 = vtanh.f32 %v4020_v19 }
0x1177   : > { %v4323_v0 = vpop.f32.mrb[66].mxu1  ;;  %v4875_v24 = vmul.f32 -1.442695, %v4279_v1  ;;  %v4282_v20 = vadd.f32 %v4281_v37, %v4066_v43  ;;  %v4283_v31 = vpop.f32.mrb[67].mxu0  ;;  %6038 = vrcp.f32 %v4011_v13  ;;  %v4322_v59 = vadd.f32 %v4321_v14, %v4074_v16 }
0x1178   : > { %v4325_v22 = vpop.f32.mrb[67].mxu1  ;;  %v4021_v52 = vadd.f32 %v4019_v9, %v4017_v29  ;;  %v6035_v23 = vpop.eup %6034  ;;  %v4324_v25 = vadd.f32 %v4323_v0, %v4070_v49 }
0x1179   : > { %6040 = vpow2.f32 %v4875_v24  ;;  %v4876_v44 = vmul.f32 -1.442695, %v4282_v20  ;;  %v4326_v61 = vadd.f32 %v4325_v22, %v4074_v16  ;;  %v4877_v28 = vmul.f32 -1.442695, %v4322_v59 }
0x117a   : > { %6042 = vtanh.f32 %v4021_v52 }
0x117b   : > { %6044 = vpow2.f32 %v4876_v44  ;;  %v4878_v42 = vmul.f32 -1.442695, %v4326_v61 }
0x117c   : > { %6046 = vpow2.f32 %v4877_v28 }
0x117d   : > { %6048 = vpow2.f32 %v4878_v42 }
0x117e   : > { %6050 = vtanh.f32 %v4320_v18 }
0x1180   : > { %v6037_v5 = vpop.eup %6036 }
0x1181   : > { %v4024_v62 = vmul.f32 %v6037_v5, %v6035_v23  ;;  %v6039_v7 = vpop.eup %6038 }
0x1183   : > { %v6041_v35 = vpop.eup %6040  ;;  %4986 = vmatprep.mubr.f32.mxu0 %v4024_v62 }
0x1184   : > { %v6043_v58 = vpop.eup %6042  ;;  %v4334_v11 = vadd.f32 1.0, %v6041_v35 }
0x1185   : > { %v6045_v4 = vpop.eup %6044  ;;  %v4025_v32 = vmul.f32 %v6043_v58, %v6039_v7 }
0x1186   : > { %6052 = vrcp.f32 %v4334_v11  ;;  %v4335_v33 = vadd.f32 1.0, %v6045_v4  ;;  %v6047_v36 = vpop.eup %6046 }
0x1187   : > { %6054 = vtanh.f32 %v4324_v25  ;;  %4987 = vmatmul.mubr.f32.vlgmr.msra.gmra.mrb[68].mxu0 %v4025_v32  ;;  %v6049_v3 = vpop.eup %6048  ;;  %v4348_v53 = vadd.f32 1.0, %v6047_v36 }
0x1188   : > { %6056 = vrcp.f32 %v4335_v33  ;;  %v6051_v55 = vpop.eup %6050  ;;  %v4349_v56 = vadd.f32 1.0, %v6049_v3 }
0x1189   : > { %6058 = vrcp.f32 %v4348_v53 }
0x1190   : > { %v6053_v54 = vpop.eup %6052 }
0x1191   : > { %v6055_v2 = vpop.eup %6054  ;;  %v4354_v40 = vmul.f32 %v6053_v54, %v6051_v55 }
0x1192   : > { %v6057_v48 = vpop.eup %6056 }
0x1193   : > { %6060 = vtanh.f32 %v4354_v40  ;;  %v4355_v39 = vmul.f32 %v6057_v48, %v6055_v2  ;;  %v6059_v41 = vpop.eup %6058 }
0x1194   : > { %6062 = vrcp.f32 %v4349_v56 }
0x1195   : > { %6064 = vtanh.f32 %v4355_v39 }
0x119d   : > { %v6061_v45 = vpop.eup %6060 }
0x119e   : > { %v6063_v57 = vpop.eup %6062  ;;  %v4358_v46 = vmul.f32 %v6061_v45, %v6059_v41 }
0x119f   : > { %v6065_v38 = vpop.eup %6064 }
0x11a0   : > { %4951 = vmatprep.mubr.f32.mxu1 %v4358_v46  ;;  %v4359_v26 = vmul.f32 %v6065_v38, %v6063_v57 }
0x11a2   : > { %4952 = vmatmul.mubr.f32.vlgmr.msra.gmra.mrb[68].mxu1 %v4359_v26 }
0x125a   : > { %v4988_v47 = vpop.f32.mrb[68].mxu0 }
0x125b   : > { %v4533_v6 = vpop.f32.mrb[69].mxu0 }
0x1275   : > { %v4953_v8 = vpop.f32.mrb[68].mxu1 }
0x1276   : > { %v4539_v60 = vadd.f32 %v4988_v47, %v4953_v8  ;;  %v4458_v30 = vpop.f32.mrb[69].mxu1 }
0x1277   : > { %v4534_v21 = vadd.f32 %v4533_v6, %v4458_v30 }
0x1278   : > { %v4550_v43 = vadd.f32 %v4879_v12, %v4539_v60 }
0x1279   : > { %v4549_v63 = vadd.f32 %v4879_v12, %v4534_v21 }
0x127a   : > { %4553 = vst.msk [vmem:[%s545_s30 + $0x8] sm:$0xff] %vm4551_vm0, %v4550_v43 }
0x127b   : > { %4552 = vst.msk [vmem:[%s545_s30] sm:$0xff] %vm4551_vm0, %v4549_v63 }
0x127c PF: > { %s7725_s13 = sld [smem:[#allocation12_spill]]  ;;  %s7726_s23 = sld [smem:[#allocation13_spill]] }
0x127d   : > { %s7727_s11 = smov %s6272_s12 }
0x1282   : > { %p20_p1 = scmp.ge.s32.totalorder %s7725_s13, 4   ;;  %s7728_s12 = smov %s7726_s23 }
0x1284   :  { %22 = sbr.rel (!%p20_p1) target bundleno = 6 (0x6), region = 161 }
0x128b   :  { %4576 = vsyncpa [#allocation6], 1 }
0x128c   :  { %4578 = vsyncpa [#allocation6 + $0x1], 1 }
0x128d   :  { %4579 = vsyncpa [#allocation8], 1 }

</bundles_post_ra>
